<compile_context>
chip_gen: v5e
topology: v5e:2x2
jax: 0.10.0
libtpu: 0.0.40
codegen_flags: <defaults>
</compile_context>

<pallas_src>
import functools

import numpy as np

import jax
import jax.numpy as jnp
from jax.experimental import pallas as pl
from jax.experimental.pallas import tpu as pltpu


# MXU operand precision (accumulation is always f32).  bf16 halves operand
# traffic and uses the native MXU rate on v5e/v6e/v7x; set to jnp.float32 for
# bit-faithful f32 operands.
MXU_OPERAND_DTYPE = jnp.bfloat16


# ----------------------------------------------------------------------------
# Pallas kernels
# ----------------------------------------------------------------------------
def _deconv_bn_lrelu_kernel(w_ref, p_ref, g_ref, b_ref, o_ref, *, cout, eps, alpha):
    """Packed-parity deconv matmul fused with BatchNorm3d (batch stats) + LeakyReLU.

    w_ref: (Cout*8, 27*Cin)   packed weights        (bf16/f32)
    p_ref: (27*Cin, M)        patch matrix, M=N*E^3 (bf16/f32)
    g_ref, b_ref: (Cout, 1)   BN affine params      (f32)
    o_ref: (Cout*8, M)        row = co*8 + parity   (f32)
    """
    y = jnp.dot(w_ref[...], p_ref[...], preferred_element_type=jnp.float32)
    m = y.shape[1]
    inv_cnt = 1.0 / (8.0 * m)          # 8 parities * M coarse cells = all N*D*H*W
    for c in range(cout):              # static unroll, cout <= 4
        blk = y[8 * c:8 * c + 8, :]                            # (8, M): channel c
        mu = jnp.sum(jnp.sum(blk, axis=1, keepdims=True),
                     axis=0, keepdims=True) * inv_cnt          # (1, 1)
        xc = blk - mu
        var = jnp.sum(jnp.sum(xc * xc, axis=1, keepdims=True),
                      axis=0, keepdims=True) * inv_cnt         # biased (PyTorch train BN)
        scale = jax.lax.rsqrt(var + eps) * g_ref[c:c + 1, :]
        z = xc * scale + b_ref[c:c + 1, :]
        o_ref[8 * c:8 * c + 8, :] = jnp.where(z > 0, z, alpha * z)


def _deconv_relu_kernel(w_ref, p_ref, o_ref):
    """Packed-parity deconv matmul fused with ReLU (final layer, no BN)."""
    y = jnp.dot(w_ref[...], p_ref[...], preferred_element_type=jnp.float32)
    o_ref[...] = jnp.maximum(y, 0.0)


# ----------------------------------------------------------------------------
# Host-side packing / layout helpers (thin XLA glue on tiny tensors)
# ----------------------------------------------------------------------------
def _parity_tap_selector():
    # S[r, t, k] = 1 iff output parity r reads kernel index k at padded-input tap t.
    s = np.zeros((2, 3, 4), np.float32)
    for r in (0, 1):
        for t in range(3):
            k = 3 + r - 2 * t
            if 0 <= k <= 3 and 0 <= t - r <= 1:
                s[r, t, k] = 1.0
    return s


_SEL = _parity_tap_selector()


def pack_deconv_weight(w):
    """(Cin, Cout, 4, 4, 4) -> (Cout*8, 27*Cin).

    Row index  = co*8 + (rd*4 + rh*2 + rw)   (output parity)
    Col index  = (td*9 + th*3 + tw)*Cin + cin (padded-input tap, channel minor)
    """
    cin, cout = w.shape[0], w.shape[1]
    s = jnp.asarray(_SEL, w.dtype)
    packed = jnp.einsum('ipa,jqb,krc,nmabc->mijkpqrn', s, s, s, w)
    return packed.reshape(cout * 8, 27 * cin)


def build_patch_matrix(x):
    """(N, Cin, E, E, E) -> (27*Cin, N*E^3): 27 padded taps on rows (channel minor),
    coarse output position (n, sd, sh, sw) on columns (lanes)."""
    n, cin, e = x.shape[0], x.shape[1], x.shape[2]
    xp = jnp.pad(x, ((0, 0), (0, 0), (1, 1), (1, 1), (1, 1)))
    taps = [xp[:, :, td:td + e, th:th + e, tw:tw + e]
            for td in range(3) for th in range(3) for tw in range(3)]
    p = jnp.stack(taps, axis=0)                       # (27, N, Cin, E, E, E)
    p = jnp.transpose(p, (0, 2, 1, 3, 4, 5))          # (27, Cin, N, E, E, E)
    return p.reshape(27 * cin, n * e * e * e)


def parity_to_spatial(y, n, cout, e):
    """(Cout*8, N*E^3) kernel output -> (N, Cout, 2E, 2E, 2E)."""
    y = y.reshape(cout, 2, 2, 2, n, e, e, e)
    y = jnp.transpose(y, (4, 0, 5, 1, 6, 2, 7, 3))    # (N, Cout, E,2, E,2, E,2)
    return y.reshape(n, cout, 2 * e, 2 * e, 2 * e)


# ----------------------------------------------------------------------------
# Layer wrappers
# ----------------------------------------------------------------------------
def deconv_bn_lrelu_pallas(x, w, gamma, beta, *, eps=1e-5, alpha=0.2):
    """ConvTranspose3d(k4,s2,p1,no bias) + BatchNorm3d(batch stats) + LeakyReLU."""
    n, _, e = x.shape[0], x.shape[1], x.shape[2]
    cout = w.shape[1]
    m = n * e ** 3
    pt = build_patch_matrix(x.astype(MXU_OPERAND_DTYPE))          # (27*Cin, M)
    wt = pack_deconv_weight(w).astype(MXU_OPERAND_DTYPE)          # (Cout*8, 27*Cin)
    y = pl.pallas_call(
        functools.partial(_deconv_bn_lrelu_kernel, cout=cout, eps=eps, alpha=alpha),
        out_shape=jax.ShapeDtypeStruct((cout * 8, m), jnp.float32),
    )(wt, pt,
      gamma.reshape(cout, 1).astype(jnp.float32),
      beta.reshape(cout, 1).astype(jnp.float32))
    return parity_to_spatial(y, n, cout, e)


def deconv_relu_pallas(x, w, *, m_blocks=2):
    """Final ConvTranspose3d(k4,s2,p1,no bias) + ReLU, M split across a parallel grid."""
    n, cin, e = x.shape[0], x.shape[1], x.shape[2]
    cout = w.shape[1]
    m = n * e ** 3
    k = 27 * cin
    c8 = cout * 8
    pt = build_patch_matrix(x.astype(MXU_OPERAND_DTYPE))          # (K, M)
    wt = pack_deconv_weight(w).astype(MXU_OPERAND_DTYPE)          # (C8, K)
    mb = m_blocks if (m % m_blocks == 0 and (m // m_blocks) % 128 == 0) else 1
    y = pl.pallas_call(
        _deconv_relu_kernel,
        out_shape=jax.ShapeDtypeStruct((c8, m), jnp.float32),
        grid=(mb,),
        in_specs=[pl.BlockSpec((c8, k), lambda i: (0, 0)),
                  pl.BlockSpec((k, m // mb), lambda i: (0, i))],
        out_specs=pl.BlockSpec((c8, m // mb), lambda i: (0, i)),
        compiler_params=pltpu.CompilerParams(
            dimension_semantics=("parallel",)),
    )(wt, pt)
    return parity_to_spatial(y, n, cout, e)


def decoder_forward(x, params, *, alpha):
    for (w, gamma, beta) in params["hidden"]:
        x = deconv_bn_lrelu_pallas(x, w, gamma, beta, alpha=alpha)
    return deconv_relu_pallas(x, params["final_w"])


# ----------------------------------------------------------------------------
# Pure-JAX reference (matches the kernel's bf16 MXU-operand rounding so the
# comparison isolates kernel/layout correctness).
# ----------------------------------------------------------------------------
def _conv_transpose3d_ref(x, w):
    xc = x.astype(MXU_OPERAND_DTYPE).astype(jnp.float32)
    wc = w.astype(MXU_OPERAND_DTYPE).astype(jnp.float32)
    wf = jnp.flip(wc, axis=(2, 3, 4))              # (Cin, Cout, 4,4,4) flipped
    wf = jnp.transpose(wf, (1, 0, 2, 3, 4))        # OIDHW
    return jax.lax.conv_general_dilated(
        xc, wf, window_strides=(1, 1, 1), padding=[(2, 2)] * 3,
        lhs_dilation=(2, 2, 2),
        dimension_numbers=("NCDHW", "OIDHW", "NCDHW"),
        preferred_element_type=jnp.float32)


def _bn_lrelu_ref(x, gamma, beta, eps, alpha):
    mean = jnp.mean(x, axis=(0, 2, 3, 4), keepdims=True)
    var = jnp.mean((x - mean) ** 2, axis=(0, 2, 3, 4), keepdims=True)
    y = (x - mean) / jnp.sqrt(var + eps)
    y = y * gamma.reshape(1, -1, 1, 1, 1) + beta.reshape(1, -1, 1, 1, 1)
    return jnp.where(y > 0, y, alpha * y)


def decoder_forward_ref(x, params, *, alpha):
    for (w, gamma, beta) in params["hidden"]:
        x = _conv_transpose3d_ref(x, w)
        x = _bn_lrelu_ref(x, gamma, beta, 1e-5, alpha)
    x = _conv_transpose3d_ref(x, params["final_w"])
    return jnp.maximum(x, 0.0)


# ----------------------------------------------------------------------------
# Deterministic parameter init (synthetic; matches the module's shapes)
# ----------------------------------------------------------------------------
def init_params(key, embedding_channel, ch_mult, full_deconv_limit):
    params = {"hidden": []}
    ch = embedding_channel
    for _ in range(full_deconv_limit):
        key, k1, k2, k3 = jax.random.split(key, 4)
        w = 0.1 * jax.random.normal(k1, (ch, ch // ch_mult, 4, 4, 4), jnp.float32)
        gamma = 1.0 + 0.1 * jax.random.normal(k2, (ch // ch_mult,), jnp.float32)
        beta = 0.1 * jax.random.normal(k3, (ch // ch_mult,), jnp.float32)
        params["hidden"].append((w, gamma, beta))
        ch //= ch_mult
    key, k1 = jax.random.split(key)
    params["final_w"] = 0.1 * jax.random.normal(
        k1, (ch, ch // ch_mult, 4, 4, 4), jnp.float32)
    return params


if __name__ == "__main__":
    # Decoder(embedded_cube_edge=4, ch_mult=2, deconv_bias=False,
    #         fc1_hidden_dim=*, fc2_output_dim=* (unused in forward),
    #         embedding_channel=8, leakyrelu_const=0.2, full_deconv_limit=2)
    BATCH = 2
    EMBEDDED_CUBE_EDGE = 4
    EMBEDDING_CHANNEL = 8
    CH_MULT = 2
    FULL_DECONV_LIMIT = 2
    LEAKYRELU_CONST = 0.2

    key = jax.random.PRNGKey(0)
    kx, kp = jax.random.split(key)
    x = jax.random.normal(
        kx, (BATCH, EMBEDDING_CHANNEL,
             EMBEDDED_CUBE_EDGE, EMBEDDED_CUBE_EDGE, EMBEDDED_CUBE_EDGE),
        jnp.float32)
    params = init_params(kp, EMBEDDING_CHANNEL, CH_MULT, FULL_DECONV_LIMIT)

    fwd = jax.jit(functools.partial(decoder_forward, alpha=LEAKYRELU_CONST))
    out = jax.block_until_ready(fwd(x, params))

    expected_edge = EMBEDDED_CUBE_EDGE * (2 ** (FULL_DECONV_LIMIT + 1))
    assert out.shape == (BATCH, 1, expected_edge, expected_edge, expected_edge), out.shape

    ref = decoder_forward_ref(x, params, alpha=LEAKYRELU_CONST)
    max_err = float(jnp.max(jnp.abs(out - ref)))
    assert jnp.allclose(out, ref, rtol=3e-2, atol=3e-2), f"max abs err = {max_err}"

    print("KERNEL_OK")
</pallas_src>

<mosaic_0001>
module attributes {stable_mosaic.version = 11 : i64} {
  func.func @_deconv_bn_lrelu_kernel(%arg0: memref<32x216xbf16, #tpu.memory_space<vmem>>, %arg1: memref<216x128xbf16, #tpu.memory_space<vmem>>, %arg2: memref<4x1xf32, #tpu.memory_space<vmem>>, %arg3: memref<4x1xf32, #tpu.memory_space<vmem>>, %arg4: memref<32x128xf32, #tpu.memory_space<vmem>>) attributes {dimension_semantics = [], scalar_prefetch = 0 : i64, scratch_operands = 0 : i64, tpu.core_type = #tpu.core_type<tc>} {
    %c0 = arith.constant 0 : index
    %c0_0 = arith.constant 0 : index
    %0 = vector.load %arg0[%c0, %c0_0] : memref<32x216xbf16, #tpu.memory_space<vmem>>, vector<32x216xbf16>
    %c0_1 = arith.constant 0 : index
    %c0_2 = arith.constant 0 : index
    %1 = vector.load %arg1[%c0_1, %c0_2] : memref<216x128xbf16, #tpu.memory_space<vmem>>, vector<216x128xbf16>
    %cst = arith.constant dense<0.000000e+00> : vector<32x128xf32>
    %2 = tpu.matmul %0, %1, %cst {dimension_numbers = #tpu.dot_dimension_numbers<[1], [0], [0], [1], [0, 0, 1, 1], [], []>} : vector<32x216xbf16>, vector<216x128xbf16>, vector<32x128xf32> -> vector<32x128xf32>
    %3 = vector.extract_strided_slice %2 {offsets = [0, 0], sizes = [8, 128], strides = [1, 1]} : vector<32x128xf32> to vector<8x128xf32>
    %cst_3 = arith.constant dense<0.000000e+00> : vector<8xf32>
    %4 = vector.multi_reduction <add>, %3, %cst_3 [1] : vector<8x128xf32> to vector<8xf32>
    %5 = vector.shape_cast %4 : vector<8xf32> to vector<8x1xf32>
    %cst_4 = arith.constant dense<0.000000e+00> : vector<1xf32>
    %6 = vector.multi_reduction <add>, %5, %cst_4 [0] : vector<8x1xf32> to vector<1xf32>
    %7 = vector.shape_cast %6 : vector<1xf32> to vector<1x1xf32>
    %cst_5 = arith.constant 9.765625E-4 : f32
    %8 = vector.broadcast %cst_5 : f32 to vector<1x1xf32>
    %9 = arith.mulf %7, %8 : vector<1x1xf32>
    %10 = vector.broadcast %9 : vector<1x1xf32> to vector<8x128xf32>
    %11 = arith.subf %3, %10 : vector<8x128xf32>
    %12 = arith.mulf %11, %11 : vector<8x128xf32>
    %cst_6 = arith.constant dense<0.000000e+00> : vector<8xf32>
    %13 = vector.multi_reduction <add>, %12, %cst_6 [1] : vector<8x128xf32> to vector<8xf32>
    %14 = vector.shape_cast %13 : vector<8xf32> to vector<8x1xf32>
    %cst_7 = arith.constant dense<0.000000e+00> : vector<1xf32>
    %15 = vector.multi_reduction <add>, %14, %cst_7 [0] : vector<8x1xf32> to vector<1xf32>
    %16 = vector.shape_cast %15 : vector<1xf32> to vector<1x1xf32>
    %cst_8 = arith.constant 9.765625E-4 : f32
    %17 = vector.broadcast %cst_8 : f32 to vector<1x1xf32>
    %18 = arith.mulf %16, %17 : vector<1x1xf32>
    %cst_9 = arith.constant 9.99999974E-6 : f32
    %19 = vector.broadcast %cst_9 : f32 to vector<1x1xf32>
    %20 = arith.addf %18, %19 : vector<1x1xf32>
    %21 = math.rsqrt %20 : vector<1x1xf32>
    %c0_10 = arith.constant 0 : index
    %c0_11 = arith.constant 0 : index
    %22 = vector.load %arg2[%c0_10, %c0_11] : memref<4x1xf32, #tpu.memory_space<vmem>>, vector<1x1xf32>
    %23 = arith.mulf %21, %22 : vector<1x1xf32>
    %24 = vector.broadcast %23 : vector<1x1xf32> to vector<8x128xf32>
    %25 = arith.mulf %11, %24 : vector<8x128xf32>
    %c0_12 = arith.constant 0 : index
    %c0_13 = arith.constant 0 : index
    %26 = vector.load %arg3[%c0_12, %c0_13] : memref<4x1xf32, #tpu.memory_space<vmem>>, vector<1x1xf32>
    %27 = vector.broadcast %26 : vector<1x1xf32> to vector<8x128xf32>
    %28 = arith.addf %25, %27 : vector<8x128xf32>
    %cst_14 = arith.constant 0.000000e+00 : f32
    %29 = vector.broadcast %cst_14 : f32 to vector<8x128xf32>
    %30 = arith.cmpf ogt, %28, %29 : vector<8x128xf32>
    %cst_15 = arith.constant 2.000000e-01 : f32
    %31 = vector.broadcast %cst_15 : f32 to vector<8x128xf32>
    %32 = arith.mulf %31, %28 : vector<8x128xf32>
    %33 = arith.select %30, %28, %32 : vector<8x128xi1>, vector<8x128xf32>
    %c0_16 = arith.constant 0 : index
    %c0_17 = arith.constant 0 : index
    %34 = vector.load %arg4[%c0_16, %c0_17] : memref<32x128xf32, #tpu.memory_space<vmem>>, vector<8x128xf32>
    tpu.vector_store %arg4[%c0_16, %c0_17], %33 {strides = array<i32>} : memref<32x128xf32, #tpu.memory_space<vmem>>, vector<8x128xf32>,
    %35 = vector.extract_strided_slice %2 {offsets = [8, 0], sizes = [8, 128], strides = [1, 1]} : vector<32x128xf32> to vector<8x128xf32>
    %cst_18 = arith.constant dense<0.000000e+00> : vector<8xf32>
    %36 = vector.multi_reduction <add>, %35, %cst_18 [1] : vector<8x128xf32> to vector<8xf32>
    %37 = vector.shape_cast %36 : vector<8xf32> to vector<8x1xf32>
    %cst_19 = arith.constant dense<0.000000e+00> : vector<1xf32>
    %38 = vector.multi_reduction <add>, %37, %cst_19 [0] : vector<8x1xf32> to vector<1xf32>
    %39 = vector.shape_cast %38 : vector<1xf32> to vector<1x1xf32>
    %cst_20 = arith.constant 9.765625E-4 : f32
    %40 = vector.broadcast %cst_20 : f32 to vector<1x1xf32>
    %41 = arith.mulf %39, %40 : vector<1x1xf32>
    %42 = vector.broadcast %41 : vector<1x1xf32> to vector<8x128xf32>
    %43 = arith.subf %35, %42 : vector<8x128xf32>
    %44 = arith.mulf %43, %43 : vector<8x128xf32>
    %cst_21 = arith.constant dense<0.000000e+00> : vector<8xf32>
    %45 = vector.multi_reduction <add>, %44, %cst_21 [1] : vector<8x128xf32> to vector<8xf32>
    %46 = vector.shape_cast %45 : vector<8xf32> to vector<8x1xf32>
    %cst_22 = arith.constant dense<0.000000e+00> : vector<1xf32>
    %47 = vector.multi_reduction <add>, %46, %cst_22 [0] : vector<8x1xf32> to vector<1xf32>
    %48 = vector.shape_cast %47 : vector<1xf32> to vector<1x1xf32>
    %cst_23 = arith.constant 9.765625E-4 : f32
    %49 = vector.broadcast %cst_23 : f32 to vector<1x1xf32>
    %50 = arith.mulf %48, %49 : vector<1x1xf32>
    %cst_24 = arith.constant 9.99999974E-6 : f32
    %51 = vector.broadcast %cst_24 : f32 to vector<1x1xf32>
    %52 = arith.addf %50, %51 : vector<1x1xf32>
    %53 = math.rsqrt %52 : vector<1x1xf32>
    %c1 = arith.constant 1 : index
    %c0_25 = arith.constant 0 : index
    %54 = vector.load %arg2[%c1, %c0_25] : memref<4x1xf32, #tpu.memory_space<vmem>>, vector<1x1xf32>
    %55 = arith.mulf %53, %54 : vector<1x1xf32>
    %56 = vector.broadcast %55 : vector<1x1xf32> to vector<8x128xf32>
    %57 = arith.mulf %43, %56 : vector<8x128xf32>
    %c1_26 = arith.constant 1 : index
    %c0_27 = arith.constant 0 : index
    %58 = vector.load %arg3[%c1_26, %c0_27] : memref<4x1xf32, #tpu.memory_space<vmem>>, vector<1x1xf32>
    %59 = vector.broadcast %58 : vector<1x1xf32> to vector<8x128xf32>
    %60 = arith.addf %57, %59 : vector<8x128xf32>
    %cst_28 = arith.constant 0.000000e+00 : f32
    %61 = vector.broadcast %cst_28 : f32 to vector<8x128xf32>
    %62 = arith.cmpf ogt, %60, %61 : vector<8x128xf32>
    %cst_29 = arith.constant 2.000000e-01 : f32
    %63 = vector.broadcast %cst_29 : f32 to vector<8x128xf32>
    %64 = arith.mulf %63, %60 : vector<8x128xf32>
    %65 = arith.select %62, %60, %64 : vector<8x128xi1>, vector<8x128xf32>
    %c8 = arith.constant 8 : index
    %c0_30 = arith.constant 0 : index
    %66 = vector.load %arg4[%c8, %c0_30] : memref<32x128xf32, #tpu.memory_space<vmem>>, vector<8x128xf32>
    tpu.vector_store %arg4[%c8, %c0_30], %65 {strides = array<i32>} : memref<32x128xf32, #tpu.memory_space<vmem>>, vector<8x128xf32>,
    %67 = vector.extract_strided_slice %2 {offsets = [16, 0], sizes = [8, 128], strides = [1, 1]} : vector<32x128xf32> to vector<8x128xf32>
    %cst_31 = arith.constant dense<0.000000e+00> : vector<8xf32>
    %68 = vector.multi_reduction <add>, %67, %cst_31 [1] : vector<8x128xf32> to vector<8xf32>
    %69 = vector.shape_cast %68 : vector<8xf32> to vector<8x1xf32>
    %cst_32 = arith.constant dense<0.000000e+00> : vector<1xf32>
    %70 = vector.multi_reduction <add>, %69, %cst_32 [0] : vector<8x1xf32> to vector<1xf32>
    %71 = vector.shape_cast %70 : vector<1xf32> to vector<1x1xf32>
    %cst_33 = arith.constant 9.765625E-4 : f32
    %72 = vector.broadcast %cst_33 : f32 to vector<1x1xf32>
    %73 = arith.mulf %71, %72 : vector<1x1xf32>
    %74 = vector.broadcast %73 : vector<1x1xf32> to vector<8x128xf32>
    %75 = arith.subf %67, %74 : vector<8x128xf32>
    %76 = arith.mulf %75, %75 : vector<8x128xf32>
    %cst_34 = arith.constant dense<0.000000e+00> : vector<8xf32>
    %77 = vector.multi_reduction <add>, %76, %cst_34 [1] : vector<8x128xf32> to vector<8xf32>
    %78 = vector.shape_cast %77 : vector<8xf32> to vector<8x1xf32>
    %cst_35 = arith.constant dense<0.000000e+00> : vector<1xf32>
    %79 = vector.multi_reduction <add>, %78, %cst_35 [0] : vector<8x1xf32> to vector<1xf32>
    %80 = vector.shape_cast %79 : vector<1xf32> to vector<1x1xf32>
    %cst_36 = arith.constant 9.765625E-4 : f32
    %81 = vector.broadcast %cst_36 : f32 to vector<1x1xf32>
    %82 = arith.mulf %80, %81 : vector<1x1xf32>
    %cst_37 = arith.constant 9.99999974E-6 : f32
    %83 = vector.broadcast %cst_37 : f32 to vector<1x1xf32>
    %84 = arith.addf %82, %83 : vector<1x1xf32>
    %85 = math.rsqrt %84 : vector<1x1xf32>
    %c2 = arith.constant 2 : index
    %c0_38 = arith.constant 0 : index
    %86 = vector.load %arg2[%c2, %c0_38] : memref<4x1xf32, #tpu.memory_space<vmem>>, vector<1x1xf32>
    %87 = arith.mulf %85, %86 : vector<1x1xf32>
    %88 = vector.broadcast %87 : vector<1x1xf32> to vector<8x128xf32>
    %89 = arith.mulf %75, %88 : vector<8x128xf32>
    %c2_39 = arith.constant 2 : index
    %c0_40 = arith.constant 0 : index
    %90 = vector.load %arg3[%c2_39, %c0_40] : memref<4x1xf32, #tpu.memory_space<vmem>>, vector<1x1xf32>
    %91 = vector.broadcast %90 : vector<1x1xf32> to vector<8x128xf32>
    %92 = arith.addf %89, %91 : vector<8x128xf32>
    %cst_41 = arith.constant 0.000000e+00 : f32
    %93 = vector.broadcast %cst_41 : f32 to vector<8x128xf32>
    %94 = arith.cmpf ogt, %92, %93 : vector<8x128xf32>
    %cst_42 = arith.constant 2.000000e-01 : f32
    %95 = vector.broadcast %cst_42 : f32 to vector<8x128xf32>
    %96 = arith.mulf %95, %92 : vector<8x128xf32>
    %97 = arith.select %94, %92, %96 : vector<8x128xi1>, vector<8x128xf32>
    %c16 = arith.constant 16 : index
    %c0_43 = arith.constant 0 : index
    %98 = vector.load %arg4[%c16, %c0_43] : memref<32x128xf32, #tpu.memory_space<vmem>>, vector<8x128xf32>
    tpu.vector_store %arg4[%c16, %c0_43], %97 {strides = array<i32>} : memref<32x128xf32, #tpu.memory_space<vmem>>, vector<8x128xf32>,
    %99 = vector.extract_strided_slice %2 {offsets = [24, 0], sizes = [8, 128], strides = [1, 1]} : vector<32x128xf32> to vector<8x128xf32>
    %cst_44 = arith.constant dense<0.000000e+00> : vector<8xf32>
    %100 = vector.multi_reduction <add>, %99, %cst_44 [1] : vector<8x128xf32> to vector<8xf32>
    %101 = vector.shape_cast %100 : vector<8xf32> to vector<8x1xf32>
    %cst_45 = arith.constant dense<0.000000e+00> : vector<1xf32>
    %102 = vector.multi_reduction <add>, %101, %cst_45 [0] : vector<8x1xf32> to vector<1xf32>
    %103 = vector.shape_cast %102 : vector<1xf32> to vector<1x1xf32>
    %cst_46 = arith.constant 9.765625E-4 : f32
    %104 = vector.broadcast %cst_46 : f32 to vector<1x1xf32>
    %105 = arith.mulf %103, %104 : vector<1x1xf32>
    %106 = vector.broadcast %105 : vector<1x1xf32> to vector<8x128xf32>
    %107 = arith.subf %99, %106 : vector<8x128xf32>
    %108 = arith.mulf %107, %107 : vector<8x128xf32>
    %cst_47 = arith.constant dense<0.000000e+00> : vector<8xf32>
    %109 = vector.multi_reduction <add>, %108, %cst_47 [1] : vector<8x128xf32> to vector<8xf32>
    %110 = vector.shape_cast %109 : vector<8xf32> to vector<8x1xf32>
    %cst_48 = arith.constant dense<0.000000e+00> : vector<1xf32>
    %111 = vector.multi_reduction <add>, %110, %cst_48 [0] : vector<8x1xf32> to vector<1xf32>
    %112 = vector.shape_cast %111 : vector<1xf32> to vector<1x1xf32>
    %cst_49 = arith.constant 9.765625E-4 : f32
    %113 = vector.broadcast %cst_49 : f32 to vector<1x1xf32>
    %114 = arith.mulf %112, %113 : vector<1x1xf32>
    %cst_50 = arith.constant 9.99999974E-6 : f32
    %115 = vector.broadcast %cst_50 : f32 to vector<1x1xf32>
    %116 = arith.addf %114, %115 : vector<1x1xf32>
    %117 = math.rsqrt %116 : vector<1x1xf32>
    %c3 = arith.constant 3 : index
    %c0_51 = arith.constant 0 : index
    %118 = vector.load %arg2[%c3, %c0_51] : memref<4x1xf32, #tpu.memory_space<vmem>>, vector<1x1xf32>
    %119 = arith.mulf %117, %118 : vector<1x1xf32>
    %120 = vector.broadcast %119 : vector<1x1xf32> to vector<8x128xf32>
    %121 = arith.mulf %107, %120 : vector<8x128xf32>
    %c3_52 = arith.constant 3 : index
    %c0_53 = arith.constant 0 : index
    %122 = vector.load %arg3[%c3_52, %c0_53] : memref<4x1xf32, #tpu.memory_space<vmem>>, vector<1x1xf32>
    %123 = vector.broadcast %122 : vector<1x1xf32> to vector<8x128xf32>
    %124 = arith.addf %121, %123 : vector<8x128xf32>
    %cst_54 = arith.constant 0.000000e+00 : f32
    %125 = vector.broadcast %cst_54 : f32 to vector<8x128xf32>
    %126 = arith.cmpf ogt, %124, %125 : vector<8x128xf32>
    %cst_55 = arith.constant 2.000000e-01 : f32
    %127 = vector.broadcast %cst_55 : f32 to vector<8x128xf32>
    %128 = arith.mulf %127, %124 : vector<8x128xf32>
    %129 = arith.select %126, %124, %128 : vector<8x128xi1>, vector<8x128xf32>
    %c24 = arith.constant 24 : index
    %c0_56 = arith.constant 0 : index
    %130 = vector.load %arg4[%c24, %c0_56] : memref<32x128xf32, #tpu.memory_space<vmem>>, vector<8x128xf32>
    tpu.vector_store %arg4[%c24, %c0_56], %129 {strides = array<i32>} : memref<32x128xf32, #tpu.memory_space<vmem>>, vector<8x128xf32>,
    return
  }
}

module attributes {stable_mosaic.version = 11 : i64} {
  func.func @_deconv_bn_lrelu_kernel(%arg0: memref<16x108xbf16, #tpu.memory_space<vmem>>, %arg1: memref<108x1024xbf16, #tpu.memory_space<vmem>>, %arg2: memref<2x1xf32, #tpu.memory_space<vmem>>, %arg3: memref<2x1xf32, #tpu.memory_space<vmem>>, %arg4: memref<16x1024xf32, #tpu.memory_space<vmem>>) attributes {dimension_semantics = [], scalar_prefetch = 0 : i64, scratch_operands = 0 : i64, tpu.core_type = #tpu.core_type<tc>} {
    %c0 = arith.constant 0 : index
    %c0_0 = arith.constant 0 : index
    %0 = vector.load %arg0[%c0, %c0_0] : memref<16x108xbf16, #tpu.memory_space<vmem>>, vector<16x108xbf16>
    %c0_1 = arith.constant 0 : index
    %c0_2 = arith.constant 0 : index
    %1 = vector.load %arg1[%c0_1, %c0_2] : memref<108x1024xbf16, #tpu.memory_space<vmem>>, vector<108x1024xbf16>
    %cst = arith.constant dense<0.000000e+00> : vector<16x1024xf32>
    %2 = tpu.matmul %0, %1, %cst {dimension_numbers = #tpu.dot_dimension_numbers<[1], [0], [0], [1], [0, 0, 1, 1], [], []>} : vector<16x108xbf16>, vector<108x1024xbf16>, vector<16x1024xf32> -> vector<16x1024xf32>
    %3 = vector.extract_strided_slice %2 {offsets = [0, 0], sizes = [8, 1024], strides = [1, 1]} : vector<16x1024xf32> to vector<8x1024xf32>
    %cst_3 = arith.constant dense<0.000000e+00> : vector<8xf32>
    %4 = vector.multi_reduction <add>, %3, %cst_3 [1] : vector<8x1024xf32> to vector<8xf32>
    %5 = vector.shape_cast %4 : vector<8xf32> to vector<8x1xf32>
    %cst_4 = arith.constant dense<0.000000e+00> : vector<1xf32>
    %6 = vector.multi_reduction <add>, %5, %cst_4 [0] : vector<8x1xf32> to vector<1xf32>
    %7 = vector.shape_cast %6 : vector<1xf32> to vector<1x1xf32>
    %cst_5 = arith.constant 1.22070313E-4 : f32
    %8 = vector.broadcast %cst_5 : f32 to vector<1x1xf32>
    %9 = arith.mulf %7, %8 : vector<1x1xf32>
    %10 = vector.broadcast %9 : vector<1x1xf32> to vector<8x1024xf32>
    %11 = arith.subf %3, %10 : vector<8x1024xf32>
    %12 = arith.mulf %11, %11 : vector<8x1024xf32>
    %cst_6 = arith.constant dense<0.000000e+00> : vector<8xf32>
    %13 = vector.multi_reduction <add>, %12, %cst_6 [1] : vector<8x1024xf32> to vector<8xf32>
    %14 = vector.shape_cast %13 : vector<8xf32> to vector<8x1xf32>
    %cst_7 = arith.constant dense<0.000000e+00> : vector<1xf32>
    %15 = vector.multi_reduction <add>, %14, %cst_7 [0] : vector<8x1xf32> to vector<1xf32>
    %16 = vector.shape_cast %15 : vector<1xf32> to vector<1x1xf32>
    %cst_8 = arith.constant 1.22070313E-4 : f32
    %17 = vector.broadcast %cst_8 : f32 to vector<1x1xf32>
    %18 = arith.mulf %16, %17 : vector<1x1xf32>
    %cst_9 = arith.constant 9.99999974E-6 : f32
    %19 = vector.broadcast %cst_9 : f32 to vector<1x1xf32>
    %20 = arith.addf %18, %19 : vector<1x1xf32>
    %21 = math.rsqrt %20 : vector<1x1xf32>
    %c0_10 = arith.constant 0 : index
    %c0_11 = arith.constant 0 : index
    %22 = vector.load %arg2[%c0_10, %c0_11] : memref<2x1xf32, #tpu.memory_space<vmem>>, vector<1x1xf32>
    %23 = arith.mulf %21, %22 : vector<1x1xf32>
    %24 = vector.broadcast %23 : vector<1x1xf32> to vector<8x1024xf32>
    %25 = arith.mulf %11, %24 : vector<8x1024xf32>
    %c0_12 = arith.constant 0 : index
    %c0_13 = arith.constant 0 : index
    %26 = vector.load %arg3[%c0_12, %c0_13] : memref<2x1xf32, #tpu.memory_space<vmem>>, vector<1x1xf32>
    %27 = vector.broadcast %26 : vector<1x1xf32> to vector<8x1024xf32>
    %28 = arith.addf %25, %27 : vector<8x1024xf32>
    %cst_14 = arith.constant 0.000000e+00 : f32
    %29 = vector.broadcast %cst_14 : f32 to vector<8x1024xf32>
    %30 = arith.cmpf ogt, %28, %29 : vector<8x1024xf32>
    %cst_15 = arith.constant 2.000000e-01 : f32
    %31 = vector.broadcast %cst_15 : f32 to vector<8x1024xf32>
    %32 = arith.mulf %31, %28 : vector<8x1024xf32>
    %33 = arith.select %30, %28, %32 : vector<8x1024xi1>, vector<8x1024xf32>
    %c0_16 = arith.constant 0 : index
    %c0_17 = arith.constant 0 : index
    %34 = vector.load %arg4[%c0_16, %c0_17] : memref<16x1024xf32, #tpu.memory_space<vmem>>, vector<8x1024xf32>
    tpu.vector_store %arg4[%c0_16, %c0_17], %33 {strides = array<i32>} : memref<16x1024xf32, #tpu.memory_space<vmem>>, vector<8x1024xf32>,
    %35 = vector.extract_strided_slice %2 {offsets = [8, 0], sizes = [8, 1024], strides = [1, 1]} : vector<16x1024xf32> to vector<8x1024xf32>
    %cst_18 = arith.constant dense<0.000000e+00> : vector<8xf32>
    %36 = vector.multi_reduction <add>, %35, %cst_18 [1] : vector<8x1024xf32> to vector<8xf32>
    %37 = vector.shape_cast %36 : vector<8xf32> to vector<8x1xf32>
    %cst_19 = arith.constant dense<0.000000e+00> : vector<1xf32>
    %38 = vector.multi_reduction <add>, %37, %cst_19 [0] : vector<8x1xf32> to vector<1xf32>
    %39 = vector.shape_cast %38 : vector<1xf32> to vector<1x1xf32>
    %cst_20 = arith.constant 1.22070313E-4 : f32
    %40 = vector.broadcast %cst_20 : f32 to vector<1x1xf32>
    %41 = arith.mulf %39, %40 : vector<1x1xf32>
    %42 = vector.broadcast %41 : vector<1x1xf32> to vector<8x1024xf32>
    %43 = arith.subf %35, %42 : vector<8x1024xf32>
    %44 = arith.mulf %43, %43 : vector<8x1024xf32>
    %cst_21 = arith.constant dense<0.000000e+00> : vector<8xf32>
    %45 = vector.multi_reduction <add>, %44, %cst_21 [1] : vector<8x1024xf32> to vector<8xf32>
    %46 = vector.shape_cast %45 : vector<8xf32> to vector<8x1xf32>
    %cst_22 = arith.constant dense<0.000000e+00> : vector<1xf32>
    %47 = vector.multi_reduction <add>, %46, %cst_22 [0] : vector<8x1xf32> to vector<1xf32>
    %48 = vector.shape_cast %47 : vector<1xf32> to vector<1x1xf32>
    %cst_23 = arith.constant 1.22070313E-4 : f32
    %49 = vector.broadcast %cst_23 : f32 to vector<1x1xf32>
    %50 = arith.mulf %48, %49 : vector<1x1xf32>
    %cst_24 = arith.constant 9.99999974E-6 : f32
    %51 = vector.broadcast %cst_24 : f32 to vector<1x1xf32>
    %52 = arith.addf %50, %51 : vector<1x1xf32>
    %53 = math.rsqrt %52 : vector<1x1xf32>
    %c1 = arith.constant 1 : index
    %c0_25 = arith.constant 0 : index
    %54 = vector.load %arg2[%c1, %c0_25] : memref<2x1xf32, #tpu.memory_space<vmem>>, vector<1x1xf32>
    %55 = arith.mulf %53, %54 : vector<1x1xf32>
    %56 = vector.broadcast %55 : vector<1x1xf32> to vector<8x1024xf32>
    %57 = arith.mulf %43, %56 : vector<8x1024xf32>
    %c1_26 = arith.constant 1 : index
    %c0_27 = arith.constant 0 : index
    %58 = vector.load %arg3[%c1_26, %c0_27] : memref<2x1xf32, #tpu.memory_space<vmem>>, vector<1x1xf32>
    %59 = vector.broadcast %58 : vector<1x1xf32> to vector<8x1024xf32>
    %60 = arith.addf %57, %59 : vector<8x1024xf32>
    %cst_28 = arith.constant 0.000000e+00 : f32
    %61 = vector.broadcast %cst_28 : f32 to vector<8x1024xf32>
    %62 = arith.cmpf ogt, %60, %61 : vector<8x1024xf32>
    %cst_29 = arith.constant 2.000000e-01 : f32
    %63 = vector.broadcast %cst_29 : f32 to vector<8x1024xf32>
    %64 = arith.mulf %63, %60 : vector<8x1024xf32>
    %65 = arith.select %62, %60, %64 : vector<8x1024xi1>, vector<8x1024xf32>
    %c8 = arith.constant 8 : index
    %c0_30 = arith.constant 0 : index
    %66 = vector.load %arg4[%c8, %c0_30] : memref<16x1024xf32, #tpu.memory_space<vmem>>, vector<8x1024xf32>
    tpu.vector_store %arg4[%c8, %c0_30], %65 {strides = array<i32>} : memref<16x1024xf32, #tpu.memory_space<vmem>>, vector<8x1024xf32>,
    return
  }
}

module attributes {stable_mosaic.version = 11 : i64} {
  func.func @_deconv_relu_kernel(%arg0: i32, %arg1: memref<8x54xbf16, #tpu.memory_space<vmem>>, %arg2: memref<54x4096xbf16, #tpu.memory_space<vmem>>, %arg3: memref<8x4096xf32, #tpu.memory_space<vmem>>) attributes {dimension_semantics = [#tpu.dimension_semantics<parallel>], iteration_bounds = array<i64: 2>, scalar_prefetch = 0 : i64, scratch_operands = 0 : i64, tpu.core_type = #tpu.core_type<tc>, window_params = [{pipeline_mode = #tpu.pipeline_mode<synchronous>, transform_indices = @transform_0, window_bounds = array<i64: 8, 54>}, {transform_indices = @transform_1, window_bounds = array<i64: 54, 4096>}, {transform_indices = @transform_2, window_bounds = array<i64: 8, 4096>}]} {
    %c0 = arith.constant 0 : index
    %c0_0 = arith.constant 0 : index
    %0 = vector.load %arg1[%c0, %c0_0] : memref<8x54xbf16, #tpu.memory_space<vmem>>, vector<8x54xbf16>
    %c0_1 = arith.constant 0 : index
    %c0_2 = arith.constant 0 : index
    %1 = vector.load %arg2[%c0_1, %c0_2] : memref<54x4096xbf16, #tpu.memory_space<vmem>>, vector<54x4096xbf16>
    %cst = arith.constant dense<0.000000e+00> : vector<8x4096xf32>
    %2 = tpu.matmul %0, %1, %cst {dimension_numbers = #tpu.dot_dimension_numbers<[1], [0], [0], [1], [0, 0, 1, 1], [], []>} : vector<8x54xbf16>, vector<54x4096xbf16>, vector<8x4096xf32> -> vector<8x4096xf32>
    %cst_3 = arith.constant 0.000000e+00 : f32
    %3 = vector.broadcast %cst_3 : f32 to vector<8x4096xf32>
    %4 = arith.maximumf %2, %3 : vector<8x4096xf32>
    %c0_4 = arith.constant 0 : index
    %c0_5 = arith.constant 0 : index
    %5 = vector.load %arg3[%c0_4, %c0_5] : memref<8x4096xf32, #tpu.memory_space<vmem>>, vector<8x4096xf32>
    tpu.vector_store %arg3[%c0_4, %c0_5], %4 {strides = array<i32>} : memref<8x4096xf32, #tpu.memory_space<vmem>>, vector<8x4096xf32>,
    return
  }
  func.func @transform_0(%arg0: i32) -> (i32, i32) {
    %c0_i32 = arith.constant 0 : i32
    %c0_i32_0 = arith.constant 0 : i32
    %c0_i32_1 = arith.constant 0 : i32
    return %c0_i32, %c0_i32_0 : i32, i32
  }
  func.func @transform_1(%arg0: i32) -> (i32, i32) {
    %c0_i32 = arith.constant 0 : i32
    %c0_i32_0 = arith.constant 0 : i32
    return %c0_i32, %arg0 : i32, i32
  }
  func.func @transform_2(%arg0: i32) -> (i32, i32) {
    %c0_i32 = arith.constant 0 : i32
    %c0_i32_0 = arith.constant 0 : i32
    return %c0_i32, %arg0 : i32, i32
  }
}

</mosaic_0001>

<bundles_post_ra>
// kernel: decoder_forward.3
= control target key start
LH: loop header
LB: loop body
LE: loop exit
PB: predicated region body
PF: predicated region fallthrough
CT: control target
= control target key end

     0   :  { %vm155_vm0 = vcmask 1043456   ;;  %vm148_vm1 = vcmask 719872   ;;  %s665_s1 = inlined_call_operand.vmem [shape: bf16[216,128], index: 1, kind: input, shape index: {}]   ;;  %s666_s0 = inlined_call_operand.vmem [shape: bf16[32,216], index: 0, kind: input, shape index: {}]   ;;  %s667_s2 = inlined_call_operand.vmem [shape: f32[4,1], index: 2, kind: input, shape index: {}]   ;;  %s668_s3 = inlined_call_operand.vmem [shape: f32[4,1], index: 3, kind: input, shape index: {}]   ;;  %s669_s4 = inlined_call_operand.vmem [shape: f32[32,128], index: 4, kind: output, shape index: {}]  }
   0x1   :  { %v474_v0 = vld [vmem:[%s665_s1 + $0x38] sm:$0xff]  ;;  %v48_v1 = vld [vmem:[%s665_s1 + $0x68] sm:$0xf]  ;;  %v473_v3 = vld [vmem:[%s665_s1 + $0x30] sm:$0xff] }
   0x2   :  { %v120_v2 = vunpack.c.l.b16 %v48_v1  ;;  %159 = vmatpush.bf16.msra.mxu0 %v474_v0  ;;  %480 = vmatpush.bf16.msra.mxu2 %v474_v0  ;;  %v479_v6 = vld [vmem:[%s665_s1 + $0x60] sm:$0xff]  ;;  %v472_v7 = vld [vmem:[%s665_s1 + $0x28] sm:$0xff]  ;;  %v478_v8 = vld [vmem:[%s665_s1 + $0x58] sm:$0xff] }
   0x3   :  { %v471_v9 = vld [vmem:[%s665_s1 + $0x20] sm:$0xff]  ;;  %v477_v10 = vld [vmem:[%s665_s1 + $0x50] sm:$0xff]  ;;  %v470_v11 = vld [vmem:[%s665_s1 + $0x18] sm:$0xff] }
   0x4   :  { %v134_v4 = vpack.c.b16 %v120_v2, %v120_v2  ;;  %v476_v12 = vld [vmem:[%s665_s1 + $0x48] sm:$0xff]  ;;  %v469_v13 = vld [vmem:[%s665_s1 + $0x10] sm:$0xff]  ;;  %v475_v14 = vld [vmem:[%s665_s1 + $0x40] sm:$0xff] }
   0x5   :  { %v468_v15 = vld [vmem:[%s665_s1 + $0x8] sm:$0xff]  ;;  %v465_v16 = vld [vmem:[%s666_s0 + $0x14] sm:$0xf]  ;;  %v405_v17 = vld [vmem:[%s666_s0 + $0x18] sm:$0xf0] }
   0x6   :  { %v157_v5 = vsel %vm155_vm0, %v134_v4, 0  ;;  %160 = vmatpush.bf16.msra.mxu0 %v473_v3  ;;  %481 = vmatpush.bf16.msra.mxu2 %v473_v3  ;;  %v463_v18 = vld [vmem:[%s666_s0 + $0x4] sm:$0xf]  ;;  %v397_v19 = vld [vmem:[%s666_s0 + $0x8] sm:$0xf0]  ;;  %v408_v20 = vor.u32 %v465_v16, %v405_v17 }
   0x7   :  { %488 = vmatpush.bf16.msra.mxu3 %v157_v5  ;;  %180 = vmatpush.bf16.msra.mxu1 %v157_v5  ;;  %v467_v21 = vld [vmem:[%s665_s1] sm:$0xff]  ;;  %v400_v22 = vor.u32 %v463_v18, %v397_v19  ;;  %v464_v24 = vld [vmem:[%s666_s0 + $0x4] sm:$0xf0]  ;;  %v403_v25 = vld [vmem:[%s666_s0 + $0x10] sm:$0xf] }
   0x8   :  { %v395_v23 = vld [vmem:[%s666_s0] sm:$0xf]  ;;  %v466_v26 = vld [vmem:[%s666_s0 + $0x14] sm:$0xf0] }
   0x9   :  { %v396_v27 = vor.u32 %v464_v24, %v395_v23  ;;  %v404_v28 = vor.u32 %v466_v26, %v403_v25 }
   0xa   :  { %161 = vmatpush.bf16.msra.mxu0 %v472_v7  ;;  %482 = vmatpush.bf16.msra.mxu2 %v472_v7 }
   0xb   :  { %489 = vmatpush.bf16.msra.mxu3 %v479_v6  ;;  %181 = vmatpush.bf16.msra.mxu1 %v479_v6 }
   0xe   :  { %162 = vmatpush.bf16.msra.mxu0 %v471_v9  ;;  %483 = vmatpush.bf16.msra.mxu2 %v471_v9 }
   0xf   :  { %490 = vmatpush.bf16.msra.mxu3 %v478_v8  ;;  %182 = vmatpush.bf16.msra.mxu1 %v478_v8 }
  0x12   :  { %163 = vmatpush.bf16.msra.mxu0 %v470_v11  ;;  %484 = vmatpush.bf16.msra.mxu2 %v470_v11 }
  0x13   :  { %491 = vmatpush.bf16.msra.mxu3 %v477_v10  ;;  %183 = vmatpush.bf16.msra.mxu1 %v477_v10 }
  0x16   :  { %164 = vmatpush.bf16.msra.mxu0 %v469_v13  ;;  %485 = vmatpush.bf16.msra.mxu2 %v469_v13 }
  0x17   :  { %492 = vmatpush.bf16.msra.mxu3 %v476_v12  ;;  %184 = vmatpush.bf16.msra.mxu1 %v476_v12 }
  0x1a   :  { %165 = vmatpush.bf16.msra.mxu0 %v468_v15  ;;  %486 = vmatpush.bf16.msra.mxu2 %v468_v15 }
  0x1b   :  { %493 = vmatpush.bf16.msra.mxu3 %v475_v14  ;;  %185 = vmatpush.bf16.msra.mxu1 %v475_v14 }
  0x1e   :  { %462 = vmatmul.msk.bf16.vlgmr.msra.gmra.mxu3 %vm148_vm1, %v408_v20  ;;  %166 = vmatpush.bf16.msra.mxu0 %v467_v21 }
  0x1f   :  { %461 = vmatmul.msk.bf16.vlgmr.msra.gmra.mxu1 %vm148_vm1, %v400_v22  ;;  %487 = vmatpush.bf16.msra.mxu2 %v467_v21 }
  0x21   :  { %167 = vmatmul.bf16.vlgmr.msra.gmra.mxu0 %v396_v27 }
  0x22   :  { %172 = vmatmul.bf16.vlgmr.msra.gmra.mxu2 %v404_v28 }
  0x9c   :  { %v187_v29 = vpop.f32.mrf.mxu1 }
  0x9e   :  { %v168_v30 = vpop.f32.mrf.mxu0 }
  0x9f   :  { %v188_v31 = vadd.f32 %v187_v29, %v168_v30 }
  0xa1   :  { %197 = vadd.xlane.f32.xlu0 %v188_v31  ;;  %v192_v32 = vpop.f32.mrf.mxu3 }
  0xa4   :  { %v189_v35 = vpop.f32.mrf.mxu1 }
  0xa5   :  { %v173_v33 = vpop.f32.mrf.mxu2 }
  0xa6   :  { %v193_v34 = vadd.f32 %v192_v32, %v173_v33  ;;  %v170_v36 = vpop.f32.mrf.mxu0 }
  0xa7   :  { %v190_v37 = vadd.f32 %v189_v35, %v170_v36 }
  0xa8   :  { %293 = vadd.xlane.f32.xlu1 %v193_v34 }
  0xa9   :  { %245 = vadd.xlane.f32.xlu0 %v190_v37  ;;  %v194_v38 = vpop.f32.mrf.mxu3 }
  0xad   :  { %v175_v39 = vpop.f32.mrf.mxu2 }
  0xae   :  { %v195_v40 = vadd.f32 %v194_v38, %v175_v39 }
  0xb0   :  { %341 = vadd.xlane.f32.xlu1 %v195_v40 }
 0x114   :  { %v198_v41 = vpop.xlane.xlu0 %197 }
 0x115   :  { %v199_v42 = vrot.slane %v198_v41, 4 }
 0x117   :  { %v200_v43 = vadd.f32 %v199_v42, %v198_v41 }
 0x119   :  { %v201_v44 = vrot.slane %v200_v43, 2 }
 0x11b   :  { %v202_v45 = vadd.f32 %v201_v44, %v200_v43  ;;  %v294_v46 = vpop.xlane.xlu1 %293 }
 0x11c   :  { %v295_v47 = vrot.slane %v294_v46, 4  ;;  %v246_v48 = vpop.xlane.xlu0 %245 }
 0x11d   :  { %v203_v49 = vrot.slane %v202_v45, 1  ;;  %v247_v50 = vrot.slane %v246_v48, 4 }
 0x11e   :  { %v296_v51 = vadd.f32 %v295_v47, %v294_v46 }
 0x11f   :  { %v248_v52 = vadd.f32 %v247_v50, %v246_v48  ;;  %v204_v53 = vadd.f32 %v203_v49, %v202_v45 }
 0x120   :  { %v297_v54 = vrot.slane %v296_v51, 2 }
 0x121   :  { %v249_v55 = vrot.slane %v248_v52, 2  ;;  %v205_v56 = vmul.f32 0.0009765625, %v204_v53 }
 0x122   :  { %v298_v57 = vadd.f32 %v297_v54, %v296_v51 }
 0x123   :  { %v250_v58 = vadd.f32 %v249_v55, %v248_v52  ;;  %v342_v59 = vpop.xlane.xlu1 %341  ;;  %v609_v60 = vsub.f32 %v188_v31, %v205_v56 }
 0x124   :  { %v299_v61 = vrot.slane %v298_v57, 1  ;;  %v343_v62 = vrot.slane %v342_v59, 4 }
 0x125   :  { %v251_v63 = vrot.slane %v250_v58, 1  ;;  %v207_v0 = vmul.f32 %v609_v60, %v609_v60 }
 0x126   :  { %v300_v1 = vadd.f32 %v299_v61, %v298_v57  ;;  %v344_v2 = vadd.f32 %v343_v62, %v342_v59 }
 0x127   :  { %v252_v3 = vadd.f32 %v251_v63, %v250_v58  ;;  %208 = vadd.xlane.f32.xlu2 %v207_v0  ;;  %v228_v0 = vld [vmem:[%s667_s2] sm:$0x1] }
 0x128   :  { %v345_v4 = vrot.slane %v344_v2, 2  ;;  %v301_v5 = vmul.f32 0.0009765625, %v300_v1 }
 0x129   :  { %v253_v6 = vmul.f32 0.0009765625, %v252_v3 }
 0x12a   :  { %v346_v7 = vadd.f32 %v345_v4, %v344_v2  ;;  %v613_v8 = vsub.f32 %v193_v34, %v301_v5  ;;  %v235_v5 = vld [vmem:[%s668_s3] sm:$0x1] }
 0x12b   :  { %v615_v9 = vsub.f32 %v190_v37, %v253_v6 }
 0x12c   :  { %v347_v10 = vrot.slane %v346_v7, 1  ;;  %v303_v11 = vmul.f32 %v613_v8, %v613_v8 }
 0x12d   :  { %v255_v12 = vmul.f32 %v615_v9, %v615_v9 }
 0x12e   :  { %v348_v13 = vadd.f32 %v347_v10, %v346_v7  ;;  %304 = vadd.xlane.f32.xlu0 %v303_v11 }
 0x12f   :  { %256 = vadd.xlane.f32.xlu2 %v255_v12 }
 0x130   :  { %v349_v14 = vmul.f32 0.0009765625, %v348_v13 }
 0x132   :  { %v621_v15 = vsub.f32 %v195_v40, %v349_v14 }
 0x134   :  { %v351_v16 = vmul.f32 %v621_v15, %v621_v15 }
 0x136   :  { %352 = vadd.xlane.f32.xlu1 %v351_v16 }
 0x19a   :  { %v209_v17 = vpop.xlane.xlu2 %208 }
 0x19b   :  { %v210_v18 = vrot.slane %v209_v17, 4 }
 0x19d   :  { %v211_v19 = vadd.f32 %v210_v18, %v209_v17  ;;  %v276_v17 = vld [vmem:[%s667_s2 + $0x1] sm:$0x1] }
 0x19f   :  { %v212_v20 = vrot.slane %v211_v19, 2 }
 0x1a1   :  { %v213_v21 = vadd.f32 %v212_v20, %v211_v19  ;;  %v305_v22 = vpop.xlane.xlu0 %304 }
 0x1a2   :  { %v306_v23 = vrot.slane %v305_v22, 4  ;;  %v257_v24 = vpop.xlane.xlu2 %256 }
 0x1a3   :  { %v214_v25 = vrot.slane %v213_v21, 1  ;;  %v258_v26 = vrot.slane %v257_v24, 4 }
 0x1a4   :  { %v307_v27 = vadd.f32 %v306_v23, %v305_v22  ;;  %v283_v23 = vld [vmem:[%s668_s3 + $0x1] sm:$0x1] }
 0x1a5   :  { %v215_v28 = vadd.f32 %v214_v25, %v213_v21  ;;  %v259_v29 = vadd.f32 %v258_v26, %v257_v24  ;;  %v324_v21 = vld [vmem:[%s667_s2 + $0x2] sm:$0x1] }
 0x1a6   :  { %v308_v30 = vrot.slane %v307_v27, 2  ;;  %v331_v26 = vld [vmem:[%s668_s3 + $0x2] sm:$0x1] }
 0x1a7   :  { %v216_v31 = vmul.f32 0.0009765625, %v215_v28  ;;  %v260_v32 = vrot.slane %v259_v29, 2 }
 0x1a8   :  { %v309_v33 = vadd.f32 %v308_v30, %v307_v27 }
 0x1a9   :  { %v217_v34 = vadd.f32 1e-05, %v216_v31  ;;  %v261_v35 = vadd.f32 %v260_v32, %v259_v29  ;;  %v353_v36 = vpop.xlane.xlu1 %352  ;;  %v372_v29 = vld [vmem:[%s667_s2 + $0x3] sm:$0x1] }
 0x1aa   :  { %v310_v37 = vrot.slane %v309_v33, 1  ;;  %v354_v38 = vrot.slane %v353_v36, 4  ;;  %v379_v32 = vld [vmem:[%s668_s3 + $0x3] sm:$0x1] }
 0x1ab   :  { %510 = vrsqrt.f32 %v217_v34  ;;  %v262_v39 = vrot.slane %v261_v35, 1  ;;  %vm224_vm3 = vweird.f32 %v217_v34 }
 0x1ac   :  { %v311_v40 = vadd.f32 %v310_v37, %v309_v33  ;;  %v355_v41 = vadd.f32 %v354_v38, %v353_v36 }
 0x1ad   :  { %v263_v42 = vadd.f32 %v262_v39, %v261_v35 }
 0x1ae   :  { %v312_v43 = vmul.f32 0.0009765625, %v311_v40  ;;  %v356_v44 = vrot.slane %v355_v41, 2 }
 0x1af   :  { %v264_v45 = vmul.f32 0.0009765625, %v263_v42 }
 0x1b0   :  { %v313_v46 = vadd.f32 1e-05, %v312_v43  ;;  %v357_v47 = vadd.f32 %v356_v44, %v355_v41 }
 0x1b1   :  { %v511_v48 = vpop.eup %510  ;;  %v265_v49 = vadd.f32 1e-05, %v264_v45 }
 0x1b2   :  { %512 = vrsqrt.f32 %v313_v46  ;;  %v358_v50 = vrot.slane %v357_v47, 1  ;;  %v219_v51 = vmul.f32 %v511_v48, %v217_v34  ;;  %vm225_vm2 = vweird.f32 %v511_v48 }
 0x1b3   :  { %514 = vrsqrt.f32 %v265_v49  ;;  %vm226_vm4 = vmor %vm224_vm3, %vm225_vm2  ;;  %vm320_vm7 = vweird.f32 %v313_v46  ;;  %vm272_vm8 = vweird.f32 %v265_v49 }
 0x1b4   :  { %v359_v52 = vadd.f32 %v358_v50, %v357_v47  ;;  %v220_v53 = vmul.f32 %v511_v48, %v219_v51 }
 0x1b6   :  { %v360_v54 = vmul.f32 0.0009765625, %v359_v52  ;;  %v221_v55 = vmul.f32 0.5, %v220_v53 }
 0x1b8   :  { %v513_v56 = vpop.eup %512  ;;  %v361_v57 = vadd.f32 1e-05, %v360_v54  ;;  %v222_v58 = vsub.f32 1.5, %v221_v55 }
 0x1b9   :  { %v515_v59 = vpop.eup %514  ;;  %v315_v61 = vmul.f32 %v513_v56, %v313_v46  ;;  %vm321_vm5 = vweird.f32 %v513_v56 }
 0x1ba   :  { %v267_v62 = vmul.f32 %v515_v59, %v265_v49  ;;  %516 = vrsqrt.f32 %v361_v57  ;;  %v223_v63 = vmul.f32 %v511_v48, %v222_v58  ;;  %vm273_vm6 = vweird.f32 %v515_v59  ;;  %vm322_vm9 = vmor %vm320_vm7, %vm321_vm5 }
 0x1bb   :  { %v316_v1 = vmul.f32 %v513_v56, %v315_v61  ;;  %vm274_vm10 = vmor %vm272_vm8, %vm273_vm6  ;;  %vm368_vm12 = vweird.f32 %v361_v57 }
 0x1bc   :  { %v227_v2 = vsel %vm226_vm4, %v511_v48, %v223_v63  ;;  %v268_v3 = vmul.f32 %v515_v59, %v267_v62 }
 0x1bd   :  { %v229_v4 = vmul.f32 %v228_v0, %v227_v2  ;;  %v317_v6 = vmul.f32 0.5, %v316_v1 }
 0x1be   :  { %v269_v7 = vmul.f32 0.5, %v268_v3 }
 0x1bf   :  { %494 = vpush %v229_v4  ;;  %v318_v10 = vsub.f32 1.5, %v317_v6 }
 0x1c0   :  { %v517_v11 = vpop.eup %516  ;;  %496 = vpush %v235_v5  ;;  %v270_v12 = vsub.f32 1.5, %v269_v7 }
 0x1c1   :  { %v363_v13 = vmul.f32 %v517_v11, %v361_v57  ;;  %v319_v14 = vmul.f32 %v513_v56, %v318_v10  ;;  %vm369_vm11 = vweird.f32 %v517_v11 }
 0x1c2   :  { %v271_v16 = vmul.f32 %v515_v59, %v270_v12  ;;  %vm370_vm13 = vmor %vm368_vm12, %vm369_vm11 }
 0x1c3   :  { %v364_v18 = vmul.f32 %v517_v11, %v363_v13  ;;  %v323_v20 = vsel %vm322_vm9, %v513_v56, %v319_v14 }
 0x1c4   :  { %v275_v19 = vsel %vm274_vm10, %v515_v59, %v271_v16  ;;  %v325_v25 = vmul.f32 %v324_v21, %v323_v20 }
 0x1c5   :  { %v277_v22 = vmul.f32 %v276_v17, %v275_v19  ;;  %v365_v24 = vmul.f32 0.5, %v364_v18 }
 0x1c7   :  { %498 = vpush %v277_v22  ;;  %v366_v27 = vsub.f32 1.5, %v365_v24 }
 0x1c8   :  { %500 = vpush %v283_v23 }
 0x1c9   :  { %502 = vpush %v325_v25  ;;  %v367_v28 = vmul.f32 %v517_v11, %v366_v27 }
 0x1ca   :  { %504 = vpush %v331_v26 }
 0x1cb   :  { %v371_v30 = vsel %vm370_vm13, %v517_v11, %v367_v28 }
 0x1cc   :  { %v373_v31 = vmul.f32 %v372_v29, %v371_v30 }
 0x1ce   :  { %506 = vpush %v373_v31 }
 0x1cf   :  { %508 = vpush %v379_v32 }
 0x1f0   :  { %s495_s21 = spop %494 }
 0x1f1   :  { %v232_v33 = vstv %s495_s21  ;;  %s497_s22 = spop %496 }
 0x1f2   :  { %v234_v34 = vmul.f32 %v232_v33, %v609_v60  ;;  %v238_v35 = vstv %s497_s22 }
 0x1f4   :  { %v240_v36 = vadd.f32 %v238_v35, %v234_v34 }
 0x1f6   :  { %vm241_vm14 = vcmp.gt.f32.partialorder %v240_v36, 0.0  ;;  %v242_v37 = vmul.f32 0.2, %v240_v36 }
 0x1f8   :  { %v243_v38 = vsel %vm241_vm14, %v240_v36, %v242_v37  ;;  %s499_s2 = spop %498 }
 0x1f9   :  { %244 = vst [vmem:[%s669_s4] sm:$0xff] %v243_v38  ;;  %v280_v39 = vstv %s499_s2  ;;  %s501_s25 = spop %500 }
 0x1fa   :  { %v282_v40 = vmul.f32 %v280_v39, %v615_v9  ;;  %v286_v41 = vstv %s501_s25  ;;  %s503_s3 = spop %502 }
 0x1fb   :  { %v328_v42 = vstv %s503_s3  ;;  %s505_s26 = spop %504 }
 0x1fc   :  { %v288_v43 = vadd.f32 %v286_v41, %v282_v40  ;;  %v330_v60 = vmul.f32 %v328_v42, %v613_v8  ;;  %v334_v44 = vstv %s505_s26 }
 0x1fe   :  { %vm289_vm15 = vcmp.gt.f32.partialorder %v288_v43, 0.0  ;;  %v290_v45 = vmul.f32 0.2, %v288_v43  ;;  %v336_v46 = vadd.f32 %v334_v44, %v330_v60 }
 0x1ff   :  { %s507_s27 = spop %506 }
 0x200   :  { %v291_v47 = vsel %vm289_vm15, %v288_v43, %v290_v45  ;;  %vm337_vm0 = vcmp.gt.f32.partialorder %v336_v46, 0.0  ;;  %v338_v48 = vmul.f32 0.2, %v336_v46  ;;  %v376_v49 = vstv %s507_s27  ;;  %s509_s28 = spop %508 }
 0x201   :  { %292 = vst [vmem:[%s669_s4 + $0x8] sm:$0xff] %v291_v47  ;;  %v378_v9 = vmul.f32 %v376_v49, %v621_v15  ;;  %v382_v50 = vstv %s509_s28 }
 0x202   :  { %v339_v51 = vsel %vm337_vm0, %v336_v46, %v338_v48 }
 0x203   :  { %340 = vst [vmem:[%s669_s4 + $0x10] sm:$0xff] %v339_v51  ;;  %v384_v8 = vadd.f32 %v382_v50, %v378_v9 }
 0x205   :  { %vm385_vm1 = vcmp.gt.f32.partialorder %v384_v8, 0.0  ;;  %v386_v52 = vmul.f32 0.2, %v384_v8 }
 0x207   :  { %v387_v53 = vsel %vm385_vm1, %v384_v8, %v386_v52 }
 0x208   :  { %388 = vst [vmem:[%s669_s4 + $0x18] sm:$0xff] %v387_v53 }

// kernel: decoder_forward.4
= control target key start
LH: loop header
LB: loop body
LE: loop exit
PB: predicated region body
PF: predicated region fallthrough
CT: control target
= control target key end

     0   :  { %vm357_vm0 = vcmask 1045504   ;;  %vm353_vm1 = vcmask 883712   ;;  %s1578_s1 = inlined_call_operand.vmem [shape: bf16[108,1024], index: 1, kind: input, shape index: {}]   ;;  %s1579_s0 = inlined_call_operand.vmem [shape: bf16[16,108], index: 0, kind: input, shape index: {}]   ;;  %s1580_s2 = inlined_call_operand.vmem [shape: f32[2,1], index: 2, kind: input, shape index: {}]   ;;  %s1581_s3 = inlined_call_operand.vmem [shape: f32[2,1], index: 3, kind: input, shape index: {}]   ;;  %s1582_s4 = inlined_call_operand.vmem [shape: f32[16,1024], index: 4, kind: output, shape index: {}]  }
   0x1   :  { %v932_v0 = vld [vmem:[%s1578_s1 + $0x180] sm:$0xf]  ;;  %v1019_v2 = vld [vmem:[%s1578_s1 + $0x184] sm:$0xf]  ;;  %v940_v5 = vld [vmem:[%s1578_s1 + $0x188] sm:$0xf] }
   0x2   :  { %v1023_v1 = vld [vmem:[%s1578_s1 + $0x19c] sm:$0x30]  ;;  %v934_v4 = vld [vmem:[%s1578_s1 + $0x1a0] sm:$0x30]  ;;  %v1024_v6 = vld [vmem:[%s1578_s1 + $0x1a4] sm:$0x30] }
   0x3   :  { %v933_v3 = vor.u32 %v1023_v1, %v932_v0  ;;  %v937_v7 = vor.u32 %v1019_v2, %v934_v4  ;;  %v941_v8 = vor.u32 %v1024_v6, %v940_v5  ;;  %v1020_v9 = vld [vmem:[%s1578_s1 + $0x18c] sm:$0xf]  ;;  %v900_v11 = vld [vmem:[%s1578_s1 + $0x140] sm:$0xf]  ;;  %v1011_v15 = vld [vmem:[%s1578_s1 + $0x144] sm:$0xf] }
   0x4   :  { %v942_v10 = vld [vmem:[%s1578_s1 + $0x1a8] sm:$0x30]  ;;  %v1015_v14 = vld [vmem:[%s1578_s1 + $0x15c] sm:$0xf0]  ;;  %v902_v19 = vld [vmem:[%s1578_s1 + $0x160] sm:$0xf0] }
   0x5   :  { %v359_v12 = vsel %vm357_vm0, %v933_v3, 0  ;;  %v945_v13 = vor.u32 %v1020_v9, %v942_v10  ;;  %v362_v16 = vsel %vm357_vm0, %v937_v7, 0  ;;  %v365_v17 = vsel %vm357_vm0, %v941_v8, 0  ;;  %v908_v20 = vld [vmem:[%s1578_s1 + $0x148] sm:$0xf] }
   0x6   :  { %383 = vmatpush.bf16.msra.mxu0 %v359_v12  ;;  %v901_v18 = vor.u32 %v1015_v14, %v900_v11  ;;  %397 = vmatpush.bf16.msra.mxu1 %v362_v16  ;;  %v905_v22 = vor.u32 %v1011_v15, %v902_v19  ;;  %v1016_v23 = vld [vmem:[%s1578_s1 + $0x164] sm:$0xf0]  ;;  %v1012_v24 = vld [vmem:[%s1578_s1 + $0x14c] sm:$0xf]  ;;  %v868_v27 = vld [vmem:[%s1578_s1 + $0x100] sm:$0xf] }
   0x7   :  { %411 = vmatpush.bf16.msra.mxu2 %v365_v17  ;;  %v368_v21 = vsel %vm357_vm0, %v945_v13, 0  ;;  %v909_v25 = vor.u32 %v1016_v23, %v908_v20  ;;  %v910_v26 = vld [vmem:[%s1578_s1 + $0x168] sm:$0xf0]  ;;  %v1007_v28 = vld [vmem:[%s1578_s1 + $0x11c] sm:$0xf0] }
   0x8   :  { %425 = vmatpush.bf16.msra.mxu3 %v368_v21  ;;  %v913_v29 = vor.u32 %v1012_v24, %v910_v26  ;;  %v1003_v30 = vld [vmem:[%s1578_s1 + $0x104] sm:$0xf]  ;;  %v876_v32 = vld [vmem:[%s1578_s1 + $0x108] sm:$0xf]  ;;  %v869_v33 = vor.u32 %v1007_v28, %v868_v27  ;;  %v1004_v35 = vld [vmem:[%s1578_s1 + $0x10c] sm:$0xf] }
   0x9   :  { %v870_v31 = vld [vmem:[%s1578_s1 + $0x120] sm:$0xf0]  ;;  %v1008_v34 = vld [vmem:[%s1578_s1 + $0x124] sm:$0xf0]  ;;  %v878_v36 = vld [vmem:[%s1578_s1 + $0x128] sm:$0xf0] }
   0xa   :  { %384 = vmatpush.bf16.msra.mxu0 %v901_v18  ;;  %398 = vmatpush.bf16.msra.mxu1 %v905_v22  ;;  %v873_v37 = vor.u32 %v1003_v30, %v870_v31  ;;  %v877_v38 = vor.u32 %v1008_v34, %v876_v32  ;;  %v836_v39 = vld [vmem:[%s1578_s1 + $0xc0] sm:$0xf]  ;;  %v995_v41 = vld [vmem:[%s1578_s1 + $0xc4] sm:$0xf]  ;;  %v881_v42 = vor.u32 %v1004_v35, %v878_v36  ;;  %v844_v44 = vld [vmem:[%s1578_s1 + $0xc8] sm:$0xf] }
   0xb   :  { %412 = vmatpush.bf16.msra.mxu2 %v909_v25  ;;  %v999_v40 = vld [vmem:[%s1578_s1 + $0xdc] sm:$0xf0]  ;;  %v838_v43 = vld [vmem:[%s1578_s1 + $0xe0] sm:$0xf0]  ;;  %v1000_v45 = vld [vmem:[%s1578_s1 + $0xe4] sm:$0xf0] }
   0xc   :  { %426 = vmatpush.bf16.msra.mxu3 %v913_v29  ;;  %v996_v46 = vld [vmem:[%s1578_s1 + $0xcc] sm:$0xf]  ;;  %v837_v48 = vor.u32 %v999_v40, %v836_v39  ;;  %v841_v49 = vor.u32 %v995_v41, %v838_v43  ;;  %v845_v50 = vor.u32 %v1000_v45, %v844_v44  ;;  %v804_v51 = vld [vmem:[%s1578_s1 + $0x80] sm:$0xf]  ;;  %v987_v53 = vld [vmem:[%s1578_s1 + $0x84] sm:$0xf] }
   0xd   :  { %v846_v47 = vld [vmem:[%s1578_s1 + $0xe8] sm:$0xf0]  ;;  %v991_v52 = vld [vmem:[%s1578_s1 + $0x9c] sm:$0xf0]  ;;  %v806_v55 = vld [vmem:[%s1578_s1 + $0xa0] sm:$0xf0] }
   0xe   :  { %385 = vmatpush.bf16.msra.mxu0 %v869_v33  ;;  %399 = vmatpush.bf16.msra.mxu1 %v873_v37  ;;  %v849_v54 = vor.u32 %v996_v46, %v846_v47  ;;  %v812_v56 = vld [vmem:[%s1578_s1 + $0x88] sm:$0xf]  ;;  %v988_v58 = vld [vmem:[%s1578_s1 + $0x8c] sm:$0xf]  ;;  %v805_v60 = vor.u32 %v991_v52, %v804_v51  ;;  %v772_v61 = vld [vmem:[%s1578_s1 + $0x40] sm:$0xf]  ;;  %v809_v62 = vor.u32 %v987_v53, %v806_v55 }
   0xf   :  { %413 = vmatpush.bf16.msra.mxu2 %v877_v38  ;;  %v992_v57 = vld [vmem:[%s1578_s1 + $0xa4] sm:$0xf0]  ;;  %v814_v59 = vld [vmem:[%s1578_s1 + $0xa8] sm:$0xf0]  ;;  %v983_v0 = vld [vmem:[%s1578_s1 + $0x5c] sm:$0xf0] }
  0x10   :  { %427 = vmatpush.bf16.msra.mxu3 %v881_v42  ;;  %v813_v63 = vor.u32 %v992_v57, %v812_v56  ;;  %v979_v1 = vld [vmem:[%s1578_s1 + $0x44] sm:$0xf]  ;;  %v817_v3 = vor.u32 %v988_v58, %v814_v59  ;;  %v780_v4 = vld [vmem:[%s1578_s1 + $0x48] sm:$0xf]  ;;  %v980_v6 = vld [vmem:[%s1578_s1 + $0x4c] sm:$0xf]  ;;  %v773_v10 = vor.u32 %v983_v0, %v772_v61 }
  0x11   :  { %v774_v2 = vld [vmem:[%s1578_s1 + $0x60] sm:$0xf0]  ;;  %v984_v5 = vld [vmem:[%s1578_s1 + $0x64] sm:$0xf0]  ;;  %v782_v7 = vld [vmem:[%s1578_s1 + $0x68] sm:$0xf0] }
  0x12   :  { %386 = vmatpush.bf16.msra.mxu0 %v837_v48  ;;  %400 = vmatpush.bf16.msra.mxu1 %v841_v49  ;;  %v740_v8 = vld [vmem:[%s1578_s1] sm:$0xf]  ;;  %v971_v11 = vld [vmem:[%s1578_s1 + $0x4] sm:$0xf]  ;;  %v748_v13 = vld [vmem:[%s1578_s1 + $0x8] sm:$0xf]  ;;  %v777_v17 = vor.u32 %v979_v1, %v774_v2  ;;  %v781_v18 = vor.u32 %v984_v5, %v780_v4  ;;  %v785_v22 = vor.u32 %v980_v6, %v782_v7 }
  0x13   :  { %414 = vmatpush.bf16.msra.mxu2 %v845_v50  ;;  %v975_v9 = vld [vmem:[%s1578_s1 + $0x1c] sm:$0xf0]  ;;  %v742_v12 = vld [vmem:[%s1578_s1 + $0x20] sm:$0xf0]  ;;  %v948_v14 = vld [vmem:[%s1578_s1 + $0x190] sm:$0xf] }
  0x14   :  { %428 = vmatpush.bf16.msra.mxu3 %v849_v54  ;;  %v1025_v15 = vld [vmem:[%s1578_s1 + $0x1ac] sm:$0x30]  ;;  %v1021_v16 = vld [vmem:[%s1578_s1 + $0x194] sm:$0xf]  ;;  %v956_v20 = vld [vmem:[%s1578_s1 + $0x198] sm:$0xf]  ;;  %v741_v29 = vor.u32 %v975_v9, %v740_v8  ;;  %v745_v32 = vor.u32 %v971_v11, %v742_v12 }
  0x15   :  { %v950_v19 = vld [vmem:[%s1578_s1 + $0x1b0] sm:$0x30]  ;;  %v1026_v21 = vld [vmem:[%s1578_s1 + $0x1b4] sm:$0x30]  ;;  %v976_v23 = vld [vmem:[%s1578_s1 + $0x24] sm:$0xf0]  ;;  %v949_v28 = vor.u32 %v1025_v15, %v948_v14 }
  0x16   :  { %387 = vmatpush.bf16.msra.mxu0 %v805_v60  ;;  %401 = vmatpush.bf16.msra.mxu1 %v809_v62  ;;  %v1022_v24 = vld [vmem:[%s1578_s1 + $0x19c] sm:$0xf]  ;;  %v972_v26 = vld [vmem:[%s1578_s1 + $0xc] sm:$0xf]  ;;  %v953_v30 = vor.u32 %v1021_v16, %v950_v19  ;;  %v957_v31 = vor.u32 %v1026_v21, %v956_v20  ;;  %v749_v33 = vor.u32 %v976_v23, %v748_v13  ;;  %v916_v36 = vld [vmem:[%s1578_s1 + $0x150] sm:$0xf] }
  0x17   :  { %415 = vmatpush.bf16.msra.mxu2 %v813_v63  ;;  %v958_v25 = vld [vmem:[%s1578_s1 + $0x1b8] sm:$0x30]  ;;  %v750_v27 = vld [vmem:[%s1578_s1 + $0x28] sm:$0xf0]  ;;  %v1017_v37 = vld [vmem:[%s1578_s1 + $0x16c] sm:$0xf0] }
  0x18   :  { %429 = vmatpush.bf16.msra.mxu3 %v817_v3  ;;  %v961_v34 = vor.u32 %v1022_v24, %v958_v25  ;;  %v753_v35 = vor.u32 %v972_v26, %v750_v27  ;;  %v371_v38 = vsel %vm357_vm0, %v949_v28, 0  ;;  %v1270_v39 = vld [vmem:[%s1579_s0] sm:$0xff]  ;;  %v1013_v40 = vld [vmem:[%s1578_s1 + $0x154] sm:$0xf]  ;;  %v374_v42 = vsel %vm357_vm0, %v953_v30, 0 }
  0x19   :  { %v918_v41 = vld [vmem:[%s1578_s1 + $0x170] sm:$0xf0]  ;;  %v377_v43 = vsel %vm357_vm0, %v957_v31, 0  ;;  %v924_v44 = vld [vmem:[%s1578_s1 + $0x158] sm:$0xf]  ;;  %v917_v49 = vor.u32 %v1017_v37, %v916_v36 }
  0x1a   :  { %388 = vmatpush.bf16.msra.mxu0 %v773_v10  ;;  %402 = vmatpush.bf16.msra.mxu1 %v777_v17  ;;  %v1018_v45 = vld [vmem:[%s1578_s1 + $0x174] sm:$0xf0]  ;;  %v380_v46 = vsel %vm357_vm0, %v961_v34, 0  ;;  %v1014_v47 = vld [vmem:[%s1578_s1 + $0x15c] sm:$0xf]  ;;  %v921_v50 = vor.u32 %v1013_v40, %v918_v41 }
  0x1b   :  { %416 = vmatpush.bf16.msra.mxu2 %v781_v18  ;;  %v926_v48 = vld [vmem:[%s1578_s1 + $0x178] sm:$0xf0]  ;;  %v925_v51 = vor.u32 %v1018_v45, %v924_v44  ;;  %v884_v52 = vld [vmem:[%s1578_s1 + $0x110] sm:$0xf]  ;;  %v1005_v54 = vld [vmem:[%s1578_s1 + $0x114] sm:$0xf] }
  0x1c   :  { %430 = vmatpush.bf16.msra.mxu3 %v785_v22  ;;  %v1009_v53 = vld [vmem:[%s1578_s1 + $0x12c] sm:$0xf0]  ;;  %v929_v55 = vor.u32 %v1014_v47, %v926_v48  ;;  %v886_v56 = vld [vmem:[%s1578_s1 + $0x130] sm:$0xf0]  ;;  %v892_v57 = vld [vmem:[%s1578_s1 + $0x118] sm:$0xf] }
  0x1d   :  { %v1010_v58 = vld [vmem:[%s1578_s1 + $0x134] sm:$0xf0]  ;;  %v1006_v59 = vld [vmem:[%s1578_s1 + $0x11c] sm:$0xf]  ;;  %v885_v61 = vor.u32 %v1009_v53, %v884_v52  ;;  %v889_v62 = vor.u32 %v1005_v54, %v886_v56  ;;  %v852_v0 = vld [vmem:[%s1578_s1 + $0xd0] sm:$0xf] }
  0x1e   :  { %389 = vmatpush.bf16.msra.mxu0 %v741_v29  ;;  %403 = vmatpush.bf16.msra.mxu1 %v745_v32  ;;  %v894_v60 = vld [vmem:[%s1578_s1 + $0x138] sm:$0xf0]  ;;  %v893_v63 = vor.u32 %v1010_v58, %v892_v57  ;;  %v1001_v1 = vld [vmem:[%s1578_s1 + $0xec] sm:$0xf0]  ;;  %v997_v2 = vld [vmem:[%s1578_s1 + $0xd4] sm:$0xf] }
  0x1f   :  { %417 = vmatpush.bf16.msra.mxu2 %v749_v33  ;;  %v897_v3 = vor.u32 %v1006_v59, %v894_v60  ;;  %v854_v4 = vld [vmem:[%s1578_s1 + $0xf0] sm:$0xf0]  ;;  %v860_v5 = vld [vmem:[%s1578_s1 + $0xd8] sm:$0xf]  ;;  %v998_v7 = vld [vmem:[%s1578_s1 + $0xdc] sm:$0xf]  ;;  %v853_v9 = vor.u32 %v1001_v1, %v852_v0 }
  0x20   :  { %431 = vmatpush.bf16.msra.mxu3 %v753_v35  ;;  %v1002_v6 = vld [vmem:[%s1578_s1 + $0xf4] sm:$0xf0]  ;;  %v862_v8 = vld [vmem:[%s1578_s1 + $0xf8] sm:$0xf0]  ;;  %v857_v10 = vor.u32 %v997_v2, %v854_v4  ;;  %v820_v12 = vld [vmem:[%s1578_s1 + $0x90] sm:$0xf] }
  0x21   :  { %962 = vmatmul.msk.bf16.vlgmr.msra.gmra.mxu0 %vm353_vm1, %v1270_v39  ;;  %963 = vmatmul.msk.bf16.vlgmr.msra.gmra.mxu1 %vm353_vm1, %v1270_v39  ;;  %v861_v11 = vor.u32 %v1002_v6, %v860_v5  ;;  %v993_v13 = vld [vmem:[%s1578_s1 + $0xac] sm:$0xf0]  ;;  %v989_v14 = vld [vmem:[%s1578_s1 + $0x94] sm:$0xf]  ;;  %v865_v15 = vor.u32 %v998_v7, %v862_v8  ;;  %v828_v17 = vld [vmem:[%s1578_s1 + $0x98] sm:$0xf] }
  0x22   :  { %439 = vmatpush.bf16.msrb.mxu0 %v371_v38  ;;  %453 = vmatpush.bf16.msrb.mxu1 %v374_v42  ;;  %v822_v16 = vld [vmem:[%s1578_s1 + $0xb0] sm:$0xf0]  ;;  %v994_v18 = vld [vmem:[%s1578_s1 + $0xb4] sm:$0xf0]  ;;  %v990_v19 = vld [vmem:[%s1578_s1 + $0x9c] sm:$0xf]  ;;  %v821_v21 = vor.u32 %v993_v13, %v820_v12 }
  0x23   :  { %467 = vmatpush.bf16.msrb.mxu2 %v377_v43  ;;  %965 = vmatmul.msk.bf16.vlgmr.msra.gmra.mxu3 %vm353_vm1, %v1270_v39  ;;  %v830_v20 = vld [vmem:[%s1578_s1 + $0xb8] sm:$0xf0]  ;;  %v825_v22 = vor.u32 %v989_v14, %v822_v16  ;;  %v829_v23 = vor.u32 %v994_v18, %v828_v17  ;;  %v788_v24 = vld [vmem:[%s1578_s1 + $0x50] sm:$0xf]  ;;  %v981_v26 = vld [vmem:[%s1578_s1 + $0x54] sm:$0xf] }
  0x24   :  { %481 = vmatpush.bf16.msrb.mxu3 %v380_v46  ;;  %964 = vmatmul.msk.bf16.vlgmr.msra.gmra.mxu2 %vm353_vm1, %v1270_v39  ;;  %v985_v25 = vld [vmem:[%s1578_s1 + $0x6c] sm:$0xf0]  ;;  %v833_v27 = vor.u32 %v990_v19, %v830_v20  ;;  %v790_v28 = vld [vmem:[%s1578_s1 + $0x70] sm:$0xf0]  ;;  %v796_v29 = vld [vmem:[%s1578_s1 + $0x58] sm:$0xf] }
  0x25   :  { %v986_v30 = vld [vmem:[%s1578_s1 + $0x74] sm:$0xf0]  ;;  %v982_v31 = vld [vmem:[%s1578_s1 + $0x5c] sm:$0xf]  ;;  %v789_v33 = vor.u32 %v985_v25, %v788_v24  ;;  %v793_v34 = vor.u32 %v981_v26, %v790_v28  ;;  %v756_v36 = vld [vmem:[%s1578_s1 + $0x10] sm:$0xf] }
  0x26   :  { %440 = vmatpush.bf16.msrb.mxu0 %v917_v49  ;;  %454 = vmatpush.bf16.msrb.mxu1 %v921_v50  ;;  %v798_v32 = vld [vmem:[%s1578_s1 + $0x78] sm:$0xf0]  ;;  %v797_v35 = vor.u32 %v986_v30, %v796_v29  ;;  %v977_v37 = vld [vmem:[%s1578_s1 + $0x2c] sm:$0xf0]  ;;  %v973_v38 = vld [vmem:[%s1578_s1 + $0x14] sm:$0xf] }
  0x27   :  { %468 = vmatpush.bf16.msrb.mxu2 %v925_v51  ;;  %v801_v40 = vor.u32 %v982_v31, %v798_v32  ;;  %v758_v41 = vld [vmem:[%s1578_s1 + $0x30] sm:$0xf0]  ;;  %v764_v42 = vld [vmem:[%s1578_s1 + $0x18] sm:$0xf]  ;;  %v974_v44 = vld [vmem:[%s1578_s1 + $0x1c] sm:$0xf]  ;;  %v757_v46 = vor.u32 %v977_v37, %v756_v36 }
  0x28   :  { %482 = vmatpush.bf16.msrb.mxu3 %v929_v55  ;;  %v978_v43 = vld [vmem:[%s1578_s1 + $0x34] sm:$0xf0]  ;;  %v766_v45 = vld [vmem:[%s1578_s1 + $0x38] sm:$0xf0]  ;;  %v761_v47 = vor.u32 %v973_v38, %v758_v41 }
  0x29   :  { %v765_v48 = vor.u32 %v978_v43, %v764_v42  ;;  %v769_v49 = vor.u32 %v974_v44, %v766_v45 }
  0x2a   :  { %441 = vmatpush.bf16.msrb.mxu0 %v885_v61  ;;  %455 = vmatpush.bf16.msrb.mxu1 %v889_v62 }
  0x2b   :  { %469 = vmatpush.bf16.msrb.mxu2 %v893_v63 }
  0x2c   :  { %483 = vmatpush.bf16.msrb.mxu3 %v897_v3 }
  0x2e   :  { %442 = vmatpush.bf16.msrb.mxu0 %v853_v9  ;;  %456 = vmatpush.bf16.msrb.mxu1 %v857_v10 }
  0x2f   :  { %470 = vmatpush.bf16.msrb.mxu2 %v861_v11 }
  0x30   :  { %484 = vmatpush.bf16.msrb.mxu3 %v865_v15 }
  0x32   :  { %443 = vmatpush.bf16.msrb.mxu0 %v821_v21  ;;  %457 = vmatpush.bf16.msrb.mxu1 %v825_v22 }
  0x33   :  { %471 = vmatpush.bf16.msrb.mxu2 %v829_v23 }
  0x34   :  { %485 = vmatpush.bf16.msrb.mxu3 %v833_v27 }
  0x36   :  { %444 = vmatpush.bf16.msrb.mxu0 %v789_v33  ;;  %458 = vmatpush.bf16.msrb.mxu1 %v793_v34 }
  0x37   :  { %472 = vmatpush.bf16.msrb.mxu2 %v797_v35 }
  0x38   :  { %486 = vmatpush.bf16.msrb.mxu3 %v801_v40 }
  0x3a   :  { %445 = vmatpush.bf16.msrb.mxu0 %v757_v46  ;;  %459 = vmatpush.bf16.msrb.mxu1 %v761_v47 }
  0x3b   :  { %473 = vmatpush.bf16.msrb.mxu2 %v765_v48 }
  0x3c   :  { %487 = vmatpush.bf16.msrb.mxu3 %v769_v49 }
  0x3d   :  { %966 = vmatmul.msk.bf16.vlgmr.msrb.gmra.mxu0 %vm353_vm1, %v1270_v39  ;;  %967 = vmatmul.msk.bf16.vlgmr.msrb.gmra.mxu1 %vm353_vm1, %v1270_v39 }
  0x3e   :  { %968 = vmatmul.msk.bf16.vlgmr.msrb.gmra.mxu2 %vm353_vm1, %v1270_v39 }
  0x3f   :  { %969 = vmatmul.msk.bf16.vlgmr.msrb.gmra.mxu3 %vm353_vm1, %v1270_v39 }
  0x9e   :  { %v391_v50 = vpop.f32.mrf.mxu0  ;;  %v405_v51 = vpop.f32.mrf.mxu1 }
  0x9f   :  { %v494_v54 = vadd.f32 %v405_v51, %v391_v50 }
  0xa6   :  { %v433_v53 = vpop.f32.mrf.mxu3  ;;  %v393_v55 = vpop.f32.mrf.mxu0 }
  0xa7   :  { %v419_v52 = vpop.f32.mrf.mxu2  ;;  %v407_v56 = vpop.f32.mrf.mxu1 }
  0xa8   :  { %v495_v57 = vadd.f32 %v494_v54, %v419_v52  ;;  %v612_v60 = vadd.f32 %v407_v56, %v393_v55 }
  0xaa   :  { %v496_v59 = vadd.f32 %v495_v57, %v433_v53 }
  0xae   :  { %v435_v61 = vpop.f32.mrf.mxu3 }
  0xaf   :  { %v421_v58 = vpop.f32.mrf.mxu2 }
  0xb0   :  { %v613_v1 = vadd.f32 %v612_v60, %v421_v58 }
  0xb2   :  { %v614_v4 = vadd.f32 %v613_v1, %v435_v61 }
  0xba   :  { %v447_v62 = vpop.f32.mrf.mxu0  ;;  %v461_v0 = vpop.f32.mrf.mxu1 }
  0xbb   :  { %v497_v63 = vadd.f32 %v496_v59, %v447_v62 }
  0xbd   :  { %v498_v2 = vadd.f32 %v497_v63, %v461_v0 }
  0xc1   :  { %v475_v3 = vpop.f32.mrf.mxu2 }
  0xc2   :  { %v499_v39 = vadd.f32 %v498_v2, %v475_v3  ;;  %v489_v5 = vpop.f32.mrf.mxu3  ;;  %v449_v6 = vpop.f32.mrf.mxu0 }
  0xc3   :  { %v615_v7 = vadd.f32 %v614_v4, %v449_v6  ;;  %v463_v9 = vpop.f32.mrf.mxu1 }
  0xc4   :  { %v500_v8 = vadd.f32 %v499_v39, %v489_v5 }
  0xc5   :  { %v616_v10 = vadd.f32 %v615_v7, %v463_v9 }
  0xc6   :  { %501 = vadd.xlane.f32.xlu0 %v500_v8 }
  0xc9   :  { %v477_v11 = vpop.f32.mrf.mxu2 }
  0xca   :  { %v617_v12 = vadd.f32 %v616_v10, %v477_v11  ;;  %v491_v13 = vpop.f32.mrf.mxu3 }
  0xcc   :  { %v618_v14 = vadd.f32 %v617_v12, %v491_v13 }
  0xce   :  { %619 = vadd.xlane.f32.xlu0 %v618_v14 }
 0x139   :  { %v502_v15 = vpop.xlane.xlu0 %501 }
 0x13a   :  { %v503_v16 = vrot.slane %v502_v15, 4 }
 0x13c   :  { %v504_v17 = vadd.f32 %v503_v16, %v502_v15 }
 0x13e   :  { %v505_v18 = vrot.slane %v504_v17, 2 }
 0x140   :  { %v506_v19 = vadd.f32 %v505_v18, %v504_v17 }
 0x141   :  { %v620_v20 = vpop.xlane.xlu0 %619 }
 0x142   :  { %v507_v21 = vrot.slane %v506_v19, 1  ;;  %v621_v22 = vrot.slane %v620_v20, 4 }
 0x144   :  { %v508_v23 = vadd.f32 %v507_v21, %v506_v19  ;;  %v622_v24 = vadd.f32 %v621_v22, %v620_v20 }
 0x146   :  { %v509_v25 = vmul.f32 0.00012207031, %v508_v23  ;;  %v623_v26 = vrot.slane %v622_v24, 2 }
 0x148   :  { %v624_v27 = vadd.f32 %v623_v26, %v622_v24  ;;  %v1429_v28 = vsub.f32 %v391_v50, %v509_v25  ;;  %v1431_v29 = vsub.f32 %v405_v51, %v509_v25  ;;  %v1433_v30 = vsub.f32 %v419_v52, %v509_v25 }
 0x149   :  { %v1435_v32 = vsub.f32 %v433_v53, %v509_v25  ;;  %v1441_v35 = vsub.f32 %v447_v62, %v509_v25  ;;  %v1445_v40 = vsub.f32 %v461_v0, %v509_v25  ;;  %v1449_v44 = vsub.f32 %v475_v3, %v509_v25 }
 0x14a   :  { %v625_v31 = vrot.slane %v624_v27, 1  ;;  %v518_v33 = vmul.f32 %v1429_v28, %v1429_v28  ;;  %v519_v34 = vmul.f32 %v1431_v29, %v1431_v29  ;;  %v520_v37 = vmul.f32 %v1433_v30, %v1433_v30 }
 0x14b   :  { %v521_v42 = vmul.f32 %v1435_v32, %v1435_v32  ;;  %v522_v45 = vmul.f32 %v1441_v35, %v1441_v35  ;;  %v1459_v50 = vsub.f32 %v489_v5, %v509_v25  ;;  %v523_v51 = vmul.f32 %v1445_v40, %v1445_v40 }
 0x14c   :  { %v626_v36 = vadd.f32 %v625_v31, %v624_v27  ;;  %v526_v38 = vadd.f32 %v519_v34, %v518_v33 }
 0x14e   :  { %v627_v41 = vmul.f32 0.00012207031, %v626_v36  ;;  %v527_v43 = vadd.f32 %v526_v38, %v520_v37 }
 0x150   :  { %v528_v46 = vadd.f32 %v527_v43, %v521_v42  ;;  %v1453_v47 = vsub.f32 %v393_v55, %v627_v41  ;;  %v1455_v48 = vsub.f32 %v407_v56, %v627_v41  ;;  %v1457_v49 = vsub.f32 %v421_v58, %v627_v41 }
 0x151   :  { %v1463_v53 = vsub.f32 %v435_v61, %v627_v41  ;;  %v524_v55 = vmul.f32 %v1449_v44, %v1449_v44  ;;  %v1471_v58 = vsub.f32 %v449_v6, %v627_v41  ;;  %v525_v61 = vmul.f32 %v1459_v50, %v1459_v50 }
 0x152   :  { %v529_v52 = vadd.f32 %v528_v46, %v522_v45  ;;  %v636_v54 = vmul.f32 %v1453_v47, %v1453_v47  ;;  %v637_v57 = vmul.f32 %v1455_v48, %v1455_v48  ;;  %v638_v59 = vmul.f32 %v1457_v49, %v1457_v49 }
 0x153   :  { %v1477_v63 = vsub.f32 %v463_v9, %v627_v41  ;;  %v639_v0 = vmul.f32 %v1463_v53, %v1463_v53  ;;  %v1481_v3 = vsub.f32 %v477_v11, %v627_v41  ;;  %v640_v4 = vmul.f32 %v1471_v58, %v1471_v58 }
 0x154   :  { %v530_v56 = vadd.f32 %v529_v52, %v523_v51  ;;  %v644_v60 = vadd.f32 %v637_v57, %v636_v54  ;;  %v1485_v5 = vsub.f32 %v491_v13, %v627_v41  ;;  %v553_v51 = vld [vmem:[%s1580_s2] sm:$0x1] }
 0x155   :  { %v641_v6 = vmul.f32 %v1477_v63, %v1477_v63  ;;  %v642_v8 = vmul.f32 %v1481_v3, %v1481_v3 }
 0x156   :  { %v531_v62 = vadd.f32 %v530_v56, %v524_v55  ;;  %v645_v1 = vadd.f32 %v644_v60, %v638_v59  ;;  %v643_v10 = vmul.f32 %v1485_v5, %v1485_v5  ;;  %v567_v55 = vld [vmem:[%s1581_s3] sm:$0x1] }
 0x158   :  { %v532_v2 = vadd.f32 %v531_v62, %v525_v61  ;;  %v646_v39 = vadd.f32 %v645_v1, %v639_v0  ;;  %v671_v61 = vld [vmem:[%s1580_s2 + $0x1] sm:$0x1] }
 0x159   :  { %v685_v1 = vld [vmem:[%s1581_s3 + $0x1] sm:$0x1] }
 0x15a   :  { %533 = vadd.xlane.f32.xlu1 %v532_v2  ;;  %v647_v7 = vadd.f32 %v646_v39, %v640_v4 }
 0x15c   :  { %v648_v9 = vadd.f32 %v647_v7, %v641_v6 }
 0x15e   :  { %v649_v11 = vadd.f32 %v648_v9, %v642_v8 }
 0x160   :  { %v650_v12 = vadd.f32 %v649_v11, %v643_v10 }
 0x162   :  { %651 = vadd.xlane.f32.xlu1 %v650_v12 }
 0x1cd   :  { %v534_v14 = vpop.xlane.xlu1 %533 }
 0x1ce   :  { %v535_v15 = vrot.slane %v534_v14, 4 }
 0x1d0   :  { %v536_v16 = vadd.f32 %v535_v15, %v534_v14 }
 0x1d2   :  { %v537_v17 = vrot.slane %v536_v16, 2 }
 0x1d4   :  { %v538_v13 = vadd.f32 %v537_v17, %v536_v16 }
 0x1d5   :  { %v652_v18 = vpop.xlane.xlu1 %651 }
 0x1d6   :  { %v539_v19 = vrot.slane %v538_v13, 1  ;;  %v653_v20 = vrot.slane %v652_v18, 4 }
 0x1d8   :  { %v540_v21 = vadd.f32 %v539_v19, %v538_v13  ;;  %v654_v22 = vadd.f32 %v653_v20, %v652_v18 }
 0x1da   :  { %v541_v23 = vmul.f32 0.00012207031, %v540_v21  ;;  %v655_v24 = vrot.slane %v654_v22, 2 }
 0x1dc   :  { %v542_v25 = vadd.f32 1e-05, %v541_v23  ;;  %v656_v26 = vadd.f32 %v655_v24, %v654_v22 }
 0x1de   :  { %1035 = vrsqrt.f32 %v542_v25  ;;  %v657_v27 = vrot.slane %v656_v26, 1  ;;  %vm549_vm3 = vweird.f32 %v542_v25 }
 0x1e0   :  { %v658_v31 = vadd.f32 %v657_v27, %v656_v26 }
 0x1e2   :  { %v659_v33 = vmul.f32 0.00012207031, %v658_v31 }
 0x1e4   :  { %v1036_v34 = vpop.eup %1035  ;;  %v660_v36 = vadd.f32 1e-05, %v659_v33 }
 0x1e5   :  { %v544_v37 = vmul.f32 %v1036_v34, %v542_v25  ;;  %vm550_vm2 = vweird.f32 %v1036_v34 }
 0x1e6   :  { %1037 = vrsqrt.f32 %v660_v36  ;;  %vm551_vm4 = vmor %vm549_vm3, %vm550_vm2  ;;  %vm667_vm6 = vweird.f32 %v660_v36 }
 0x1e7   :  { %v545_v38 = vmul.f32 %v1036_v34, %v544_v37 }
 0x1e9   :  { %v546_v41 = vmul.f32 0.5, %v545_v38 }
 0x1eb   :  { %v547_v42 = vsub.f32 1.5, %v546_v41 }
 0x1ec   :  { %v1038_v43 = vpop.eup %1037 }
 0x1ed   :  { %v662_v45 = vmul.f32 %v1038_v43, %v660_v36  ;;  %v548_v46 = vmul.f32 %v1036_v34, %v547_v42  ;;  %vm668_vm5 = vweird.f32 %v1038_v43 }
 0x1ee   :  { %vm669_vm7 = vmor %vm667_vm6, %vm668_vm5 }
 0x1ef   :  { %v552_v52 = vsel %vm551_vm4, %v1036_v34, %v548_v46  ;;  %v663_v54 = vmul.f32 %v1038_v43, %v662_v45 }
 0x1f0   :  { %v554_v57 = vmul.f32 %v553_v51, %v552_v52 }
 0x1f1   :  { %v664_v56 = vmul.f32 0.5, %v663_v54 }
 0x1f2   :  { %1027 = vpush %v554_v57 }
 0x1f3   :  { %1029 = vpush %v567_v55  ;;  %v665_v59 = vsub.f32 1.5, %v664_v56 }
 0x1f5   :  { %v666_v60 = vmul.f32 %v1038_v43, %v665_v59 }
 0x1f7   :  { %v670_v62 = vsel %vm669_vm7, %v1038_v43, %v666_v60 }
 0x1f8   :  { %v672_v0 = vmul.f32 %v671_v61, %v670_v62 }
 0x1fa   :  { %1031 = vpush %v672_v0 }
 0x1fb   :  { %1033 = vpush %v685_v1 }
 0x223   :  { %s1028_s10 = spop %1027 }
 0x224   :  { %v557_v2 = vstv %s1028_s10  ;;  %s1030_s11 = spop %1029 }
 0x225   :  { %v559_v4 = vmul.f32 %v557_v2, %v1429_v28  ;;  %v560_v39 = vmul.f32 %v557_v2, %v1431_v29  ;;  %v561_v6 = vmul.f32 %v557_v2, %v1433_v30  ;;  %v562_v7 = vmul.f32 %v557_v2, %v1435_v32 }
 0x226   :  { %v563_v8 = vmul.f32 %v557_v2, %v1441_v35  ;;  %v564_v9 = vmul.f32 %v557_v2, %v1445_v40  ;;  %v565_v10 = vmul.f32 %v557_v2, %v1449_v44  ;;  %v566_v11 = vmul.f32 %v557_v2, %v1459_v50 }
 0x227   :  { %v570_v12 = vstv %s1030_s11 }
 0x228   :  { %v572_v14 = vadd.f32 %v570_v12, %v559_v4  ;;  %v573_v15 = vadd.f32 %v570_v12, %v560_v39  ;;  %v574_v16 = vadd.f32 %v570_v12, %v561_v6  ;;  %v575_v17 = vadd.f32 %v570_v12, %v562_v7 }
 0x229   :  { %v576_v28 = vadd.f32 %v570_v12, %v563_v8  ;;  %v577_v13 = vadd.f32 %v570_v12, %v564_v9  ;;  %v578_v29 = vadd.f32 %v570_v12, %v565_v10  ;;  %v579_v18 = vadd.f32 %v570_v12, %v566_v11 }
 0x22a   :  { %vm580_vm8 = vcmp.gt.f32.partialorder %v572_v14, 0.0  ;;  %vm581_vm9 = vcmp.gt.f32.partialorder %v573_v15, 0.0  ;;  %vm582_vm10 = vcmp.gt.f32.partialorder %v574_v16, 0.0  ;;  %vm583_vm11 = vcmp.gt.f32.partialorder %v575_v17, 0.0 }
 0x22b   :  { %vm584_vm12 = vcmp.gt.f32.partialorder %v576_v28, 0.0  ;;  %vm585_vm13 = vcmp.gt.f32.partialorder %v577_v13, 0.0  ;;  %vm586_vm14 = vcmp.gt.f32.partialorder %v578_v29, 0.0  ;;  %s1032_s2 = spop %1031  ;;  %v588_v30 = vmul.f32 0.2, %v572_v14 }
 0x22c   :  { %v589_v32 = vmul.f32 0.2, %v573_v15  ;;  %v590_v35 = vmul.f32 0.2, %v574_v16  ;;  %v675_v40 = vstv %s1032_s2  ;;  %v591_v44 = vmul.f32 0.2, %v575_v17  ;;  %s1034_s13 = spop %1033 }
 0x22d   :  { %v592_v50 = vmul.f32 0.2, %v576_v28  ;;  %v593_v19 = vmul.f32 0.2, %v577_v13  ;;  %v594_v20 = vmul.f32 0.2, %v578_v29  ;;  %v596_v22 = vsel %vm580_vm8, %v572_v14, %v588_v30 }
 0x22e   :  { %v595_v21 = vmul.f32 0.2, %v579_v18  ;;  %v597_v23 = vsel %vm581_vm9, %v573_v15, %v589_v32  ;;  %vm587_vm15 = vcmp.gt.f32.partialorder %v579_v18, 0.0  ;;  %v598_v24 = vsel %vm582_vm10, %v574_v16, %v590_v35  ;;  %604 = vst [vmem:[%s1582_s4] sm:$0xff] %v596_v22 }
 0x22f   :  { %v599_v25 = vsel %vm583_vm11, %v575_v17, %v591_v44  ;;  %v677_v26 = vmul.f32 %v675_v40, %v1453_v47  ;;  %v600_v27 = vsel %vm584_vm12, %v576_v28, %v592_v50  ;;  %v601_v31 = vsel %vm585_vm13, %v577_v13, %v593_v19  ;;  %605 = vst [vmem:[%s1582_s4 + $0x8] sm:$0xff] %v597_v23 }
 0x230   :  { %v678_v33 = vmul.f32 %v675_v40, %v1455_v48  ;;  %v679_v34 = vmul.f32 %v675_v40, %v1457_v49  ;;  %606 = vst [vmem:[%s1582_s4 + $0x10] sm:$0xff] %v598_v24  ;;  %v680_v36 = vmul.f32 %v675_v40, %v1463_v53  ;;  %v681_v47 = vmul.f32 %v675_v40, %v1471_v58 }
 0x231   :  { %v682_v37 = vmul.f32 %v675_v40, %v1477_v63  ;;  %v683_v38 = vmul.f32 %v675_v40, %v1481_v3  ;;  %v602_v41 = vsel %vm586_vm14, %v578_v29, %v594_v20  ;;  %v603_v42 = vsel %vm587_vm15, %v579_v18, %v595_v21  ;;  %607 = vst [vmem:[%s1582_s4 + $0x18] sm:$0xff] %v599_v25 }
 0x232   :  { %v684_v48 = vmul.f32 %v675_v40, %v1485_v5  ;;  %v688_v49 = vstv %s1034_s13  ;;  %608 = vst [vmem:[%s1582_s4 + $0x20] sm:$0xff] %v600_v27 }
 0x233   :  { %v690_v53 = vadd.f32 %v688_v49, %v677_v26  ;;  %v691_v58 = vadd.f32 %v688_v49, %v678_v33  ;;  %v692_v63 = vadd.f32 %v688_v49, %v679_v34  ;;  %v693_v43 = vadd.f32 %v688_v49, %v680_v36  ;;  %609 = vst [vmem:[%s1582_s4 + $0x28] sm:$0xff] %v601_v31 }
 0x234   :  { %v694_v3 = vadd.f32 %v688_v49, %v681_v47  ;;  %v695_v45 = vadd.f32 %v688_v49, %v682_v37  ;;  %610 = vst [vmem:[%s1582_s4 + $0x30] sm:$0xff] %v602_v41  ;;  %v696_v5 = vadd.f32 %v688_v49, %v683_v38  ;;  %v697_v46 = vadd.f32 %v688_v49, %v684_v48 }
 0x235   :  { %vm698_vm0 = vcmp.gt.f32.partialorder %v690_v53, 0.0  ;;  %611 = vst [vmem:[%s1582_s4 + $0x38] sm:$0xff] %v603_v42  ;;  %vm699_vm1 = vcmp.gt.f32.partialorder %v691_v58, 0.0  ;;  %vm700_vm2 = vcmp.gt.f32.partialorder %v692_v63, 0.0  ;;  %vm701_vm3 = vcmp.gt.f32.partialorder %v693_v43, 0.0 }
 0x236   :  { %vm702_vm4 = vcmp.gt.f32.partialorder %v694_v3, 0.0  ;;  %v706_v51 = vmul.f32 0.2, %v690_v53  ;;  %v707_v52 = vmul.f32 0.2, %v691_v58  ;;  %vm703_vm5 = vcmp.gt.f32.partialorder %v695_v45, 0.0 }
 0x237   :  { %v708_v54 = vmul.f32 0.2, %v692_v63  ;;  %v709_v57 = vmul.f32 0.2, %v693_v43  ;;  %v710_v55 = vmul.f32 0.2, %v694_v3 }
 0x238   :  { %v711_v56 = vmul.f32 0.2, %v695_v45  ;;  %v712_v59 = vmul.f32 0.2, %v696_v5  ;;  %v714_v60 = vsel %vm698_vm0, %v690_v53, %v706_v51  ;;  %v715_v61 = vsel %vm699_vm1, %v691_v58, %v707_v52 }
 0x239   :  { %vm704_vm6 = vcmp.gt.f32.partialorder %v696_v5, 0.0  ;;  %v713_v62 = vmul.f32 0.2, %v697_v46  ;;  %v716_v0 = vsel %vm700_vm2, %v692_v63, %v708_v54  ;;  %v717_v1 = vsel %vm701_vm3, %v693_v43, %v709_v57  ;;  %722 = vst [vmem:[%s1582_s4 + $0x40] sm:$0xff] %v714_v60 }
 0x23a   :  { %vm705_vm7 = vcmp.gt.f32.partialorder %v697_v46, 0.0  ;;  %v718_v2 = vsel %vm702_vm4, %v694_v3, %v710_v55  ;;  %723 = vst [vmem:[%s1582_s4 + $0x48] sm:$0xff] %v715_v61  ;;  %v719_v4 = vsel %vm703_vm5, %v695_v45, %v711_v56  ;;  %v720_v39 = vsel %vm704_vm6, %v696_v5, %v712_v59 }
 0x23b   :  { %724 = vst [vmem:[%s1582_s4 + $0x50] sm:$0xff] %v716_v0  ;;  %v721_v6 = vsel %vm705_vm7, %v697_v46, %v713_v62 }
 0x23c   :  { %725 = vst [vmem:[%s1582_s4 + $0x58] sm:$0xff] %v717_v1 }
 0x23d   :  { %726 = vst [vmem:[%s1582_s4 + $0x60] sm:$0xff] %v718_v2 }
 0x23e   :  { %727 = vst [vmem:[%s1582_s4 + $0x68] sm:$0xff] %v719_v4 }
 0x23f   :  { %728 = vst [vmem:[%s1582_s4 + $0x70] sm:$0xff] %v720_v39 }
 0x240   :  { %729 = vst [vmem:[%s1582_s4 + $0x78] sm:$0xff] %v721_v6 }

// kernel: decoder_forward.5
= control target key start
LH: loop header
LB: loop body
LE: loop exit
PB: predicated region body
PF: predicated region fallthrough
CT: control target
= control target key end

     0   :  { %s2294_s9 = smov 0   ;;  %s2296_s10 = smov 0   ;;  %s2919_s0 = inlined_call_operand.vmem [shape: bf16[8,54], index: 0, kind: input, shape index: {}]   ;;  %s2920_s1 = inlined_call_operand.vmem [shape: bf16[54,8192], index: 1, kind: input, shape index: {}]   ;;  %s2921_s2 = inlined_call_operand.vmem [shape: f32[8,8192], index: 2, kind: output, shape index: {}]  }
   0x1   :  { %s2298_s11 = smov 0  }
   0x2 LB: > { %s1705_s12 = sadd.s32 4294967295, %s2277_s11   ;;  %s2311_s13 = sadd.s32 1, %s2277_s11   ;;  %s2277_s11 = sphi %s2298_s11, %s2924_s11   ;;  %s2273_s10 = sphi %s2296_s10, %s2923_s10   ;;  %s2269_s9 = sphi %s2294_s9, %s2922_s9  }
   0x3   : > { %s37_s14 = ssub.s32 %s2277_s11, %s2311_s13  ;;  %s40_s15 = sadd.s32 1, %s2273_s10 }
   0x4   : > { %p38_p0 = scmp.eq.s32.totalorder %s37_s14, 0  ;;  %p47_p1 = scmp.ne.s32.totalorder %s2273_s10, %s2269_s9 }
   0x5   : > { %p48_p2 = scmp.eq.s32.totalorder %s2277_s11, 0  ;;  %p1708_p4 = scmp.ge.s32.totalorder %s2277_s11, 2 }
   0x6   : > { %s2320_s16 = scalar_select %p38_p0, %s2273_s10, %s40_s15  }
   0x7   : > { %p49_p3 = por %p48_p2, %p47_p1  ;;  %102 = sbr.rel (%p1708_p4) target bundleno = 128 (0x80), region = 20 }
   0xc   : > { %105 = sbr.rel (!%p49_p3) target bundleno = 128 (0x80), region = 24  ;;  %s107_s17 = sand.u32 (%p49_p3), 1, %s2273_s10  }
   0xd   : > { %s2132_s18 = sshll.u32 (%p49_p3), %s2277_s11, 7  ;;  %s2229_s19 = smul.u32 (%p49_p3), 896, %s107_s17 }
   0xe   : > { %s2328_s22 = scalar_lea.vmem (%p49_p3), %s2920_s1, %s2132_s18 }
   0xf   : > { %v125_v0 = vld [vmem:[%s2328_s22] sm:$0xff] (%p49_p3)  ;;  %v127_v1 = vld [vmem:[%s2328_s22 + $0x8] sm:$0xff] (%p49_p3)  ;;  %v129_v2 = vld [vmem:[%s2328_s22 + $0x10] sm:$0xff] (%p49_p3)  ;;  %s2333_s23 = scalar_lea.vmem (%p49_p3), [#allocation2], %s2229_s19 }
  0x10   : > { %126 = vst [vmem:[%s2333_s23] sm:$0xff] (%p49_p3), %v125_v0  ;;  %v131_v3 = vld [vmem:[%s2328_s22 + $0x18] sm:$0xff] (%p49_p3)  ;;  %v133_v4 = vld [vmem:[%s2328_s22 + $0x20] sm:$0xff] (%p49_p3)  ;;  %v135_v5 = vld [vmem:[%s2328_s22 + $0x28] sm:$0xff] (%p49_p3) }
  0x11   : > { %128 = vst [vmem:[%s2333_s23 + $0x8] sm:$0xff] %v127_v1  ;;  %v137_v6 = vld [vmem:[%s2328_s22 + $0x30] sm:$0xff]  ;;  %v139_v7 = vld [vmem:[%s2328_s22 + $0x38] sm:$0xff]  ;;  %v141_v8 = vld [vmem:[%s2328_s22 + $0x40] sm:$0xff] }
  0x12   : > { %130 = vst [vmem:[%s2333_s23 + $0x10] sm:$0xff] %v129_v2  ;;  %v143_v9 = vld [vmem:[%s2328_s22 + $0x48] sm:$0xff]  ;;  %v145_v10 = vld [vmem:[%s2328_s22 + $0x50] sm:$0xff]  ;;  %v147_v11 = vld [vmem:[%s2328_s22 + $0x58] sm:$0xff] }
  0x13   : > { %132 = vst [vmem:[%s2333_s23 + $0x18] sm:$0xff] %v131_v3  ;;  %v149_v12 = vld [vmem:[%s2328_s22 + $0x60] sm:$0xff]  ;;  %v151_v13 = vld [vmem:[%s2328_s22 + $0x68] sm:$0xff]  ;;  %v153_v14 = vld [vmem:[%s2328_s22 + $0x70] sm:$0xff] }
  0x14   : > { %134 = vst [vmem:[%s2333_s23 + $0x20] sm:$0xff] %v133_v4  ;;  %v155_v15 = vld [vmem:[%s2328_s22 + $0x78] sm:$0xff]  ;;  %v157_v16 = vld [vmem:[%s2328_s22 + $0x100] sm:$0xff]  ;;  %v159_v17 = vld [vmem:[%s2328_s22 + $0x108] sm:$0xff] }
  0x15   : > { %136 = vst [vmem:[%s2333_s23 + $0x28] sm:$0xff] %v135_v5  ;;  %v161_v18 = vld [vmem:[%s2328_s22 + $0x110] sm:$0xff]  ;;  %v163_v19 = vld [vmem:[%s2328_s22 + $0x118] sm:$0xff]  ;;  %v165_v20 = vld [vmem:[%s2328_s22 + $0x120] sm:$0xff] }
  0x16   : > { %138 = vst [vmem:[%s2333_s23 + $0x30] sm:$0xff] %v137_v6  ;;  %v167_v21 = vld [vmem:[%s2328_s22 + $0x128] sm:$0xff]  ;;  %v169_v22 = vld [vmem:[%s2328_s22 + $0x130] sm:$0xff]  ;;  %v171_v23 = vld [vmem:[%s2328_s22 + $0x138] sm:$0xff] }
  0x17   : > { %140 = vst [vmem:[%s2333_s23 + $0x38] sm:$0xff] %v139_v7  ;;  %v173_v24 = vld [vmem:[%s2328_s22 + $0x140] sm:$0xff]  ;;  %v175_v25 = vld [vmem:[%s2328_s22 + $0x148] sm:$0xff]  ;;  %v177_v26 = vld [vmem:[%s2328_s22 + $0x150] sm:$0xff] }
  0x18   : > { %142 = vst [vmem:[%s2333_s23 + $0x40] sm:$0xff] %v141_v8  ;;  %v179_v27 = vld [vmem:[%s2328_s22 + $0x158] sm:$0xff]  ;;  %v181_v28 = vld [vmem:[%s2328_s22 + $0x160] sm:$0xff]  ;;  %v183_v29 = vld [vmem:[%s2328_s22 + $0x168] sm:$0xff] }
  0x19   : > { %144 = vst [vmem:[%s2333_s23 + $0x48] sm:$0xff] %v143_v9  ;;  %v185_v30 = vld [vmem:[%s2328_s22 + $0x170] sm:$0xff]  ;;  %v187_v31 = vld [vmem:[%s2328_s22 + $0x178] sm:$0xff]  ;;  %v189_v32 = vld [vmem:[%s2328_s22 + $0x200] sm:$0xff] }
  0x1a   : > { %146 = vst [vmem:[%s2333_s23 + $0x50] sm:$0xff] %v145_v10  ;;  %v191_v33 = vld [vmem:[%s2328_s22 + $0x208] sm:$0xff]  ;;  %v193_v34 = vld [vmem:[%s2328_s22 + $0x210] sm:$0xff]  ;;  %v195_v35 = vld [vmem:[%s2328_s22 + $0x218] sm:$0xff] }
  0x1b   : > { %148 = vst [vmem:[%s2333_s23 + $0x58] sm:$0xff] %v147_v11  ;;  %v197_v36 = vld [vmem:[%s2328_s22 + $0x220] sm:$0xff]  ;;  %v199_v37 = vld [vmem:[%s2328_s22 + $0x228] sm:$0xff]  ;;  %v201_v38 = vld [vmem:[%s2328_s22 + $0x230] sm:$0xff] }
  0x1c   : > { %150 = vst [vmem:[%s2333_s23 + $0x60] sm:$0xff] %v149_v12  ;;  %v203_v39 = vld [vmem:[%s2328_s22 + $0x238] sm:$0xff]  ;;  %v205_v40 = vld [vmem:[%s2328_s22 + $0x240] sm:$0xff]  ;;  %v207_v41 = vld [vmem:[%s2328_s22 + $0x248] sm:$0xff] }
  0x1d   : > { %152 = vst [vmem:[%s2333_s23 + $0x68] sm:$0xff] %v151_v13  ;;  %v209_v42 = vld [vmem:[%s2328_s22 + $0x250] sm:$0xff]  ;;  %v211_v43 = vld [vmem:[%s2328_s22 + $0x258] sm:$0xff]  ;;  %v213_v44 = vld [vmem:[%s2328_s22 + $0x260] sm:$0xff] }
  0x1e   : > { %154 = vst [vmem:[%s2333_s23 + $0x70] sm:$0xff] %v153_v14  ;;  %v215_v45 = vld [vmem:[%s2328_s22 + $0x268] sm:$0xff]  ;;  %v217_v46 = vld [vmem:[%s2328_s22 + $0x270] sm:$0xff]  ;;  %v219_v47 = vld [vmem:[%s2328_s22 + $0x278] sm:$0xff] }
  0x1f   : > { %156 = vst [vmem:[%s2333_s23 + $0x78] sm:$0xff] %v155_v15  ;;  %v221_v48 = vld [vmem:[%s2328_s22 + $0x300] sm:$0xff]  ;;  %v223_v49 = vld [vmem:[%s2328_s22 + $0x308] sm:$0xff]  ;;  %v225_v50 = vld [vmem:[%s2328_s22 + $0x310] sm:$0xff] }
  0x20   : > { %158 = vst [vmem:[%s2333_s23 + $0x80] sm:$0xff] %v157_v16  ;;  %v227_v51 = vld [vmem:[%s2328_s22 + $0x318] sm:$0xff]  ;;  %v229_v52 = vld [vmem:[%s2328_s22 + $0x320] sm:$0xff]  ;;  %v231_v53 = vld [vmem:[%s2328_s22 + $0x328] sm:$0xff] }
  0x21   : > { %160 = vst [vmem:[%s2333_s23 + $0x88] sm:$0xff] %v159_v17  ;;  %v233_v54 = vld [vmem:[%s2328_s22 + $0x330] sm:$0xff]  ;;  %v235_v55 = vld [vmem:[%s2328_s22 + $0x338] sm:$0xff]  ;;  %v237_v56 = vld [vmem:[%s2328_s22 + $0x340] sm:$0xff] }
  0x22   : > { %162 = vst [vmem:[%s2333_s23 + $0x90] sm:$0xff] %v161_v18  ;;  %v239_v57 = vld [vmem:[%s2328_s22 + $0x348] sm:$0xff]  ;;  %v241_v58 = vld [vmem:[%s2328_s22 + $0x350] sm:$0xff]  ;;  %v243_v59 = vld [vmem:[%s2328_s22 + $0x358] sm:$0xff] }
  0x23   : > { %164 = vst [vmem:[%s2333_s23 + $0x98] sm:$0xff] %v163_v19  ;;  %v245_v60 = vld [vmem:[%s2328_s22 + $0x360] sm:$0xff]  ;;  %v247_v61 = vld [vmem:[%s2328_s22 + $0x368] sm:$0xff]  ;;  %v249_v62 = vld [vmem:[%s2328_s22 + $0x370] sm:$0xff] }
  0x24   : > { %166 = vst [vmem:[%s2333_s23 + $0xa0] sm:$0xff] %v165_v20  ;;  %v251_v63 = vld [vmem:[%s2328_s22 + $0x378] sm:$0xff]  ;;  %v253_v0 = vld [vmem:[%s2328_s22 + $0x400] sm:$0xff]  ;;  %v255_v1 = vld [vmem:[%s2328_s22 + $0x408] sm:$0xff] }
  0x25   : > { %168 = vst [vmem:[%s2333_s23 + $0xa8] sm:$0xff] %v167_v21  ;;  %v257_v2 = vld [vmem:[%s2328_s22 + $0x410] sm:$0xff]  ;;  %v259_v3 = vld [vmem:[%s2328_s22 + $0x418] sm:$0xff]  ;;  %v261_v4 = vld [vmem:[%s2328_s22 + $0x420] sm:$0xff] }
  0x26   : > { %170 = vst [vmem:[%s2333_s23 + $0xb0] sm:$0xff] %v169_v22  ;;  %v263_v5 = vld [vmem:[%s2328_s22 + $0x428] sm:$0xff]  ;;  %v265_v6 = vld [vmem:[%s2328_s22 + $0x430] sm:$0xff]  ;;  %v267_v7 = vld [vmem:[%s2328_s22 + $0x438] sm:$0xff] }
  0x27   : > { %172 = vst [vmem:[%s2333_s23 + $0xb8] sm:$0xff] %v171_v23  ;;  %v269_v8 = vld [vmem:[%s2328_s22 + $0x440] sm:$0xff]  ;;  %v271_v9 = vld [vmem:[%s2328_s22 + $0x448] sm:$0xff]  ;;  %v273_v10 = vld [vmem:[%s2328_s22 + $0x450] sm:$0xff] }
  0x28   : > { %174 = vst [vmem:[%s2333_s23 + $0xc0] sm:$0xff] %v173_v24  ;;  %v275_v11 = vld [vmem:[%s2328_s22 + $0x458] sm:$0xff]  ;;  %v277_v12 = vld [vmem:[%s2328_s22 + $0x460] sm:$0xff]  ;;  %v279_v13 = vld [vmem:[%s2328_s22 + $0x468] sm:$0xff] }
  0x29   : > { %176 = vst [vmem:[%s2333_s23 + $0xc8] sm:$0xff] %v175_v25  ;;  %v281_v14 = vld [vmem:[%s2328_s22 + $0x470] sm:$0xff]  ;;  %v283_v15 = vld [vmem:[%s2328_s22 + $0x478] sm:$0xff]  ;;  %v285_v16 = vld [vmem:[%s2328_s22 + $0x500] sm:$0xff] }
  0x2a   : > { %178 = vst [vmem:[%s2333_s23 + $0xd0] sm:$0xff] %v177_v26  ;;  %v287_v17 = vld [vmem:[%s2328_s22 + $0x508] sm:$0xff]  ;;  %v289_v18 = vld [vmem:[%s2328_s22 + $0x510] sm:$0xff]  ;;  %v291_v19 = vld [vmem:[%s2328_s22 + $0x518] sm:$0xff] }
  0x2b   : > { %180 = vst [vmem:[%s2333_s23 + $0xd8] sm:$0xff] %v179_v27  ;;  %v293_v20 = vld [vmem:[%s2328_s22 + $0x520] sm:$0xff]  ;;  %v295_v21 = vld [vmem:[%s2328_s22 + $0x528] sm:$0xff]  ;;  %v297_v22 = vld [vmem:[%s2328_s22 + $0x530] sm:$0xff] }
  0x2c   : > { %182 = vst [vmem:[%s2333_s23 + $0xe0] sm:$0xff] %v181_v28  ;;  %v299_v23 = vld [vmem:[%s2328_s22 + $0x538] sm:$0xff]  ;;  %v301_v24 = vld [vmem:[%s2328_s22 + $0x540] sm:$0xff]  ;;  %v303_v25 = vld [vmem:[%s2328_s22 + $0x548] sm:$0xff] }
  0x2d   : > { %184 = vst [vmem:[%s2333_s23 + $0xe8] sm:$0xff] %v183_v29  ;;  %v305_v26 = vld [vmem:[%s2328_s22 + $0x550] sm:$0xff]  ;;  %v307_v27 = vld [vmem:[%s2328_s22 + $0x558] sm:$0xff]  ;;  %v309_v28 = vld [vmem:[%s2328_s22 + $0x560] sm:$0xff] }
  0x2e   : > { %186 = vst [vmem:[%s2333_s23 + $0xf0] sm:$0xff] %v185_v30  ;;  %v311_v29 = vld [vmem:[%s2328_s22 + $0x568] sm:$0xff]  ;;  %v313_v30 = vld [vmem:[%s2328_s22 + $0x570] sm:$0xff] }
  0x2f   : > { %188 = vst [vmem:[%s2333_s23 + $0xf8] sm:$0xff] %v187_v31  ;;  %v315_v31 = vld [vmem:[%s2328_s22 + $0x578] sm:$0xff] }
  0x30   : > { %190 = vst [vmem:[%s2333_s23 + $0x100] sm:$0xff] %v189_v32  ;;  %v317_v32 = vld [vmem:[%s2328_s22 + $0x600] sm:$0xff] }
  0x31   : > { %192 = vst [vmem:[%s2333_s23 + $0x108] sm:$0xff] %v191_v33  ;;  %v319_v33 = vld [vmem:[%s2328_s22 + $0x608] sm:$0xff] }
  0x32   : > { %194 = vst [vmem:[%s2333_s23 + $0x110] sm:$0xff] %v193_v34  ;;  %v321_v34 = vld [vmem:[%s2328_s22 + $0x610] sm:$0xff] }
  0x33   : > { %196 = vst [vmem:[%s2333_s23 + $0x118] sm:$0xff] %v195_v35  ;;  %v323_v35 = vld [vmem:[%s2328_s22 + $0x618] sm:$0xff] }
  0x34   : > { %198 = vst [vmem:[%s2333_s23 + $0x120] sm:$0xff] %v197_v36  ;;  %v325_v36 = vld [vmem:[%s2328_s22 + $0x620] sm:$0xff] }
  0x35   : > { %200 = vst [vmem:[%s2333_s23 + $0x128] sm:$0xff] %v199_v37  ;;  %v327_v37 = vld [vmem:[%s2328_s22 + $0x628] sm:$0xff] }
  0x36   : > { %202 = vst [vmem:[%s2333_s23 + $0x130] sm:$0xff] %v201_v38  ;;  %v329_v38 = vld [vmem:[%s2328_s22 + $0x630] sm:$0xff] }
  0x37   : > { %204 = vst [vmem:[%s2333_s23 + $0x138] sm:$0xff] %v203_v39  ;;  %v331_v39 = vld [vmem:[%s2328_s22 + $0x638] sm:$0xff] }
  0x38   : > { %206 = vst [vmem:[%s2333_s23 + $0x140] sm:$0xff] %v205_v40  ;;  %v333_v40 = vld [vmem:[%s2328_s22 + $0x640] sm:$0xff] }
  0x39   : > { %208 = vst [vmem:[%s2333_s23 + $0x148] sm:$0xff] %v207_v41  ;;  %v335_v41 = vld [vmem:[%s2328_s22 + $0x648] sm:$0xff] }
  0x3a   : > { %210 = vst [vmem:[%s2333_s23 + $0x150] sm:$0xff] %v209_v42  ;;  %v337_v42 = vld [vmem:[%s2328_s22 + $0x650] sm:$0xff] }
  0x3b   : > { %212 = vst [vmem:[%s2333_s23 + $0x158] sm:$0xff] %v211_v43  ;;  %v339_v43 = vld [vmem:[%s2328_s22 + $0x658] sm:$0xff] }
  0x3c   : > { %214 = vst [vmem:[%s2333_s23 + $0x160] sm:$0xff] %v213_v44  ;;  %v341_v44 = vld [vmem:[%s2328_s22 + $0x660] sm:$0xff] }
  0x3d   : > { %216 = vst [vmem:[%s2333_s23 + $0x168] sm:$0xff] %v215_v45  ;;  %v343_v45 = vld [vmem:[%s2328_s22 + $0x668] sm:$0xff] }
  0x3e   : > { %218 = vst [vmem:[%s2333_s23 + $0x170] sm:$0xff] %v217_v46  ;;  %v345_v46 = vld [vmem:[%s2328_s22 + $0x670] sm:$0xff] }
  0x3f   : > { %220 = vst [vmem:[%s2333_s23 + $0x178] sm:$0xff] %v219_v47  ;;  %v347_v47 = vld [vmem:[%s2328_s22 + $0x678] sm:$0xff] }
  0x40   : > { %222 = vst [vmem:[%s2333_s23 + $0x180] sm:$0xff] %v221_v48 }
  0x41   : > { %224 = vst [vmem:[%s2333_s23 + $0x188] sm:$0xff] %v223_v49 }
  0x42   : > { %226 = vst [vmem:[%s2333_s23 + $0x190] sm:$0xff] %v225_v50 }
  0x43   : > { %228 = vst [vmem:[%s2333_s23 + $0x198] sm:$0xff] %v227_v51 }
  0x44   : > { %230 = vst [vmem:[%s2333_s23 + $0x1a0] sm:$0xff] %v229_v52 }
  0x45   : > { %232 = vst [vmem:[%s2333_s23 + $0x1a8] sm:$0xff] %v231_v53 }
  0x46   : > { %234 = vst [vmem:[%s2333_s23 + $0x1b0] sm:$0xff] %v233_v54 }
  0x47   : > { %236 = vst [vmem:[%s2333_s23 + $0x1b8] sm:$0xff] %v235_v55 }
  0x48   : > { %238 = vst [vmem:[%s2333_s23 + $0x1c0] sm:$0xff] %v237_v56 }
  0x49   : > { %240 = vst [vmem:[%s2333_s23 + $0x1c8] sm:$0xff] %v239_v57 }
  0x4a   : > { %242 = vst [vmem:[%s2333_s23 + $0x1d0] sm:$0xff] %v241_v58 }
  0x4b   : > { %244 = vst [vmem:[%s2333_s23 + $0x1d8] sm:$0xff] %v243_v59 }
  0x4c   : > { %246 = vst [vmem:[%s2333_s23 + $0x1e0] sm:$0xff] %v245_v60 }
  0x4d   : > { %248 = vst [vmem:[%s2333_s23 + $0x1e8] sm:$0xff] %v247_v61 }
  0x4e   : > { %250 = vst [vmem:[%s2333_s23 + $0x1f0] sm:$0xff] %v249_v62 }
  0x4f   : > { %252 = vst [vmem:[%s2333_s23 + $0x1f8] sm:$0xff] %v251_v63 }
  0x50   : > { %254 = vst [vmem:[%s2333_s23 + $0x200] sm:$0xff] %v253_v0 }
  0x51   : > { %256 = vst [vmem:[%s2333_s23 + $0x208] sm:$0xff] %v255_v1 }
  0x52   : > { %258 = vst [vmem:[%s2333_s23 + $0x210] sm:$0xff] %v257_v2 }
  0x53   : > { %260 = vst [vmem:[%s2333_s23 + $0x218] sm:$0xff] %v259_v3 }
  0x54   : > { %262 = vst [vmem:[%s2333_s23 + $0x220] sm:$0xff] %v261_v4 }
  0x55   : > { %264 = vst [vmem:[%s2333_s23 + $0x228] sm:$0xff] %v263_v5 }
  0x56   : > { %266 = vst [vmem:[%s2333_s23 + $0x230] sm:$0xff] %v265_v6 }
  0x57   : > { %268 = vst [vmem:[%s2333_s23 + $0x238] sm:$0xff] %v267_v7 }
  0x58   : > { %270 = vst [vmem:[%s2333_s23 + $0x240] sm:$0xff] %v269_v8 }
  0x59   : > { %272 = vst [vmem:[%s2333_s23 + $0x248] sm:$0xff] %v271_v9 }
  0x5a   : > { %274 = vst [vmem:[%s2333_s23 + $0x250] sm:$0xff] %v273_v10 }
  0x5b   : > { %276 = vst [vmem:[%s2333_s23 + $0x258] sm:$0xff] %v275_v11 }
  0x5c   : > { %278 = vst [vmem:[%s2333_s23 + $0x260] sm:$0xff] %v277_v12 }
  0x5d   : > { %280 = vst [vmem:[%s2333_s23 + $0x268] sm:$0xff] %v279_v13 }
  0x5e   : > { %282 = vst [vmem:[%s2333_s23 + $0x270] sm:$0xff] %v281_v14 }
  0x5f   : > { %284 = vst [vmem:[%s2333_s23 + $0x278] sm:$0xff] %v283_v15 }
  0x60   : > { %286 = vst [vmem:[%s2333_s23 + $0x280] sm:$0xff] %v285_v16 }
  0x61   : > { %288 = vst [vmem:[%s2333_s23 + $0x288] sm:$0xff] %v287_v17 }
  0x62   : > { %290 = vst [vmem:[%s2333_s23 + $0x290] sm:$0xff] %v289_v18 }
  0x63   : > { %292 = vst [vmem:[%s2333_s23 + $0x298] sm:$0xff] %v291_v19 }
  0x64   : > { %294 = vst [vmem:[%s2333_s23 + $0x2a0] sm:$0xff] %v293_v20 }
  0x65   : > { %296 = vst [vmem:[%s2333_s23 + $0x2a8] sm:$0xff] %v295_v21 }
  0x66   : > { %298 = vst [vmem:[%s2333_s23 + $0x2b0] sm:$0xff] %v297_v22 }
  0x67   : > { %300 = vst [vmem:[%s2333_s23 + $0x2b8] sm:$0xff] %v299_v23 }
  0x68   : > { %302 = vst [vmem:[%s2333_s23 + $0x2c0] sm:$0xff] %v301_v24 }
  0x69   : > { %304 = vst [vmem:[%s2333_s23 + $0x2c8] sm:$0xff] %v303_v25 }
  0x6a   : > { %306 = vst [vmem:[%s2333_s23 + $0x2d0] sm:$0xff] %v305_v26 }
  0x6b   : > { %308 = vst [vmem:[%s2333_s23 + $0x2d8] sm:$0xff] %v307_v27 }
  0x6c   : > { %310 = vst [vmem:[%s2333_s23 + $0x2e0] sm:$0xff] %v309_v28 }
  0x6d   : > { %312 = vst [vmem:[%s2333_s23 + $0x2e8] sm:$0xff] %v311_v29 }
  0x6e   : > { %314 = vst [vmem:[%s2333_s23 + $0x2f0] sm:$0xff] %v313_v30 }
  0x6f   : > { %316 = vst [vmem:[%s2333_s23 + $0x2f8] sm:$0xff] %v315_v31 }
  0x70   : > { %318 = vst [vmem:[%s2333_s23 + $0x300] sm:$0xff] %v317_v32 }
  0x71   : > { %320 = vst [vmem:[%s2333_s23 + $0x308] sm:$0xff] %v319_v33 }
  0x72   : > { %322 = vst [vmem:[%s2333_s23 + $0x310] sm:$0xff] %v321_v34 }
  0x73   : > { %324 = vst [vmem:[%s2333_s23 + $0x318] sm:$0xff] %v323_v35 }
  0x74   : > { %326 = vst [vmem:[%s2333_s23 + $0x320] sm:$0xff] %v325_v36 }
  0x75   : > { %328 = vst [vmem:[%s2333_s23 + $0x328] sm:$0xff] %v327_v37 }
  0x76   : > { %330 = vst [vmem:[%s2333_s23 + $0x330] sm:$0xff] %v329_v38 }
  0x77   : > { %332 = vst [vmem:[%s2333_s23 + $0x338] sm:$0xff] %v331_v39 }
  0x78   : > { %334 = vst [vmem:[%s2333_s23 + $0x340] sm:$0xff] %v333_v40 }
  0x79   : > { %336 = vst [vmem:[%s2333_s23 + $0x348] sm:$0xff] %v335_v41 }
  0x7a   : > { %338 = vst [vmem:[%s2333_s23 + $0x350] sm:$0xff] %v337_v42 }
  0x7b   : > { %340 = vst [vmem:[%s2333_s23 + $0x358] sm:$0xff] %v339_v43 }
  0x7c   : > { %342 = vst [vmem:[%s2333_s23 + $0x360] sm:$0xff] %v341_v44 }
  0x7d   : > { %344 = vst [vmem:[%s2333_s23 + $0x368] sm:$0xff] %v343_v45 }
  0x7e   : > { %346 = vst [vmem:[%s2333_s23 + $0x370] sm:$0xff] %v345_v46 }
  0x7f   : > { %348 = vst [vmem:[%s2333_s23 + $0x378] sm:$0xff] %v347_v47 }
  0x80 PF: > { %p1711_p5 = scmp.ge.s32.totalorder %s2277_s11, 1  ;;  %p353_p6 = scmp.lt.s32.totalorder %s2277_s11, 3 }
  0x82   : > { %p354_p7 = pnand %p1711_p5, %p353_p6 }
  0x83   : > { %s360_s24 = sand.u32 (!%p354_p7), 1, %s2269_s9   ;;  %s1712_s29 = sshll.u32 (!%p354_p7), %s1705_s12, 5 }
  0x84   : > { %357 = sbr.rel (%p354_p7) target bundleno = 411 (0x19b), region = 47  ;;  %p383_p8 = scmp.lt.s32.totalorder (!%p354_p7), %s1712_s29, 63 }
  0x85   : > { %s2230_s25 = smul.u32 (!%p354_p7), 896, %s360_s24 }
  0x87   : > { %s2559_s26 = scalar_lea.vmem (!%p354_p7), [#allocation2], %s2230_s25 }
  0x89   : > { %v486_v48 = vld [vmem:[%s2559_s26 + $0x300] sm:$0x77]  ;;  %v487_v49 = vld [vmem:[%s2559_s26 + $0x308] sm:$0x77]  ;;  %vm1066_vm0 = vcmask 1042432   ;;  %vm1062_vm1 = vcmask 441344  }
  0x8a   : > { %v806_v50 = vunpack.c.l.b16 %v486_v48  ;;  %v807_v51 = vunpack.c.h.b16 %v486_v48  ;;  %v808_v52 = vunpack.c.l.b16 %v487_v49  ;;  %v809_v53 = vunpack.c.h.b16 %v487_v49  ;;  %v1972_v54 = vld [vmem:[%s2559_s26 + $0x200] sm:$0xf]  ;;  %v2197_v60 = vld [vmem:[%s2559_s26 + $0x204] sm:$0xf]  ;;  %v1980_v62 = vld [vmem:[%s2559_s26 + $0x208] sm:$0xf] }
  0x8b   : > { %v2213_v55 = vld [vmem:[%s2559_s26 + $0x27c] sm:$0xf0]  ;;  %v1974_v61 = vld [vmem:[%s2559_s26 + $0x280] sm:$0xf0]  ;;  %v2214_v63 = vld [vmem:[%s2559_s26 + $0x284] sm:$0xf0] }
  0x8c   : > { %v934_v56 = vpack.c.b16 %v806_v50, %v806_v50  ;;  %v935_v57 = vpack.c.b16 %v807_v51, %v807_v51  ;;  %v936_v58 = vpack.c.b16 %v808_v52, %v808_v52  ;;  %v937_v59 = vpack.c.b16 %v809_v53, %v809_v53  ;;  %v2198_v0 = vld [vmem:[%s2559_s26 + $0x20c] sm:$0xf]  ;;  %v1844_v8 = vld [vmem:[%s2559_s26 + $0x100] sm:$0xf]  ;;  %v2165_v12 = vld [vmem:[%s2559_s26 + $0x104] sm:$0xf] }
  0x8d   : > { %v1982_v1 = vld [vmem:[%s2559_s26 + $0x288] sm:$0xf0]  ;;  %v1973_v6 = vor.u32 %v2213_v55, %v1972_v54  ;;  %v1977_v7 = vor.u32 %v2197_v60, %v1974_v61  ;;  %v2181_v9 = vld [vmem:[%s2559_s26 + $0x17c] sm:$0xf0]  ;;  %v1981_v10 = vor.u32 %v2214_v63, %v1980_v62  ;;  %v1846_v13 = vld [vmem:[%s2559_s26 + $0x180] sm:$0xf0] }
  0x8e   : > { %v1068_v2 = vsel %vm1066_vm0, %v934_v56, 0  ;;  %v1071_v3 = vsel %vm1066_vm0, %v935_v57, 0  ;;  %v1074_v4 = vsel %vm1066_vm0, %v936_v58, 0  ;;  %v1077_v5 = vsel %vm1066_vm0, %v937_v59, 0  ;;  %v1852_v14 = vld [vmem:[%s2559_s26 + $0x108] sm:$0xf] }
  0x8f   : > { %1167 = vmatpush.bf16.msra.mxu0 %v1068_v2  ;;  %1180 = vmatpush.bf16.msra.mxu1 %v1071_v3  ;;  %v1985_v11 = vor.u32 %v2198_v0, %v1982_v1  ;;  %v2182_v15 = vld [vmem:[%s2559_s26 + $0x184] sm:$0xf0]  ;;  %v2166_v16 = vld [vmem:[%s2559_s26 + $0x10c] sm:$0xf]  ;;  %v489_v18 = vld [vmem:[%s2559_s26 + $0x318] sm:$0x77]  ;;  %v1845_v20 = vor.u32 %v2181_v9, %v1844_v8  ;;  %v1849_v21 = vor.u32 %v2165_v12, %v1846_v13 }
  0x90   : > { %1193 = vmatpush.bf16.msra.mxu2 %v1074_v4  ;;  %1206 = vmatpush.bf16.msra.mxu3 %v1077_v5  ;;  %v1854_v17 = vld [vmem:[%s2559_s26 + $0x188] sm:$0xf0]  ;;  %v488_v19 = vld [vmem:[%s2559_s26 + $0x310] sm:$0x77]  ;;  %v1716_v22 = vld [vmem:[%s2559_s26] sm:$0xf]  ;;  %v812_v24 = vunpack.c.l.b16 %v489_v18  ;;  %v813_v25 = vunpack.c.h.b16 %v489_v18  ;;  %v1853_v26 = vor.u32 %v2182_v15, %v1852_v14 }
  0x91   : > { %v2149_v23 = vld [vmem:[%s2559_s26 + $0x7c] sm:$0xf0]  ;;  %v1857_v27 = vor.u32 %v2166_v16, %v1854_v17  ;;  %v2133_v28 = vld [vmem:[%s2559_s26 + $0x4] sm:$0xf]  ;;  %v1724_v30 = vld [vmem:[%s2559_s26 + $0x8] sm:$0xf]  ;;  %v810_v34 = vunpack.c.l.b16 %v488_v19  ;;  %v811_v35 = vunpack.c.h.b16 %v488_v19 }
  0x92   : > { %v1718_v29 = vld [vmem:[%s2559_s26 + $0x80] sm:$0xf0]  ;;  %v2150_v31 = vld [vmem:[%s2559_s26 + $0x84] sm:$0xf0]  ;;  %v2134_v32 = vld [vmem:[%s2559_s26 + $0xc] sm:$0xf]  ;;  %v940_v36 = vpack.c.b16 %v812_v24, %v812_v24  ;;  %v941_v37 = vpack.c.b16 %v813_v25, %v813_v25  ;;  %v1717_v38 = vor.u32 %v2149_v23, %v1716_v22 }
  0x93   : > { %1168 = vmatpush.bf16.msra.mxu0 %v1973_v6  ;;  %1181 = vmatpush.bf16.msra.mxu1 %v1977_v7  ;;  %v1726_v33 = vld [vmem:[%s2559_s26 + $0x88] sm:$0xf0]  ;;  %v1721_v39 = vor.u32 %v2133_v28, %v1718_v29  ;;  %v1725_v40 = vor.u32 %v2150_v31, %v1724_v30  ;;  %v938_v42 = vpack.c.b16 %v810_v34, %v810_v34  ;;  %v1996_v44 = vld [vmem:[%s2559_s26 + $0x218] sm:$0xf]  ;;  %v2200_v48 = vld [vmem:[%s2559_s26 + $0x21c] sm:$0xf] }
  0x94   : > { %1194 = vmatpush.bf16.msra.mxu2 %v1981_v10  ;;  %1207 = vmatpush.bf16.msra.mxu3 %v1985_v11  ;;  %v1729_v41 = vor.u32 %v2134_v32, %v1726_v33  ;;  %v939_v43 = vpack.c.b16 %v811_v35, %v811_v35  ;;  %v2216_v45 = vld [vmem:[%s2559_s26 + $0x294] sm:$0xf0]  ;;  %v1086_v46 = vsel %vm1066_vm0, %v940_v36, 0  ;;  %v1089_v47 = vsel %vm1066_vm0, %v941_v37, 0  ;;  %v1998_v49 = vld [vmem:[%s2559_s26 + $0x298] sm:$0xf0] }
  0x95   : > { %v2602_v50 = vld [vmem:[%s2919_s0] sm:$0xf]  ;;  %v1988_v51 = vld [vmem:[%s2559_s26 + $0x210] sm:$0xf]  ;;  %v2199_v53 = vld [vmem:[%s2559_s26 + $0x214] sm:$0xf]  ;;  %v1997_v57 = vor.u32 %v2216_v45, %v1996_v44  ;;  %v2001_v58 = vor.u32 %v2200_v48, %v1998_v49 }
  0x96   : > { %v2215_v52 = vld [vmem:[%s2559_s26 + $0x28c] sm:$0xf0]  ;;  %v491_v54 = vld [vmem:[%s2559_s26 + $0x328] sm:$0x77]  ;;  %v1080_v55 = vsel %vm1066_vm0, %v938_v42, 0  ;;  %v1083_v56 = vsel %vm1066_vm0, %v939_v43, 0 }
  0x97   : > { %1169 = vmatpush.bf16.msra.mxu0 %v1845_v20  ;;  %1182 = vmatpush.bf16.msra.mxu1 %v1849_v21  ;;  %v1990_v59 = vld [vmem:[%s2559_s26 + $0x290] sm:$0xf0]  ;;  %v1868_v60 = vld [vmem:[%s2559_s26 + $0x118] sm:$0xf]  ;;  %v2168_v62 = vld [vmem:[%s2559_s26 + $0x11c] sm:$0xf]  ;;  %v816_v0 = vunpack.c.l.b16 %v491_v54  ;;  %v817_v1 = vunpack.c.h.b16 %v491_v54  ;;  %v1989_v3 = vor.u32 %v2215_v52, %v1988_v51 }
  0x98   : > { %1195 = vmatpush.bf16.msra.mxu2 %v1853_v26  ;;  %1208 = vmatpush.bf16.msra.mxu3 %v1857_v27  ;;  %v2184_v61 = vld [vmem:[%s2559_s26 + $0x194] sm:$0xf0]  ;;  %v1870_v63 = vld [vmem:[%s2559_s26 + $0x198] sm:$0xf0]  ;;  %v490_v2 = vld [vmem:[%s2559_s26 + $0x320] sm:$0x77]  ;;  %v1993_v4 = vor.u32 %v2199_v53, %v1990_v59 }
  0x99   : > { %v1860_v5 = vld [vmem:[%s2559_s26 + $0x110] sm:$0xf]  ;;  %v1869_v7 = vor.u32 %v2184_v61, %v1868_v60  ;;  %v1873_v8 = vor.u32 %v2168_v62, %v1870_v63  ;;  %v2167_v9 = vld [vmem:[%s2559_s26 + $0x114] sm:$0xf]  ;;  %v1740_v11 = vld [vmem:[%s2559_s26 + $0x18] sm:$0xf]  ;;  %v814_v15 = vunpack.c.l.b16 %v490_v2  ;;  %v815_v16 = vunpack.c.h.b16 %v490_v2 }
  0x9a   : > { %v2183_v6 = vld [vmem:[%s2559_s26 + $0x18c] sm:$0xf0]  ;;  %v1862_v10 = vld [vmem:[%s2559_s26 + $0x190] sm:$0xf0]  ;;  %v2152_v12 = vld [vmem:[%s2559_s26 + $0x94] sm:$0xf0]  ;;  %v944_v17 = vpack.c.b16 %v816_v0, %v816_v0  ;;  %v945_v18 = vpack.c.b16 %v817_v1, %v817_v1 }
  0x9b   : > { %1170 = vmatpush.bf16.msra.mxu0 %v1717_v38  ;;  %1183 = vmatpush.bf16.msra.mxu1 %v1721_v39  ;;  %v2136_v13 = vld [vmem:[%s2559_s26 + $0x1c] sm:$0xf]  ;;  %v1861_v19 = vor.u32 %v2183_v6, %v1860_v5  ;;  %v1865_v20 = vor.u32 %v2167_v9, %v1862_v10  ;;  %v1732_v21 = vld [vmem:[%s2559_s26 + $0x10] sm:$0xf]  ;;  %v1741_v22 = vor.u32 %v2152_v12, %v1740_v11  ;;  %v2135_v25 = vld [vmem:[%s2559_s26 + $0x14] sm:$0xf] }
  0x9c   : > { %1196 = vmatpush.bf16.msra.mxu2 %v1725_v40  ;;  %1209 = vmatpush.bf16.msra.mxu3 %v1729_v41  ;;  %v1742_v14 = vld [vmem:[%s2559_s26 + $0x98] sm:$0xf0]  ;;  %v2151_v24 = vld [vmem:[%s2559_s26 + $0x8c] sm:$0xf0]  ;;  %v1734_v26 = vld [vmem:[%s2559_s26 + $0x90] sm:$0xf0]  ;;  %v942_v27 = vpack.c.b16 %v814_v15, %v814_v15  ;;  %v943_v28 = vpack.c.b16 %v815_v16, %v815_v16 }
  0x9d   : > { %v1745_v23 = vor.u32 %v2136_v13, %v1742_v14  ;;  %v2012_v29 = vld [vmem:[%s2559_s26 + $0x228] sm:$0xf]  ;;  %v1098_v31 = vsel %vm1066_vm0, %v944_v17, 0  ;;  %v1101_v32 = vsel %vm1066_vm0, %v945_v18, 0  ;;  %v2202_v33 = vld [vmem:[%s2559_s26 + $0x22c] sm:$0xf]  ;;  %v1733_v35 = vor.u32 %v2151_v24, %v1732_v21 }
  0x9e   : > { %2098 = vmatmul.msk.bf16.vlgmr.msra.gmra.mxu0 %vm1062_vm1, %v2602_v50  ;;  %2099 = vmatmul.msk.bf16.vlgmr.msra.gmra.mxu1 %vm1062_vm1, %v2602_v50  ;;  %v2218_v30 = vld [vmem:[%s2559_s26 + $0x2a4] sm:$0xf0]  ;;  %v2014_v34 = vld [vmem:[%s2559_s26 + $0x2a8] sm:$0xf0]  ;;  %v1737_v36 = vor.u32 %v2135_v25, %v1734_v26  ;;  %v2004_v37 = vld [vmem:[%s2559_s26 + $0x220] sm:$0xf] }
  0x9f   : > { %2100 = vmatmul.msk.bf16.vlgmr.msra.gmra.mxu2 %vm1062_vm1, %v2602_v50  ;;  %2101 = vmatmul.msk.bf16.vlgmr.msra.gmra.mxu3 %vm1062_vm1, %v2602_v50  ;;  %v2217_v38 = vld [vmem:[%s2559_s26 + $0x29c] sm:$0xf0]  ;;  %v2201_v39 = vld [vmem:[%s2559_s26 + $0x224] sm:$0xf]  ;;  %v493_v40 = vld [vmem:[%s2559_s26 + $0x338] sm:$0x77]  ;;  %v2013_v43 = vor.u32 %v2218_v30, %v2012_v29  ;;  %v2017_v44 = vor.u32 %v2202_v33, %v2014_v34 }
  0xa0   : > { %1245 = vmatpush.bf16.msrb.mxu2 %v1086_v46  ;;  %1258 = vmatpush.bf16.msrb.mxu3 %v1089_v47  ;;  %v1092_v41 = vsel %vm1066_vm0, %v942_v27, 0  ;;  %v1095_v42 = vsel %vm1066_vm0, %v943_v28, 0  ;;  %v2006_v45 = vld [vmem:[%s2559_s26 + $0x2a0] sm:$0xf0]  ;;  %v1884_v46 = vld [vmem:[%s2559_s26 + $0x128] sm:$0xf]  ;;  %v820_v51 = vunpack.c.l.b16 %v493_v40  ;;  %v821_v52 = vunpack.c.h.b16 %v493_v40 }
  0xa1   : > { %1219 = vmatpush.bf16.msrb.mxu0 %v1080_v55  ;;  %1232 = vmatpush.bf16.msrb.mxu1 %v1083_v56  ;;  %v2186_v47 = vld [vmem:[%s2559_s26 + $0x1a4] sm:$0xf0]  ;;  %v2170_v48 = vld [vmem:[%s2559_s26 + $0x12c] sm:$0xf]  ;;  %v492_v53 = vld [vmem:[%s2559_s26 + $0x330] sm:$0x77]  ;;  %v2005_v54 = vor.u32 %v2217_v38, %v2004_v37  ;;  %v2009_v55 = vor.u32 %v2201_v39, %v2006_v45 }
  0xa2   : > { %v1886_v49 = vld [vmem:[%s2559_s26 + $0x1a8] sm:$0xf0]  ;;  %v1876_v56 = vld [vmem:[%s2559_s26 + $0x120] sm:$0xf]  ;;  %v2169_v60 = vld [vmem:[%s2559_s26 + $0x124] sm:$0xf]  ;;  %v818_v2 = vunpack.c.l.b16 %v492_v53  ;;  %v949_v5 = vpack.c.b16 %v821_v52, %v821_v52 }
  0xa3   : > { %v1889_v59 = vor.u32 %v2170_v48, %v1886_v49  ;;  %v1878_v61 = vld [vmem:[%s2559_s26 + $0x1a0] sm:$0xf0]  ;;  %v1756_v62 = vld [vmem:[%s2559_s26 + $0x28] sm:$0xf]  ;;  %v2138_v0 = vld [vmem:[%s2559_s26 + $0x2c] sm:$0xf] }
  0xa4   : > { %1246 = vmatpush.bf16.msrb.mxu2 %v1997_v57  ;;  %1259 = vmatpush.bf16.msrb.mxu3 %v2001_v58  ;;  %v2185_v57 = vld [vmem:[%s2559_s26 + $0x19c] sm:$0xf0]  ;;  %v1885_v58 = vor.u32 %v2186_v47, %v1884_v46  ;;  %v2154_v63 = vld [vmem:[%s2559_s26 + $0xa4] sm:$0xf0]  ;;  %v1758_v1 = vld [vmem:[%s2559_s26 + $0xa8] sm:$0xf0]  ;;  %v946_v14 = vpack.c.b16 %v818_v2, %v818_v2 }
  0xa5   : > { %1220 = vmatpush.bf16.msrb.mxu0 %v1989_v3  ;;  %1233 = vmatpush.bf16.msrb.mxu1 %v1993_v4  ;;  %v819_v3 = vunpack.c.h.b16 %v492_v53  ;;  %v948_v4 = vpack.c.b16 %v820_v51, %v820_v51  ;;  %v1877_v6 = vor.u32 %v2185_v57, %v1876_v56  ;;  %v1757_v9 = vor.u32 %v2154_v63, %v1756_v62  ;;  %v2153_v11 = vld [vmem:[%s2559_s26 + $0x9c] sm:$0xf0]  ;;  %v2137_v12 = vld [vmem:[%s2559_s26 + $0x24] sm:$0xf]  ;;  %v2028_v16 = vld [vmem:[%s2559_s26 + $0x238] sm:$0xf] }
  0xa6   : > { %v1761_v10 = vor.u32 %v2138_v0, %v1758_v1  ;;  %v1750_v13 = vld [vmem:[%s2559_s26 + $0xa0] sm:$0xf0]  ;;  %v2220_v17 = vld [vmem:[%s2559_s26 + $0x2b4] sm:$0xf0]  ;;  %v2030_v21 = vld [vmem:[%s2559_s26 + $0x2b8] sm:$0xf0] }
  0xa7   : > { %v947_v15 = vpack.c.b16 %v819_v3, %v819_v3  ;;  %v1110_v18 = vsel %vm1066_vm0, %v948_v4, 0  ;;  %v2020_v24 = vld [vmem:[%s2559_s26 + $0x230] sm:$0xf]  ;;  %v1104_v26 = vsel %vm1066_vm0, %v946_v14, 0  ;;  %v2029_v28 = vor.u32 %v2220_v17, %v2028_v16  ;;  %v2203_v30 = vld [vmem:[%s2559_s26 + $0x234] sm:$0xf] }
  0xa8   : > { %1247 = vmatpush.bf16.msrb.mxu2 %v1869_v7  ;;  %1260 = vmatpush.bf16.msrb.mxu3 %v1873_v8  ;;  %v1881_v7 = vor.u32 %v2169_v60, %v1878_v61  ;;  %v1748_v8 = vld [vmem:[%s2559_s26 + $0x20] sm:$0xf]  ;;  %v2219_v25 = vld [vmem:[%s2559_s26 + $0x2ac] sm:$0xf0]  ;;  %v2188_v33 = vld [vmem:[%s2559_s26 + $0x1b4] sm:$0xf0] }
  0xa9   : > { %1221 = vmatpush.bf16.msrb.mxu0 %v1861_v19  ;;  %1234 = vmatpush.bf16.msrb.mxu1 %v1865_v20  ;;  %v1113_v19 = vsel %vm1066_vm0, %v949_v5, 0  ;;  %v2204_v20 = vld [vmem:[%s2559_s26 + $0x23c] sm:$0xf]  ;;  %v1107_v27 = vsel %vm1066_vm0, %v947_v15, 0  ;;  %v1892_v39 = vld [vmem:[%s2559_s26 + $0x130] sm:$0xf] }
  0xaa   : > { %v2033_v29 = vor.u32 %v2204_v20, %v2030_v21  ;;  %v2172_v34 = vld [vmem:[%s2559_s26 + $0x13c] sm:$0xf]  ;;  %v494_v40 = vld [vmem:[%s2559_s26 + $0x340] sm:$0x77]  ;;  %v1772_v48 = vld [vmem:[%s2559_s26 + $0x38] sm:$0xf] }
  0xab   : > { %v1902_v38 = vld [vmem:[%s2559_s26 + $0x1b8] sm:$0xf0]  ;;  %v2156_v49 = vld [vmem:[%s2559_s26 + $0xb4] sm:$0xf0]  ;;  %v822_v51 = vunpack.c.l.b16 %v494_v40  ;;  %v823_v52 = vunpack.c.h.b16 %v494_v40  ;;  %v1764_v57 = vld [vmem:[%s2559_s26 + $0x30] sm:$0xf] }
  0xac   : > { %1248 = vmatpush.bf16.msrb.mxu2 %v1741_v22  ;;  %1261 = vmatpush.bf16.msrb.mxu3 %v1745_v23  ;;  %v1749_v22 = vor.u32 %v2153_v11, %v1748_v8  ;;  %v1753_v23 = vor.u32 %v2137_v12, %v1750_v13  ;;  %v1905_v47 = vor.u32 %v2172_v34, %v1902_v38  ;;  %v1774_v56 = vld [vmem:[%s2559_s26 + $0xb8] sm:$0xf0]  ;;  %v1766_v60 = vld [vmem:[%s2559_s26 + $0xb0] sm:$0xf0]  ;;  %v2044_v5 = vld [vmem:[%s2559_s26 + $0x248] sm:$0xf] }
  0xad   : > { %1222 = vmatpush.bf16.msrb.mxu0 %v1733_v35  ;;  %1235 = vmatpush.bf16.msrb.mxu1 %v1737_v36  ;;  %v495_v35 = vld [vmem:[%s2559_s26 + $0x348] sm:$0x77]  ;;  %v2021_v36 = vor.u32 %v2219_v25, %v2020_v24  ;;  %v1773_v61 = vor.u32 %v2156_v49, %v1772_v48  ;;  %v950_v1 = vpack.c.b16 %v822_v51, %v822_v51  ;;  %v2036_v11 = vld [vmem:[%s2559_s26 + $0x240] sm:$0xf]  ;;  %v2205_v15 = vld [vmem:[%s2559_s26 + $0x244] sm:$0xf] }
  0xae   : > { %v825_v45 = vunpack.c.h.b16 %v495_v35  ;;  %v951_v2 = vpack.c.b16 %v823_v52, %v823_v52  ;;  %v2046_v8 = vld [vmem:[%s2559_s26 + $0x2c8] sm:$0xf0]  ;;  %v2221_v12 = vld [vmem:[%s2559_s26 + $0x2bc] sm:$0xf0]  ;;  %v2038_v16 = vld [vmem:[%s2559_s26 + $0x2c0] sm:$0xf0] }
  0xaf   : > { %2104 = vmatmul.msk.bf16.vlgmr.msrb.gmra.mxu2 %vm1062_vm1, %v2602_v50  ;;  %2105 = vmatmul.msk.bf16.vlgmr.msrb.gmra.mxu3 %vm1062_vm1, %v2602_v50  ;;  %v1116_v13 = vsel %vm1066_vm0, %v950_v1, 0  ;;  %v2037_v20 = vor.u32 %v2221_v12, %v2036_v11  ;;  %v2041_v21 = vor.u32 %v2205_v15, %v2038_v16  ;;  %v2190_v24 = vld [vmem:[%s2559_s26 + $0x1c4] sm:$0xf0]  ;;  %v2174_v25 = vld [vmem:[%s2559_s26 + $0x14c] sm:$0xf]  ;;  %s2926_s29 = smov (!%p383_p8, %s1712_s29), 63 }
  0xb0   : > { %1297 = vmatpush.bf16.msra.mxu2 %v1098_v31  ;;  %1310 = vmatpush.bf16.msra.mxu3 %v1101_v32  ;;  %v2022_v31 = vld [vmem:[%s2559_s26 + $0x2b0] sm:$0xf0]  ;;  %v1900_v32 = vld [vmem:[%s2559_s26 + $0x138] sm:$0xf]  ;;  %v953_v63 = vpack.c.b16 %v825_v45, %v825_v45  ;;  %v1119_v14 = vsel %vm1066_vm0, %v951_v2, 0  ;;  %s1713_s30 = sshll.u32 %s2926_s29, 3 }
  0xb1   : > { %1271 = vmatpush.bf16.msra.mxu0 %v1092_v41  ;;  %1284 = vmatpush.bf16.msra.mxu1 %v1095_v42  ;;  %v2025_v37 = vor.u32 %v2203_v30, %v2022_v31  ;;  %v2187_v41 = vld [vmem:[%s2559_s26 + $0x1ac] sm:$0xf0]  ;;  %v2171_v42 = vld [vmem:[%s2559_s26 + $0x134] sm:$0xf]  ;;  %v1901_v46 = vor.u32 %v2188_v33, %v1900_v32  ;;  %v2189_v30 = vld [vmem:[%s2559_s26 + $0x1bc] sm:$0xf0]  ;;  %s2875_s5 = scalar_lea.vmem %s2921_s2, %s1713_s30 }
  0xb2   : > { %2102 = vmatmul.msk.bf16.vlgmr.msrb.gmra.mxu0 %vm1062_vm1, %v2602_v50  ;;  %2103 = vmatmul.msk.bf16.vlgmr.msrb.gmra.mxu1 %vm1062_vm1, %v2602_v50  ;;  %v1893_v53 = vor.u32 %v2187_v41, %v1892_v39  ;;  %v2173_v31 = vld [vmem:[%s2559_s26 + $0x144] sm:$0xf]  ;;  %v2158_v38 = vld [vmem:[%s2559_s26 + $0xc4] sm:$0xf0]  ;;  %v2142_v41 = vld [vmem:[%s2559_s26 + $0x4c] sm:$0xf] }
  0xb3   : > { %v1910_v32 = vld [vmem:[%s2559_s26 + $0x1c0] sm:$0xf0]  ;;  %v2223_v1 = vld [vmem:[%s2559_s26 + $0x2cc] sm:$0xf0]  ;;  %v2207_v2 = vld [vmem:[%s2559_s26 + $0x254] sm:$0xf] }
  0xb4   : > { %1298 = vmatpush.bf16.msra.mxu2 %v2013_v43  ;;  %1311 = vmatpush.bf16.msra.mxu3 %v2017_v44  ;;  %v1894_v43 = vld [vmem:[%s2559_s26 + $0x1b0] sm:$0xf0]  ;;  %v824_v44 = vunpack.c.l.b16 %v495_v35  ;;  %v1913_v40 = vor.u32 %v2173_v31, %v1910_v32  ;;  %v1782_v48 = vld [vmem:[%s2559_s26 + $0xc0] sm:$0xf0]  ;;  %v2192_v11 = vld [vmem:[%s2559_s26 + $0x1d4] sm:$0xf0] }
  0xb5   : > { %1272 = vmatpush.bf16.msra.mxu0 %v2005_v54  ;;  %1285 = vmatpush.bf16.msra.mxu1 %v2009_v55  ;;  %v1897_v54 = vor.u32 %v2171_v42, %v1894_v43  ;;  %v2140_v55 = vld [vmem:[%s2559_s26 + $0x3c] sm:$0xf]  ;;  %v1790_v42 = vld [vmem:[%s2559_s26 + $0xc8] sm:$0xf0]  ;;  %v1780_v43 = vld [vmem:[%s2559_s26 + $0x40] sm:$0xf] }
  0xb6   : > { %v952_v62 = vpack.c.b16 %v824_v44, %v824_v44  ;;  %v1777_v0 = vor.u32 %v2140_v55, %v1774_v56  ;;  %v2176_v12 = vld [vmem:[%s2559_s26 + $0x15c] sm:$0xf] }
  0xb8   : > { %1299 = vmatpush.bf16.msra.mxu2 %v1885_v58  ;;  %1312 = vmatpush.bf16.msra.mxu3 %v1889_v59  ;;  %v2155_v58 = vld [vmem:[%s2559_s26 + $0xac] sm:$0xf0]  ;;  %v2139_v59 = vld [vmem:[%s2559_s26 + $0x34] sm:$0xf] }
  0xb9   : > { %1273 = vmatpush.bf16.msra.mxu0 %v1877_v6  ;;  %1286 = vmatpush.bf16.msra.mxu1 %v1881_v7  ;;  %v1765_v3 = vor.u32 %v2155_v58, %v1764_v57  ;;  %v1769_v4 = vor.u32 %v2139_v59, %v1766_v60  ;;  %v2222_v6 = vld [vmem:[%s2559_s26 + $0x2c4] sm:$0xf0]  ;;  %v2206_v7 = vld [vmem:[%s2559_s26 + $0x24c] sm:$0xf]  ;;  %v2060_v60 = vld [vmem:[%s2559_s26 + $0x258] sm:$0xf] }
  0xba   : > { %v2045_v17 = vor.u32 %v2222_v6, %v2044_v5  ;;  %v499_v6 = vld [vmem:[%s2559_s26 + $0x368] sm:$0x77] }
  0xbb   : > { %v832_v15 = vunpack.c.l.b16 %v499_v6  ;;  %v833_v16 = vunpack.c.h.b16 %v499_v6  ;;  %v1942_v6 = vld [vmem:[%s2559_s26 + $0x1e0] sm:$0xf0] }
  0xbc   : > { %1300 = vmatpush.bf16.msra.mxu2 %v1757_v9  ;;  %1313 = vmatpush.bf16.msra.mxu3 %v1761_v10  ;;  %v1122_v9 = vsel %vm1066_vm0, %v952_v62, 0  ;;  %v1125_v10 = vsel %vm1066_vm0, %v953_v63, 0  ;;  %v2208_v62 = vld [vmem:[%s2559_s26 + $0x25c] sm:$0xf] }
  0xbd   : > { %1274 = vmatpush.bf16.msra.mxu0 %v1749_v22  ;;  %1287 = vmatpush.bf16.msra.mxu1 %v1753_v23  ;;  %v496_v22 = vld [vmem:[%s2559_s26 + $0x350] sm:$0x77]  ;;  %v1916_v23 = vld [vmem:[%s2559_s26 + $0x148] sm:$0xf]  ;;  %v2062_v63 = vld [vmem:[%s2559_s26 + $0x2d8] sm:$0xf0]  ;;  %v960_v31 = vpack.c.b16 %v832_v15, %v832_v15  ;;  %v961_v32 = vpack.c.b16 %v833_v16, %v833_v16 }
  0xbe   : > { %v826_v33 = vunpack.c.l.b16 %v496_v22  ;;  %v827_v34 = vunpack.c.h.b16 %v496_v22  ;;  %v1917_v35 = vor.u32 %v2190_v24, %v1916_v23  ;;  %v2065_v5 = vor.u32 %v2208_v62, %v2062_v63  ;;  %v1804_v24 = vld [vmem:[%s2559_s26 + $0x58] sm:$0xf]  ;;  %v2194_v62 = vld [vmem:[%s2559_s26 + $0x1e4] sm:$0xf0]  ;;  %v2178_v63 = vld [vmem:[%s2559_s26 + $0x16c] sm:$0xf] }
  0xbf   : > { %2108 = vmatmul.msk.bf16.vlgmr.msra.gmra.mxu2 %vm1062_vm1, %v2602_v50  ;;  %2109 = vmatmul.msk.bf16.vlgmr.msra.gmra.mxu3 %vm1062_vm1, %v2602_v50  ;;  %v2146_v15 = vld [vmem:[%s2559_s26 + $0x6c] sm:$0xf] }
  0xc0   : > { %1349 = vmatpush.bf16.msrb.mxu2 %v1110_v18  ;;  %1362 = vmatpush.bf16.msrb.mxu3 %v1113_v19  ;;  %v2049_v18 = vor.u32 %v2206_v7, %v2046_v8  ;;  %v497_v19 = vld [vmem:[%s2559_s26 + $0x358] sm:$0x77]  ;;  %v954_v49 = vpack.c.b16 %v826_v33, %v826_v33  ;;  %v955_v51 = vpack.c.b16 %v827_v34, %v827_v34  ;;  %v2159_v33 = vld [vmem:[%s2559_s26 + $0xcc] sm:$0xf0]  ;;  %v2143_v34 = vld [vmem:[%s2559_s26 + $0x54] sm:$0xf] }
  0xc1   : > { %1323 = vmatpush.bf16.msrb.mxu0 %v1104_v26  ;;  %1336 = vmatpush.bf16.msrb.mxu1 %v1107_v27  ;;  %v1918_v26 = vld [vmem:[%s2559_s26 + $0x1c8] sm:$0xf0]  ;;  %v1908_v27 = vld [vmem:[%s2559_s26 + $0x140] sm:$0xf] }
  0xc2   : > { %2106 = vmatmul.msk.bf16.vlgmr.msra.gmra.mxu0 %vm1062_vm1, %v2602_v50  ;;  %2107 = vmatmul.msk.bf16.vlgmr.msra.gmra.mxu1 %vm1062_vm1, %v2602_v50  ;;  %v1909_v39 = vor.u32 %v2189_v30, %v1908_v27  ;;  %v1128_v58 = vsel %vm1066_vm0, %v954_v49, 0  ;;  %v1131_v59 = vsel %vm1066_vm0, %v955_v51, 0  ;;  %v1796_v30 = vld [vmem:[%s2559_s26 + $0x50] sm:$0xf]  ;;  %v2078_v49 = vld [vmem:[%s2559_s26 + $0x2e8] sm:$0xf0] }
  0xc3   : > { %v2068_v51 = vld [vmem:[%s2559_s26 + $0x260] sm:$0xf]  ;;  %v1822_v16 = vld [vmem:[%s2559_s26 + $0xe8] sm:$0xf0] }
  0xc4   : > { %1350 = vmatpush.bf16.msrb.mxu2 %v2029_v28  ;;  %1363 = vmatpush.bf16.msrb.mxu3 %v2033_v29  ;;  %v828_v28 = vunpack.c.l.b16 %v497_v19  ;;  %v829_v29 = vunpack.c.h.b16 %v497_v19  ;;  %v1926_v19 = vld [vmem:[%s2559_s26 + $0x1d0] sm:$0xf0] }
  0xc5   : > { %1324 = vmatpush.bf16.msrb.mxu0 %v2021_v36  ;;  %1337 = vmatpush.bf16.msrb.mxu1 %v2025_v37  ;;  %v1921_v36 = vor.u32 %v2174_v25, %v1918_v26  ;;  %v1788_v37 = vld [vmem:[%s2559_s26 + $0x48] sm:$0xf]  ;;  %v2160_v25 = vld [vmem:[%s2559_s26 + $0xd4] sm:$0xf0] }
  0xc6   : > { %v956_v44 = vpack.c.b16 %v828_v28, %v828_v28  ;;  %v957_v45 = vpack.c.b16 %v829_v29, %v829_v29  ;;  %v1789_v52 = vor.u32 %v2158_v38, %v1788_v37  ;;  %v2144_v28 = vld [vmem:[%s2559_s26 + $0x5c] sm:$0xf]  ;;  %v1805_v38 = vor.u32 %v2160_v25, %v1804_v24 }
  0xc7   : > { %v1806_v29 = vld [vmem:[%s2559_s26 + $0xd8] sm:$0xf0] }
  0xc8   : > { %1351 = vmatpush.bf16.msrb.mxu2 %v1901_v46  ;;  %1364 = vmatpush.bf16.msrb.mxu3 %v1905_v47  ;;  %v2157_v46 = vld [vmem:[%s2559_s26 + $0xbc] sm:$0xf0]  ;;  %v2141_v47 = vld [vmem:[%s2559_s26 + $0x44] sm:$0xf]  ;;  %v1134_v56 = vsel %vm1066_vm0, %v956_v44, 0  ;;  %v1137_v57 = vsel %vm1066_vm0, %v957_v45, 0 }
  0xc9   : > { %1325 = vmatpush.bf16.msrb.mxu0 %v1893_v53  ;;  %1338 = vmatpush.bf16.msrb.mxu1 %v1897_v54  ;;  %v1793_v53 = vor.u32 %v2142_v41, %v1790_v42  ;;  %v1781_v54 = vor.u32 %v2157_v46, %v1780_v43  ;;  %v1785_v55 = vor.u32 %v2141_v47, %v1782_v48  ;;  %v1146_v42 = vsel %vm1066_vm0, %v960_v31, 0  ;;  %v2076_v46 = vld [vmem:[%s2559_s26 + $0x268] sm:$0xf]  ;;  %v2210_v48 = vld [vmem:[%s2559_s26 + $0x26c] sm:$0xf] }
  0xca   : > { %v1149_v43 = vsel %vm1066_vm0, %v961_v32, 0  ;;  %v2226_v47 = vld [vmem:[%s2559_s26 + $0x2e4] sm:$0xf0] }
  0xcc   : > { %1352 = vmatpush.bf16.msrb.mxu2 %v1773_v61  ;;  %1365 = vmatpush.bf16.msrb.mxu3 %v1777_v0  ;;  %v2224_v61 = vld [vmem:[%s2559_s26 + $0x2d4] sm:$0xf0]  ;;  %v2052_v0 = vld [vmem:[%s2559_s26 + $0x250] sm:$0xf] }
  0xcd   : > { %1326 = vmatpush.bf16.msrb.mxu0 %v1765_v3  ;;  %1339 = vmatpush.bf16.msrb.mxu1 %v1769_v4  ;;  %v2054_v3 = vld [vmem:[%s2559_s26 + $0x2d0] sm:$0xf0]  ;;  %v2061_v4 = vor.u32 %v2224_v61, %v2060_v60  ;;  %v2053_v7 = vor.u32 %v2223_v1, %v2052_v0  ;;  %v1948_v61 = vld [vmem:[%s2559_s26 + $0x168] sm:$0xf]  ;;  %v1950_v0 = vld [vmem:[%s2559_s26 + $0x1e8] sm:$0xf0] }
  0xce   : > { %v2057_v8 = vor.u32 %v2207_v2, %v2054_v3  ;;  %v500_v60 = vld [vmem:[%s2559_s26 + $0x370] sm:$0x77]  ;;  %v1940_v1 = vld [vmem:[%s2559_s26 + $0x160] sm:$0xf] }
  0xcf   : > { %2112 = vmatmul.msk.bf16.vlgmr.msrb.gmra.mxu2 %vm1062_vm1, %v2602_v50  ;;  %2113 = vmatmul.msk.bf16.vlgmr.msrb.gmra.mxu3 %vm1062_vm1, %v2602_v50 }
  0xd0   : > { %1401 = vmatpush.bf16.msra.mxu2 %v1122_v9  ;;  %1414 = vmatpush.bf16.msra.mxu3 %v1125_v10  ;;  %v498_v9 = vld [vmem:[%s2559_s26 + $0x360] sm:$0x77]  ;;  %v1932_v10 = vld [vmem:[%s2559_s26 + $0x158] sm:$0xf] }
  0xd1   : > { %1375 = vmatpush.bf16.msra.mxu0 %v1116_v13  ;;  %1388 = vmatpush.bf16.msra.mxu1 %v1119_v14  ;;  %v1934_v13 = vld [vmem:[%s2559_s26 + $0x1d8] sm:$0xf0]  ;;  %v1924_v14 = vld [vmem:[%s2559_s26 + $0x150] sm:$0xf]  ;;  %v1933_v22 = vor.u32 %v2192_v11, %v1932_v10  ;;  %v1953_v10 = vor.u32 %v2178_v63, %v1950_v0  ;;  %v1820_v11 = vld [vmem:[%s2559_s26 + $0x68] sm:$0xf] }
  0xd2   : > { %2110 = vmatmul.msk.bf16.vlgmr.msrb.gmra.mxu0 %vm1062_vm1, %v2602_v50  ;;  %2111 = vmatmul.msk.bf16.vlgmr.msrb.gmra.mxu1 %vm1062_vm1, %v2602_v50  ;;  %v1937_v23 = vor.u32 %v2176_v12, %v1934_v13  ;;  %v2162_v12 = vld [vmem:[%s2559_s26 + $0xe4] sm:$0xf0]  ;;  %v2163_v63 = vld [vmem:[%s2559_s26 + $0xec] sm:$0xf0]  ;;  %v2147_v0 = vld [vmem:[%s2559_s26 + $0x74] sm:$0xf] }
  0xd3   : > { %v1821_v25 = vor.u32 %v2162_v12, %v1820_v11 }
  0xd4   : > { %1402 = vmatpush.bf16.msra.mxu2 %v2045_v17  ;;  %1415 = vmatpush.bf16.msra.mxu3 %v2049_v18  ;;  %v2191_v17 = vld [vmem:[%s2559_s26 + $0x1cc] sm:$0xf0]  ;;  %v2175_v18 = vld [vmem:[%s2559_s26 + $0x154] sm:$0xf] }
  0xd5   : > { %1376 = vmatpush.bf16.msra.mxu0 %v2037_v20  ;;  %1389 = vmatpush.bf16.msra.mxu1 %v2041_v21  ;;  %v830_v20 = vunpack.c.l.b16 %v498_v9  ;;  %v831_v21 = vunpack.c.h.b16 %v498_v9  ;;  %v1925_v26 = vor.u32 %v2191_v17, %v1924_v14  ;;  %v1929_v27 = vor.u32 %v2175_v18, %v1926_v19  ;;  %v1812_v17 = vld [vmem:[%s2559_s26 + $0x60] sm:$0xf] }
  0xd6   : > { %v1949_v9 = vor.u32 %v2194_v62, %v1948_v61  ;;  %v1838_v61 = vld [vmem:[%s2559_s26 + $0xf8] sm:$0xf0]  ;;  %v1828_v62 = vld [vmem:[%s2559_s26 + $0x70] sm:$0xf] }
  0xd7   : > { %v959_v37 = vpack.c.b16 %v831_v21, %v831_v21  ;;  %v2145_v21 = vld [vmem:[%s2559_s26 + $0x64] sm:$0xf] }
  0xd8   : > { %1403 = vmatpush.bf16.msra.mxu2 %v1917_v35  ;;  %1416 = vmatpush.bf16.msra.mxu3 %v1921_v36  ;;  %v1798_v35 = vld [vmem:[%s2559_s26 + $0xd0] sm:$0xf0]  ;;  %v958_v36 = vpack.c.b16 %v830_v20, %v830_v20  ;;  %v2161_v20 = vld [vmem:[%s2559_s26 + $0xdc] sm:$0xf0] }
  0xd9   : > { %1377 = vmatpush.bf16.msra.mxu0 %v1909_v39  ;;  %1390 = vmatpush.bf16.msra.mxu1 %v1913_v40  ;;  %v1809_v39 = vor.u32 %v2144_v28, %v1806_v29  ;;  %v1797_v40 = vor.u32 %v2159_v33, %v1796_v30  ;;  %v1801_v41 = vor.u32 %v2143_v34, %v1798_v35  ;;  %v1143_v45 = vsel %vm1066_vm0, %v959_v37, 0  ;;  %v2092_v33 = vld [vmem:[%s2559_s26 + $0x278] sm:$0xf]  ;;  %v2212_v35 = vld [vmem:[%s2559_s26 + $0x27c] sm:$0xf] }
  0xda   : > { %v1140_v44 = vsel %vm1066_vm0, %v958_v36, 0  ;;  %v2228_v34 = vld [vmem:[%s2559_s26 + $0x2f4] sm:$0xf0]  ;;  %v2094_v36 = vld [vmem:[%s2559_s26 + $0x2f8] sm:$0xf0] }
  0xdb   : > { %v2084_v37 = vld [vmem:[%s2559_s26 + $0x270] sm:$0xf] }
  0xdc   : > { %1404 = vmatpush.bf16.msra.mxu2 %v1789_v52  ;;  %1417 = vmatpush.bf16.msra.mxu3 %v1793_v53  ;;  %v2225_v52 = vld [vmem:[%s2559_s26 + $0x2dc] sm:$0xf0]  ;;  %v2209_v53 = vld [vmem:[%s2559_s26 + $0x264] sm:$0xf] }
  0xdd   : > { %1378 = vmatpush.bf16.msra.mxu0 %v1781_v54  ;;  %1391 = vmatpush.bf16.msra.mxu1 %v1785_v55  ;;  %v2070_v54 = vld [vmem:[%s2559_s26 + $0x2e0] sm:$0xf0]  ;;  %v2077_v55 = vor.u32 %v2226_v47, %v2076_v46  ;;  %v2196_v46 = vld [vmem:[%s2559_s26 + $0x1f4] sm:$0xf0]  ;;  %v2180_v47 = vld [vmem:[%s2559_s26 + $0x17c] sm:$0xf] }
  0xdf   : > { %2116 = vmatmul.msk.bf16.vlgmr.msra.gmra.mxu2 %vm1062_vm1, %v2602_v50  ;;  %2117 = vmatmul.msk.bf16.vlgmr.msra.gmra.mxu3 %vm1062_vm1, %v2602_v50 }
  0xe0   : > { %1453 = vmatpush.bf16.msrb.mxu2 %v1134_v56  ;;  %1466 = vmatpush.bf16.msrb.mxu3 %v1137_v57  ;;  %v2081_v56 = vor.u32 %v2210_v48, %v2078_v49  ;;  %v501_v57 = vld [vmem:[%s2559_s26 + $0x378] sm:$0x77]  ;;  %v1956_v49 = vld [vmem:[%s2559_s26 + $0x170] sm:$0xf] }
  0xe1   : > { %1427 = vmatpush.bf16.msrb.mxu0 %v1128_v58  ;;  %1440 = vmatpush.bf16.msrb.mxu1 %v1131_v59  ;;  %v2069_v58 = vor.u32 %v2225_v52, %v2068_v51  ;;  %v2073_v59 = vor.u32 %v2209_v53, %v2070_v54  ;;  %v836_v2 = vunpack.c.l.b16 %v501_v57  ;;  %v837_v3 = vunpack.c.h.b16 %v501_v57  ;;  %v1966_v48 = vld [vmem:[%s2559_s26 + $0x1f8] sm:$0xf0]  ;;  %v2195_v51 = vld [vmem:[%s2559_s26 + $0x1ec] sm:$0xf0]  ;;  %v2179_v52 = vld [vmem:[%s2559_s26 + $0x174] sm:$0xf] }
  0xe2   : > { %2114 = vmatmul.msk.bf16.vlgmr.msra.gmra.mxu0 %vm1062_vm1, %v2602_v50  ;;  %2115 = vmatmul.msk.bf16.vlgmr.msra.gmra.mxu1 %vm1062_vm1, %v2602_v50  ;;  %v1958_v53 = vld [vmem:[%s2559_s26 + $0x1f0] sm:$0xf0]  ;;  %v2164_v57 = vld [vmem:[%s2559_s26 + $0xf4] sm:$0xf0] }
  0xe3   : > { %v964_v18 = vpack.c.b16 %v836_v2, %v836_v2  ;;  %v965_v19 = vpack.c.b16 %v837_v3, %v837_v3 }
  0xe4   : > { %1454 = vmatpush.bf16.msrb.mxu2 %v2061_v4  ;;  %1467 = vmatpush.bf16.msrb.mxu3 %v2065_v5  ;;  %v2193_v4 = vld [vmem:[%s2559_s26 + $0x1dc] sm:$0xf0]  ;;  %v2177_v5 = vld [vmem:[%s2559_s26 + $0x164] sm:$0xf] }
  0xe5   : > { %1428 = vmatpush.bf16.msrb.mxu0 %v2053_v7  ;;  %1441 = vmatpush.bf16.msrb.mxu1 %v2057_v8  ;;  %v834_v7 = vunpack.c.l.b16 %v500_v60  ;;  %v835_v8 = vunpack.c.h.b16 %v500_v60  ;;  %v1941_v13 = vor.u32 %v2193_v4, %v1940_v1  ;;  %v1945_v14 = vor.u32 %v2177_v5, %v1942_v6  ;;  %v2148_v60 = vld [vmem:[%s2559_s26 + $0x7c] sm:$0xf]  ;;  %v1830_v1 = vld [vmem:[%s2559_s26 + $0xf0] sm:$0xf0] }
  0xe6   : > { %v1158_v29 = vsel %vm1066_vm0, %v964_v18, 0  ;;  %v1161_v30 = vsel %vm1066_vm0, %v965_v19, 0  ;;  %v1841_v3 = vor.u32 %v2148_v60, %v1838_v61  ;;  %v1829_v4 = vor.u32 %v2163_v63, %v1828_v62 }
  0xe7   : > { %v963_v24 = vpack.c.b16 %v835_v8, %v835_v8  ;;  %v1833_v5 = vor.u32 %v2147_v0, %v1830_v1 }
  0xe8   : > { %1455 = vmatpush.bf16.msrb.mxu2 %v1933_v22  ;;  %1468 = vmatpush.bf16.msrb.mxu3 %v1937_v23  ;;  %v1814_v22 = vld [vmem:[%s2559_s26 + $0xe0] sm:$0xf0]  ;;  %v962_v23 = vpack.c.b16 %v834_v7, %v834_v7 }
  0xe9   : > { %1429 = vmatpush.bf16.msrb.mxu0 %v1925_v26  ;;  %1442 = vmatpush.bf16.msrb.mxu1 %v1929_v27  ;;  %v1825_v26 = vor.u32 %v2146_v15, %v1822_v16  ;;  %v1813_v27 = vor.u32 %v2161_v20, %v1812_v17  ;;  %v1817_v28 = vor.u32 %v2145_v21, %v1814_v22  ;;  %v1155_v32 = vsel %vm1066_vm0, %v963_v24, 0 }
  0xea   : > { %v1152_v31 = vsel %vm1066_vm0, %v962_v23, 0 }
  0xec   : > { %1456 = vmatpush.bf16.msrb.mxu2 %v1805_v38  ;;  %1469 = vmatpush.bf16.msrb.mxu3 %v1809_v39  ;;  %v2227_v38 = vld [vmem:[%s2559_s26 + $0x2ec] sm:$0xf0]  ;;  %v2211_v39 = vld [vmem:[%s2559_s26 + $0x274] sm:$0xf] }
  0xed   : > { %1430 = vmatpush.bf16.msrb.mxu0 %v1797_v40  ;;  %1443 = vmatpush.bf16.msrb.mxu1 %v1801_v41  ;;  %v2086_v40 = vld [vmem:[%s2559_s26 + $0x2f0] sm:$0xf0]  ;;  %v2093_v41 = vor.u32 %v2228_v34, %v2092_v33 }
  0xef   : > { %2120 = vmatmul.msk.bf16.vlgmr.msrb.gmra.mxu2 %vm1062_vm1, %v2602_v50  ;;  %2121 = vmatmul.msk.bf16.vlgmr.msrb.gmra.mxu3 %vm1062_vm1, %v2602_v50 }
  0xf0   : > { %1505 = vmatpush.bf16.msra.mxu2 %v1146_v42  ;;  %1518 = vmatpush.bf16.msra.mxu3 %v1149_v43  ;;  %v2097_v42 = vor.u32 %v2212_v35, %v2094_v36  ;;  %v2085_v43 = vor.u32 %v2227_v38, %v2084_v37 }
  0xf1   : > { %1479 = vmatpush.bf16.msra.mxu0 %v1140_v44  ;;  %1492 = vmatpush.bf16.msra.mxu1 %v1143_v45  ;;  %v2089_v44 = vor.u32 %v2211_v39, %v2086_v40  ;;  %v1964_v45 = vld [vmem:[%s2559_s26 + $0x178] sm:$0xf] }
  0xf2   : > { %2118 = vmatmul.msk.bf16.vlgmr.msrb.gmra.mxu0 %vm1062_vm1, %v2602_v50  ;;  %2119 = vmatmul.msk.bf16.vlgmr.msrb.gmra.mxu1 %vm1062_vm1, %v2602_v50  ;;  %v1965_v54 = vor.u32 %v2196_v46, %v1964_v45 }
  0xf4   : > { %1506 = vmatpush.bf16.msra.mxu2 %v2077_v55  ;;  %1519 = vmatpush.bf16.msra.mxu3 %v2081_v56  ;;  %v1969_v55 = vor.u32 %v2180_v47, %v1966_v48  ;;  %v1836_v56 = vld [vmem:[%s2559_s26 + $0x78] sm:$0xf] }
  0xf5   : > { %1480 = vmatpush.bf16.msra.mxu0 %v2069_v58  ;;  %1493 = vmatpush.bf16.msra.mxu1 %v2073_v59  ;;  %v1957_v58 = vor.u32 %v2195_v51, %v1956_v49  ;;  %v1961_v59 = vor.u32 %v2179_v52, %v1958_v53  ;;  %v1837_v2 = vor.u32 %v2164_v57, %v1836_v56 }
  0xf8   : > { %1507 = vmatpush.bf16.msra.mxu2 %v1949_v9  ;;  %1520 = vmatpush.bf16.msra.mxu3 %v1953_v10 }
  0xf9   : > { %1481 = vmatpush.bf16.msra.mxu0 %v1941_v13  ;;  %1494 = vmatpush.bf16.msra.mxu1 %v1945_v14 }
  0xfc   : > { %1508 = vmatpush.bf16.msra.mxu2 %v1821_v25  ;;  %1521 = vmatpush.bf16.msra.mxu3 %v1825_v26 }
  0xfd   : > { %1482 = vmatpush.bf16.msra.mxu0 %v1813_v27  ;;  %1495 = vmatpush.bf16.msra.mxu1 %v1817_v28 }
  0xff   : > { %2124 = vmatmul.msk.bf16.vlgmr.msra.gmra.mxu2 %vm1062_vm1, %v2602_v50  ;;  %2125 = vmatmul.msk.bf16.vlgmr.msra.gmra.mxu3 %vm1062_vm1, %v2602_v50 }
 0x100   : > { %1557 = vmatpush.bf16.msrb.mxu2 %v1158_v29  ;;  %1570 = vmatpush.bf16.msrb.mxu3 %v1161_v30 }
 0x101   : > { %1531 = vmatpush.bf16.msrb.mxu0 %v1152_v31  ;;  %1544 = vmatpush.bf16.msrb.mxu1 %v1155_v32 }
 0x102   : > { %2122 = vmatmul.msk.bf16.vlgmr.msra.gmra.mxu0 %vm1062_vm1, %v2602_v50  ;;  %2123 = vmatmul.msk.bf16.vlgmr.msra.gmra.mxu1 %vm1062_vm1, %v2602_v50 }
 0x104   : > { %1558 = vmatpush.bf16.msrb.mxu2 %v2093_v41  ;;  %1571 = vmatpush.bf16.msrb.mxu3 %v2097_v42 }
 0x105   : > { %1532 = vmatpush.bf16.msrb.mxu0 %v2085_v43  ;;  %1545 = vmatpush.bf16.msrb.mxu1 %v2089_v44 }
 0x108   : > { %1559 = vmatpush.bf16.msrb.mxu2 %v1965_v54  ;;  %1572 = vmatpush.bf16.msrb.mxu3 %v1969_v55 }
 0x109   : > { %1533 = vmatpush.bf16.msrb.mxu0 %v1957_v58  ;;  %1546 = vmatpush.bf16.msrb.mxu1 %v1961_v59 }
 0x10c   : > { %1560 = vmatpush.bf16.msrb.mxu2 %v1837_v2  ;;  %1573 = vmatpush.bf16.msrb.mxu3 %v1841_v3 }
 0x10d   : > { %1534 = vmatpush.bf16.msrb.mxu0 %v1829_v4  ;;  %1547 = vmatpush.bf16.msrb.mxu1 %v1833_v5 }
 0x10f   : > { %2128 = vmatmul.msk.bf16.vlgmr.msrb.gmra.mxu2 %vm1062_vm1, %v2602_v50  ;;  %2129 = vmatmul.msk.bf16.vlgmr.msrb.gmra.mxu3 %vm1062_vm1, %v2602_v50 }
 0x112   : > { %2126 = vmatmul.msk.bf16.vlgmr.msrb.gmra.mxu0 %vm1062_vm1, %v2602_v50  ;;  %2127 = vmatmul.msk.bf16.vlgmr.msrb.gmra.mxu1 %vm1062_vm1, %v2602_v50 }
 0x11b   : > { %v1172_v6 = vpop.f32.mrf.mxu0  ;;  %v1185_v7 = vpop.f32.mrf.mxu1 }
 0x11c   : > { %v1579_v8 = vmax.f32 %v1172_v6, 0.0  ;;  %v1580_v9 = vmax.f32 %v1185_v7, 0.0 }
 0x11e   : > { %1611 = vst [vmem:[%s2875_s5] sm:$0xff] %v1579_v8 }
 0x11f   : > { %1612 = vst [vmem:[%s2875_s5 + $0x8] sm:$0xff] %v1580_v9 }
 0x122   : > { %v1198_v50 = vpop.f32.mrf.mxu2  ;;  %v1211_v10 = vpop.f32.mrf.mxu3 }
 0x123   : > { %v1581_v11 = vmax.f32 %v1198_v50, 0.0  ;;  %v1582_v12 = vmax.f32 %v1211_v10, 0.0  ;;  %v1174_v13 = vpop.f32.mrf.mxu0  ;;  %v1187_v14 = vpop.f32.mrf.mxu1 }
 0x125   : > { %1613 = vst [vmem:[%s2875_s5 + $0x10] sm:$0xff] %v1581_v11 }
 0x126   : > { %1614 = vst [vmem:[%s2875_s5 + $0x18] sm:$0xff] %v1582_v12 }
 0x12a   : > { %v1200_v15 = vpop.f32.mrf.mxu2  ;;  %v1213_v16 = vpop.f32.mrf.mxu3 }
 0x12f   : > { %v1224_v17 = vpop.f32.mrf.mxu0  ;;  %v1237_v18 = vpop.f32.mrf.mxu1 }
 0x130   : > { %v1583_v19 = vmax.f32 %v1224_v17, 0.0  ;;  %v1584_v20 = vmax.f32 %v1237_v18, 0.0 }
 0x132   : > { %1615 = vst [vmem:[%s2875_s5 + $0x20] sm:$0xff] %v1583_v19  ;;  %v1250_v21 = vpop.f32.mrf.mxu2  ;;  %v1263_v22 = vpop.f32.mrf.mxu3 }
 0x133   : > { %1616 = vst [vmem:[%s2875_s5 + $0x28] sm:$0xff] %v1584_v20  ;;  %v1585_v23 = vmax.f32 %v1250_v21, 0.0  ;;  %v1586_v24 = vmax.f32 %v1263_v22, 0.0 }
 0x135   : > { %1617 = vst [vmem:[%s2875_s5 + $0x30] sm:$0xff] %v1585_v23 }
 0x136   : > { %1618 = vst [vmem:[%s2875_s5 + $0x38] sm:$0xff] %v1586_v24 }
 0x137   : > { %v1226_v25 = vpop.f32.mrf.mxu0  ;;  %v1239_v26 = vpop.f32.mrf.mxu1 }
 0x13a   : > { %v1252_v27 = vpop.f32.mrf.mxu2  ;;  %v1265_v28 = vpop.f32.mrf.mxu3 }
 0x13f   : > { %v1276_v29 = vpop.f32.mrf.mxu0  ;;  %v1289_v30 = vpop.f32.mrf.mxu1 }
 0x140   : > { %v1587_v31 = vmax.f32 %v1276_v29, 0.0  ;;  %v1588_v32 = vmax.f32 %v1289_v30, 0.0 }
 0x142   : > { %1619 = vst [vmem:[%s2875_s5 + $0x40] sm:$0xff] %v1587_v31  ;;  %v1302_v33 = vpop.f32.mrf.mxu2  ;;  %v1315_v34 = vpop.f32.mrf.mxu3 }
 0x143   : > { %1620 = vst [vmem:[%s2875_s5 + $0x48] sm:$0xff] %v1588_v32  ;;  %v1589_v35 = vmax.f32 %v1302_v33, 0.0  ;;  %v1590_v36 = vmax.f32 %v1315_v34, 0.0 }
 0x145   : > { %1621 = vst [vmem:[%s2875_s5 + $0x50] sm:$0xff] %v1589_v35 }
 0x146   : > { %1622 = vst [vmem:[%s2875_s5 + $0x58] sm:$0xff] %v1590_v36 }
 0x147   : > { %v1278_v37 = vpop.f32.mrf.mxu0  ;;  %v1291_v38 = vpop.f32.mrf.mxu1 }
 0x14a   : > { %v1304_v39 = vpop.f32.mrf.mxu2  ;;  %v1317_v40 = vpop.f32.mrf.mxu3 }
 0x14f   : > { %v1328_v41 = vpop.f32.mrf.mxu0  ;;  %v1341_v42 = vpop.f32.mrf.mxu1 }
 0x150   : > { %v1591_v43 = vmax.f32 %v1328_v41, 0.0  ;;  %v1592_v44 = vmax.f32 %v1341_v42, 0.0 }
 0x152   : > { %1623 = vst [vmem:[%s2875_s5 + $0x60] sm:$0xff] %v1591_v43  ;;  %v1354_v45 = vpop.f32.mrf.mxu2  ;;  %v1367_v46 = vpop.f32.mrf.mxu3 }
 0x153   : > { %1624 = vst [vmem:[%s2875_s5 + $0x68] sm:$0xff] %v1592_v44  ;;  %v1593_v47 = vmax.f32 %v1354_v45, 0.0  ;;  %v1594_v48 = vmax.f32 %v1367_v46, 0.0 }
 0x155   : > { %1625 = vst [vmem:[%s2875_s5 + $0x70] sm:$0xff] %v1593_v47 }
 0x156   : > { %1626 = vst [vmem:[%s2875_s5 + $0x78] sm:$0xff] %v1594_v48 }
 0x157   : > { %v1330_v49 = vpop.f32.mrf.mxu0  ;;  %v1343_v51 = vpop.f32.mrf.mxu1 }
 0x15a   : > { %v1356_v52 = vpop.f32.mrf.mxu2  ;;  %v1369_v53 = vpop.f32.mrf.mxu3 }
 0x15f   : > { %v1380_v54 = vpop.f32.mrf.mxu0  ;;  %v1393_v55 = vpop.f32.mrf.mxu1 }
 0x160   : > { %v1595_v56 = vmax.f32 %v1380_v54, 0.0  ;;  %v1596_v57 = vmax.f32 %v1393_v55, 0.0 }
 0x162   : > { %1627 = vst [vmem:[%s2875_s5 + $0x80] sm:$0xff] %v1595_v56  ;;  %v1406_v58 = vpop.f32.mrf.mxu2  ;;  %v1419_v59 = vpop.f32.mrf.mxu3 }
 0x163   : > { %1628 = vst [vmem:[%s2875_s5 + $0x88] sm:$0xff] %v1596_v57  ;;  %v1597_v60 = vmax.f32 %v1406_v58, 0.0  ;;  %v1598_v61 = vmax.f32 %v1419_v59, 0.0 }
 0x165   : > { %1629 = vst [vmem:[%s2875_s5 + $0x90] sm:$0xff] %v1597_v60 }
 0x166   : > { %1630 = vst [vmem:[%s2875_s5 + $0x98] sm:$0xff] %v1598_v61 }
 0x167   : > { %v1382_v62 = vpop.f32.mrf.mxu0  ;;  %v1395_v63 = vpop.f32.mrf.mxu1 }
 0x16a   : > { %v1408_v0 = vpop.f32.mrf.mxu2  ;;  %v1421_v1 = vpop.f32.mrf.mxu3 }
 0x16f   : > { %v1432_v2 = vpop.f32.mrf.mxu0  ;;  %v1445_v3 = vpop.f32.mrf.mxu1 }
 0x170   : > { %v1599_v4 = vmax.f32 %v1432_v2, 0.0  ;;  %v1600_v5 = vmax.f32 %v1445_v3, 0.0 }
 0x172   : > { %1631 = vst [vmem:[%s2875_s5 + $0xa0] sm:$0xff] %v1599_v4  ;;  %v1458_v6 = vpop.f32.mrf.mxu2  ;;  %v1471_v7 = vpop.f32.mrf.mxu3 }
 0x173   : > { %1632 = vst [vmem:[%s2875_s5 + $0xa8] sm:$0xff] %v1600_v5  ;;  %v1601_v8 = vmax.f32 %v1458_v6, 0.0  ;;  %v1602_v9 = vmax.f32 %v1471_v7, 0.0 }
 0x175   : > { %1633 = vst [vmem:[%s2875_s5 + $0xb0] sm:$0xff] %v1601_v8 }
 0x176   : > { %1634 = vst [vmem:[%s2875_s5 + $0xb8] sm:$0xff] %v1602_v9 }
 0x177   : > { %v1434_v50 = vpop.f32.mrf.mxu0  ;;  %v1447_v10 = vpop.f32.mrf.mxu1 }
 0x17a   : > { %v1460_v11 = vpop.f32.mrf.mxu2  ;;  %v1473_v12 = vpop.f32.mrf.mxu3 }
 0x17f   : > { %v1484_v13 = vpop.f32.mrf.mxu0  ;;  %v1497_v14 = vpop.f32.mrf.mxu1 }
 0x180   : > { %v1603_v15 = vmax.f32 %v1484_v13, 0.0  ;;  %v1604_v16 = vmax.f32 %v1497_v14, 0.0 }
 0x182   : > { %1635 = vst [vmem:[%s2875_s5 + $0xc0] sm:$0xff] %v1603_v15  ;;  %v1510_v17 = vpop.f32.mrf.mxu2  ;;  %v1523_v18 = vpop.f32.mrf.mxu3 }
 0x183   : > { %1636 = vst [vmem:[%s2875_s5 + $0xc8] sm:$0xff] %v1604_v16  ;;  %v1605_v19 = vmax.f32 %v1510_v17, 0.0  ;;  %v1606_v20 = vmax.f32 %v1523_v18, 0.0 }
 0x185   : > { %1637 = vst [vmem:[%s2875_s5 + $0xd0] sm:$0xff] %v1605_v19 }
 0x186   : > { %1638 = vst [vmem:[%s2875_s5 + $0xd8] sm:$0xff] %v1606_v20 }
 0x187   : > { %v1486_v21 = vpop.f32.mrf.mxu0  ;;  %v1499_v22 = vpop.f32.mrf.mxu1 }
 0x18a   : > { %v1512_v23 = vpop.f32.mrf.mxu2  ;;  %v1525_v24 = vpop.f32.mrf.mxu3 }
 0x18f   : > { %v1536_v25 = vpop.f32.mrf.mxu0  ;;  %v1549_v26 = vpop.f32.mrf.mxu1 }
 0x190   : > { %v1607_v27 = vmax.f32 %v1536_v25, 0.0  ;;  %v1608_v28 = vmax.f32 %v1549_v26, 0.0 }
 0x192   : > { %1639 = vst [vmem:[%s2875_s5 + $0xe0] sm:$0xff] %v1607_v27  ;;  %v1562_v29 = vpop.f32.mrf.mxu2  ;;  %v1575_v30 = vpop.f32.mrf.mxu3 }
 0x193   : > { %1640 = vst [vmem:[%s2875_s5 + $0xe8] sm:$0xff] %v1608_v28  ;;  %v1609_v31 = vmax.f32 %v1562_v29, 0.0  ;;  %v1610_v32 = vmax.f32 %v1575_v30, 0.0 }
 0x195   : > { %1641 = vst [vmem:[%s2875_s5 + $0xf0] sm:$0xff] %v1609_v31 }
 0x196   : > { %1642 = vst [vmem:[%s2875_s5 + $0xf8] sm:$0xff] %v1610_v32 }
 0x197   : > { %v1538_v33 = vpop.f32.mrf.mxu0  ;;  %v1551_v34 = vpop.f32.mrf.mxu1 }
 0x19a   : > { %v1564_v35 = vpop.f32.mrf.mxu2  ;;  %v1577_v36 = vpop.f32.mrf.mxu3 }
 0x19b PF: > { %p9_p9 = scmp.ge.s32.totalorder %s2311_s13, 4   ;;  %s2922_s9 = smov %s2273_s10 }
 0x19c   : > { %s2923_s10 = smov %s2320_s16  ;;  %s2924_s11 = smov %s2311_s13 }
 0x19d   :  { %11 = sbr.rel (!%p9_p9) target bundleno = 2 (0x2), region = 86 }

</bundles_post_ra>
